<compile_context>
chip_gen: v7x
topology: tpu7x:2x2x1
jax: 0.10.0
libtpu: 0.0.40
codegen_flags: <defaults>
</compile_context>

<pallas_src>
import functools

import jax
import jax.numpy as jnp
from jax import lax
from jax.experimental import pallas as pl
from jax.experimental.pallas import tpu as pltpu


def _round_up(x, m):
    return (x + m - 1) // m * m


# ----------------------------------------------------------------------------
# Kernel
# ----------------------------------------------------------------------------
def _bilstm_bn_fc_kernel(x_ref, *refs, num_layers, T, Bp, H, unroll):
    # ---- parse flat refs ----------------------------------------------------
    pos = 0
    layer_w = []
    for _l in range(num_layers):
        dirs = []
        for _d in range(2):                        # 0 = forward, 1 = backward
            dirs.append(tuple(refs[pos:pos + 3]))  # (w_ih_T, w_hh_T, bias)
            pos += 3
        layer_w.append(dirs)
    fc_w_ref = refs[pos]
    fc_b_ref = refs[pos + 1]
    out_ref = refs[pos + 2]
    gx_f_ref = refs[pos + 3]     # (T, Bp, 4H) fwd gate precompute
    gx_b_ref = refs[pos + 4]     # (T, Bp, 4H) bwd gate precompute
    seq_f_ref = refs[pos + 5]    # (T, Bp, H) layer outputs, forward direction
    seq_b_ref = refs[pos + 6]    # (T, Bp, H) layer outputs, backward direction

    f32 = jnp.float32
    zeros_h = jnp.zeros((Bp, H), f32)

    # Chunk the hoisted projection over time so its temporary stays ~<= 2 MiB.
    bytes_per_t = Bp * 4 * H * 4
    Tc = max(1, min(T, (2 * 1024 * 1024) // max(bytes_per_t, 1)))

    def split_gates(gates):
        i = jax.nn.sigmoid(gates[:, 0:H])
        f = jax.nn.sigmoid(gates[:, H:2 * H])
        g = jnp.tanh(gates[:, 2 * H:3 * H])
        o = jax.nn.sigmoid(gates[:, 3 * H:4 * H])
        return i, f, g, o

    def cell(gx_t, h, c, w_hh_T):
        gates = gx_t + jnp.dot(h, w_hh_T, preferred_element_type=f32)
        i, f, g, o = split_gates(gates)
        c_new = f * c + i * g
        h_new = o * jnp.tanh(c_new)
        return h_new, c_new

    def layer_input(l, t0, tc):
        """(tc*Bp, D_in_l) slab of layer l's input sequence."""
        if l == 0:
            return x_ref[pl.ds(t0, tc)].reshape(tc * Bp, x_ref.shape[2])
        return jnp.concatenate(
            [seq_f_ref[pl.ds(t0, tc)].reshape(tc * Bp, H),
             seq_b_ref[pl.ds(t0, tc)].reshape(tc * Bp, H)], axis=1)

    def layer_input_proj(l, d, dst_ref):
        """Hoisted whole-sequence input projection (+bias) -> dst_ref (T, Bp, 4H)."""
        w_ih_T_ref, _, b_ref = layer_w[l][d]
        w_ih_T = w_ih_T_ref[...]          # read once, reused across chunks
        b = b_ref[...]
        for t0 in range(0, T, Tc):        # static chunk loop
            tc = min(Tc, T - t0)
            gx = jnp.dot(layer_input(l, t0, tc), w_ih_T,
                         preferred_element_type=f32) + b
            dst_ref[pl.ds(t0, tc)] = gx.reshape(tc, Bp, 4 * H)

    h_f = zeros_h
    h_b = zeros_h
    for l in range(num_layers):
        last = (l == num_layers - 1)
        # Hoist recurrent weights out of the time loop: read once, close over values.
        whf = layer_w[l][0][1][...]

        layer_input_proj(l, 0, gx_f_ref)

        if not last:
            whb = layer_w[l][1][1][...]
            layer_input_proj(l, 1, gx_b_ref)
            # gx_f/gx_b have fully consumed seq_f/seq_b, so the recurrence below may
            # overwrite them in place (no ping-pong buffers needed).

            # Forward and backward recurrences are independent -> fuse into one loop
            # so their MXU/EUP/VPU work interleaves.
            def fused_step(s, carry, _whf=whf, _whb=whb):
                hf, cf, hb, cb = carry
                tb = T - 1 - s
                hf, cf = cell(gx_f_ref[s], hf, cf, _whf)
                seq_f_ref[s] = hf
                hb, cb = cell(gx_b_ref[tb], hb, cb, _whb)
                seq_b_ref[tb] = hb
                return hf, cf, hb, cb

            lax.fori_loop(0, T, fused_step,
                          (zeros_h, zeros_h, zeros_h, zeros_h), unroll=unroll)
        else:
            # Last layer, forward: full recurrence, no sequence stores.
            def fwd_step(s, carry, _whf=whf):
                return cell(gx_f_ref[s], carry[0], carry[1], _whf)

            h_f, _ = lax.fori_loop(0, T, fwd_step, (zeros_h, zeros_h),
                                   unroll=unroll)

            # Last layer, backward: out[:, -1, H:] is the reverse hidden after a single
            # step on input t = T-1 with zero state (h0 @ W_hh == 0, f * c0 == 0).
            w_ih_bT_ref, _, b_b_ref = layer_w[l][1]
            gates = (jnp.dot(layer_input(l, T - 1, 1), w_ih_bT_ref[...],
                             preferred_element_type=f32) + b_b_ref[...])
            i, f, g, o = split_gates(gates)
            h_b = o * jnp.tanh(i * g)

    last_cat = jnp.concatenate([h_f, h_b], axis=1)            # (Bp, 2H)
    # BatchNorm1d (inference) already folded into fc_w/fc_b by the wrapper;
    # Dropout(0.2) is identity at inference.
    out_ref[...] = (jnp.dot(last_cat, fc_w_ref[...], preferred_element_type=f32)
                    + fc_b_ref[...])


# ----------------------------------------------------------------------------
# Wrapper
# ----------------------------------------------------------------------------
@functools.partial(jax.jit, static_argnames=("num_layers", "hidden_size", "num_classes"))
def model6_forward(x, params, *, num_layers, hidden_size, num_classes):
    """x: (batch, seq, input_size) float32, batch_first like the PyTorch module."""
    eps = 1e-5
    B, T, _ = x.shape
    H = hidden_size
    Bp = _round_up(max(B, 8), 8)            # sublane-pad the batch
    Cp = _round_up(num_classes, 128)        # lane-dense output slab
    f32 = jnp.float32

    x_tm = jnp.transpose(x, (1, 0, 2)).astype(f32)   # time-major (T, B, Din)
    x_tm = jnp.pad(x_tm, ((0, 0), (0, Bp - B), (0, 0)))

    flat = [x_tm]
    for l in range(num_layers):
        for d in range(2):
            w_ih, w_hh, b_ih, b_hh = params[f"layer{l}"][d]
            flat += [w_ih.T.astype(f32),                         # (Din_l, 4H)
                     w_hh.T.astype(f32),                         # (H, 4H)
                     (b_ih + b_hh)[None, :].astype(f32)]         # (1, 4H) folded bias

    # Fold BatchNorm1d (inference, running stats) into the FC layer.
    gamma, beta, mean, var = params["bn"]
    inv = gamma.astype(f32) / jnp.sqrt(var.astype(f32) + eps)
    fc_w, fc_b = params["fc"]
    fc_wT = fc_w.T.astype(f32)                                   # (2H, C)
    fc_w_eff = inv[:, None] * fc_wT
    fc_b_eff = (beta.astype(f32) - mean.astype(f32) * inv) @ fc_wT + fc_b.astype(f32)
    fc_w_pad = jnp.zeros((2 * H, Cp), f32).at[:, :num_classes].set(fc_w_eff)
    fc_b_pad = jnp.zeros((1, Cp), f32).at[0, :num_classes].set(fc_b_eff)
    flat += [fc_w_pad, fc_b_pad]

    # VMEM budget from the actual footprint (inputs + output + scratch) with headroom
    # for compiler temporaries / the chunked projection temp.
    scratch_elems = 2 * T * Bp * 4 * H + 2 * T * Bp * H
    in_elems = sum(int(a.size) for a in flat)
    vmem_bytes = 4 * (in_elems + Bp * Cp + scratch_elems)
    vmem_limit = int(min(64 * 1024 * 1024, 2 * vmem_bytes + (8 << 20)))

    unroll = True if T <= 32 else 8        # cap unroll for long sequences

    kernel = functools.partial(_bilstm_bn_fc_kernel, num_layers=num_layers,
                               T=T, Bp=Bp, H=H, unroll=unroll)

    out = pl.pallas_call(
        kernel,
        out_shape=jax.ShapeDtypeStruct((Bp, Cp), f32),
        in_specs=[pl.BlockSpec(memory_space=pltpu.MemorySpace.VMEM)] * len(flat),
        out_specs=pl.BlockSpec(memory_space=pltpu.MemorySpace.VMEM),
        scratch_shapes=[
            pltpu.VMEM((T, Bp, 4 * H), jnp.float32),   # gx forward
            pltpu.VMEM((T, Bp, 4 * H), jnp.float32),   # gx backward
            pltpu.VMEM((T, Bp, H), jnp.float32),       # seq forward
            pltpu.VMEM((T, Bp, H), jnp.float32),       # seq backward
        ],
        compiler_params=pltpu.CompilerParams(vmem_limit_bytes=vmem_limit),
    )(*flat)
    return out[:B, :num_classes]


# ----------------------------------------------------------------------------
# Pure-JAX reference (mirrors PyTorch bidirectional nn.LSTM + BN(eval) + Linear)
# ----------------------------------------------------------------------------
def model6_ref(x, params, *, num_layers, hidden_size, eps=1e-5):
    B, T, _ = x.shape
    H = hidden_size
    seq = x.astype(jnp.float32)
    for l in range(num_layers):
        outs = []
        for d in range(2):
            w_ih, w_hh, b_ih, b_hh = params[f"layer{l}"][d]
            h = jnp.zeros((B, H), jnp.float32)
            c = jnp.zeros((B, H), jnp.float32)
            ys = [None] * T
            order = range(T) if d == 0 else range(T - 1, -1, -1)
            for t in order:
                gates = seq[:, t, :] @ w_ih.T + b_ih + h @ w_hh.T + b_hh
                i, f, g, o = jnp.split(gates, 4, axis=1)
                i, f, o = jax.nn.sigmoid(i), jax.nn.sigmoid(f), jax.nn.sigmoid(o)
                g = jnp.tanh(g)
                c = f * c + i * g
                h = o * jnp.tanh(c)
                ys[t] = h
            outs.append(jnp.stack(ys, axis=1))
        seq = jnp.concatenate(outs, axis=2)                    # (B, T, 2H)
    last = seq[:, -1, :]
    gamma, beta, mean, var = params["bn"]
    y = (last - mean) / jnp.sqrt(var + eps) * gamma + beta     # BN eval; dropout identity
    fc_w, fc_b = params["fc"]
    return y @ fc_w.T + fc_b


def init_params(key, *, input_size, hidden_size, num_layers, num_classes):
    """PyTorch-shaped parameters: per layer, (fwd, bwd) of (w_ih, w_hh, b_ih, b_hh)."""
    H = hidden_size
    k = 1.0 / (H ** 0.5)
    params = {}
    for l in range(num_layers):
        d_in = input_size if l == 0 else 2 * H
        dirs = []
        for _ in range(2):
            key, k1, k2, k3, k4 = jax.random.split(key, 5)
            dirs.append((
                jax.random.uniform(k1, (4 * H, d_in), jnp.float32, -k, k),
                jax.random.uniform(k2, (4 * H, H), jnp.float32, -k, k),
                jax.random.uniform(k3, (4 * H,), jnp.float32, -k, k),
                jax.random.uniform(k4, (4 * H,), jnp.float32, -k, k),
            ))
        params[f"layer{l}"] = tuple(dirs)
    key, kg, kb, km, kv = jax.random.split(key, 5)
    params["bn"] = (                                           # nontrivial BN stats
        1.0 + 0.1 * jax.random.normal(kg, (2 * H,), jnp.float32),   # gamma
        0.1 * jax.random.normal(kb, (2 * H,), jnp.float32),          # beta
        0.1 * jax.random.normal(km, (2 * H,), jnp.float32),          # running_mean
        1.0 + 0.1 * jax.random.uniform(kv, (2 * H,), jnp.float32),   # running_var
    )
    key, k1, k2 = jax.random.split(key, 3)
    params["fc"] = (
        jax.random.uniform(k1, (num_classes, 2 * H), jnp.float32, -k, k),
        jax.random.uniform(k2, (num_classes,), jnp.float32, -k, k),
    )
    return params


if __name__ == "__main__":
    batch, seq_len = 2, 8
    input_size, hidden_size, num_layers, num_classes = 16, 32, 2, 4

    root = jax.random.PRNGKey(0)
    k_x, k_p = jax.random.split(root)
    x = jax.random.normal(k_x, (batch, seq_len, input_size), jnp.float32)
    params = init_params(k_p, input_size=input_size, hidden_size=hidden_size,
                         num_layers=num_layers, num_classes=num_classes)

    out = model6_forward(x, params, num_layers=num_layers,
                         hidden_size=hidden_size, num_classes=num_classes)
    out = jax.block_until_ready(out)

    ref = model6_ref(x, params, num_layers=num_layers, hidden_size=hidden_size)
    assert out.shape == (batch, num_classes)
    assert jnp.allclose(out, ref, rtol=1e-4, atol=1e-4), (out, ref)

    print("KERNEL_OK")
</pallas_src>

<mosaic_0001>
module attributes {stable_mosaic.version = 11 : i64} {
  func.func @_bilstm_bn_fc_kernel(%arg0: memref<8x8x16xf32, #tpu.memory_space<vmem>>, %arg1: memref<16x128xf32, #tpu.memory_space<vmem>>, %arg2: memref<32x128xf32, #tpu.memory_space<vmem>>, %arg3: memref<1x128xf32, #tpu.memory_space<vmem>>, %arg4: memref<16x128xf32, #tpu.memory_space<vmem>>, %arg5: memref<32x128xf32, #tpu.memory_space<vmem>>, %arg6: memref<1x128xf32, #tpu.memory_space<vmem>>, %arg7: memref<64x128xf32, #tpu.memory_space<vmem>>, %arg8: memref<32x128xf32, #tpu.memory_space<vmem>>, %arg9: memref<1x128xf32, #tpu.memory_space<vmem>>, %arg10: memref<64x128xf32, #tpu.memory_space<vmem>>, %arg11: memref<32x128xf32, #tpu.memory_space<vmem>>, %arg12: memref<1x128xf32, #tpu.memory_space<vmem>>, %arg13: memref<64x128xf32, #tpu.memory_space<vmem>>, %arg14: memref<1x128xf32, #tpu.memory_space<vmem>>, %arg15: memref<8x128xf32, #tpu.memory_space<vmem>>, %arg16: memref<8x8x128xf32, #tpu.memory_space<vmem>>, %arg17: memref<8x8x128xf32, #tpu.memory_space<vmem>>, %arg18: memref<8x8x32xf32, #tpu.memory_space<vmem>>, %arg19: memref<8x8x32xf32, #tpu.memory_space<vmem>>) attributes {dimension_semantics = [], scalar_prefetch = 0 : i64, scratch_operands = 4 : i64, tpu.core_type = #tpu.core_type<tc>} {
    %cst = arith.constant 0.000000e+00 : f32
    %0 = vector.broadcast %cst : f32 to vector<8x32xf32>
    %c0 = arith.constant 0 : index
    %c0_0 = arith.constant 0 : index
    %1 = vector.load %arg2[%c0, %c0_0] : memref<32x128xf32, #tpu.memory_space<vmem>>, vector<32x128xf32>
    %c0_1 = arith.constant 0 : index
    %c0_2 = arith.constant 0 : index
    %2 = vector.load %arg1[%c0_1, %c0_2] : memref<16x128xf32, #tpu.memory_space<vmem>>, vector<16x128xf32>
    %c0_3 = arith.constant 0 : index
    %c0_4 = arith.constant 0 : index
    %3 = vector.load %arg3[%c0_3, %c0_4] : memref<1x128xf32, #tpu.memory_space<vmem>>, vector<1x128xf32>
    %c0_5 = arith.constant 0 : index
    %c0_6 = arith.constant 0 : index
    %c0_7 = arith.constant 0 : index
    %4 = vector.load %arg0[%c0_5, %c0_6, %c0_7] : memref<8x8x16xf32, #tpu.memory_space<vmem>>, vector<8x8x16xf32>
    %5 = vector.shape_cast %4 : vector<8x8x16xf32> to vector<64x16xf32>
    %cst_8 = arith.constant dense<0.000000e+00> : vector<64x128xf32>
    %6 = tpu.matmul %5, %2, %cst_8 {dimension_numbers = #tpu.dot_dimension_numbers<[1], [0], [0], [1], [0, 0, 1, 1], [], []>} : vector<64x16xf32>, vector<16x128xf32>, vector<64x128xf32> -> vector<64x128xf32>
    %7 = vector.broadcast %3 : vector<1x128xf32> to vector<64x128xf32>
    %8 = arith.addf %6, %7 : vector<64x128xf32>
    %9 = vector.shape_cast %8 : vector<64x128xf32> to vector<8x8x128xf32>
    %c0_9 = arith.constant 0 : index
    %c0_10 = arith.constant 0 : index
    %c0_11 = arith.constant 0 : index
    %10 = vector.load %arg16[%c0_9, %c0_10, %c0_11] : memref<8x8x128xf32, #tpu.memory_space<vmem>>, vector<8x8x128xf32>
    tpu.vector_store %arg16[%c0_9, %c0_10, %c0_11], %9 {strides = array<i32>} : memref<8x8x128xf32, #tpu.memory_space<vmem>>, vector<8x8x128xf32>,
    %c0_12 = arith.constant 0 : index
    %c0_13 = arith.constant 0 : index
    %11 = vector.load %arg5[%c0_12, %c0_13] : memref<32x128xf32, #tpu.memory_space<vmem>>, vector<32x128xf32>
    %c0_14 = arith.constant 0 : index
    %c0_15 = arith.constant 0 : index
    %12 = vector.load %arg4[%c0_14, %c0_15] : memref<16x128xf32, #tpu.memory_space<vmem>>, vector<16x128xf32>
    %c0_16 = arith.constant 0 : index
    %c0_17 = arith.constant 0 : index
    %13 = vector.load %arg6[%c0_16, %c0_17] : memref<1x128xf32, #tpu.memory_space<vmem>>, vector<1x128xf32>
    %c0_18 = arith.constant 0 : index
    %c0_19 = arith.constant 0 : index
    %c0_20 = arith.constant 0 : index
    %14 = vector.load %arg0[%c0_18, %c0_19, %c0_20] : memref<8x8x16xf32, #tpu.memory_space<vmem>>, vector<8x8x16xf32>
    %15 = vector.shape_cast %14 : vector<8x8x16xf32> to vector<64x16xf32>
    %cst_21 = arith.constant dense<0.000000e+00> : vector<64x128xf32>
    %16 = tpu.matmul %15, %12, %cst_21 {dimension_numbers = #tpu.dot_dimension_numbers<[1], [0], [0], [1], [0, 0, 1, 1], [], []>} : vector<64x16xf32>, vector<16x128xf32>, vector<64x128xf32> -> vector<64x128xf32>
    %17 = vector.broadcast %13 : vector<1x128xf32> to vector<64x128xf32>
    %18 = arith.addf %16, %17 : vector<64x128xf32>
    %19 = vector.shape_cast %18 : vector<64x128xf32> to vector<8x8x128xf32>
    %c0_22 = arith.constant 0 : index
    %c0_23 = arith.constant 0 : index
    %c0_24 = arith.constant 0 : index
    %20 = vector.load %arg17[%c0_22, %c0_23, %c0_24] : memref<8x8x128xf32, #tpu.memory_space<vmem>>, vector<8x8x128xf32>
    tpu.vector_store %arg17[%c0_22, %c0_23, %c0_24], %19 {strides = array<i32>} : memref<8x8x128xf32, #tpu.memory_space<vmem>>, vector<8x8x128xf32>,
    %c0_i32 = arith.constant 0 : i32
    %c7_i32 = arith.constant 7 : i32
    %21 = arith.subi %c7_i32, %c0_i32 : i32
    %22 = arith.index_cast %c0_i32 : i32 to index
    %c0_25 = arith.constant 0 : index
    %c0_26 = arith.constant 0 : index
    %23 = vector.load %arg16[%22, %c0_25, %c0_26] : memref<8x8x128xf32, #tpu.memory_space<vmem>>, vector<1x8x128xf32>
    %24 = vector.shape_cast %23 : vector<1x8x128xf32> to vector<8x128xf32>
    %cst_27 = arith.constant dense<0.000000e+00> : vector<8x128xf32>
    %25 = tpu.matmul %0, %1, %cst_27 {dimension_numbers = #tpu.dot_dimension_numbers<[1], [0], [0], [1], [0, 0, 1, 1], [], []>} : vector<8x32xf32>, vector<32x128xf32>, vector<8x128xf32> -> vector<8x128xf32>
    %26 = arith.addf %24, %25 : vector<8x128xf32>
    %27 = vector.extract_strided_slice %26 {offsets = [0, 0], sizes = [8, 32], strides = [1, 1]} : vector<8x128xf32> to vector<8x32xf32>
    %28 = arith.negf %27 : vector<8x32xf32>
    %29 = math.exp %28 : vector<8x32xf32>
    %cst_28 = arith.constant 1.000000e+00 : f32
    %30 = vector.broadcast %cst_28 : f32 to vector<8x32xf32>
    %31 = arith.addf %30, %29 : vector<8x32xf32>
    %32 = arith.divf %30, %31 : vector<8x32xf32>
    %33 = vector.extract_strided_slice %26 {offsets = [0, 32], sizes = [8, 32], strides = [1, 1]} : vector<8x128xf32> to vector<8x32xf32>
    %34 = arith.negf %33 : vector<8x32xf32>
    %35 = math.exp %34 : vector<8x32xf32>
    %cst_29 = arith.constant 1.000000e+00 : f32
    %36 = vector.broadcast %cst_29 : f32 to vector<8x32xf32>
    %37 = arith.addf %36, %35 : vector<8x32xf32>
    %38 = arith.divf %36, %37 : vector<8x32xf32>
    %39 = vector.extract_strided_slice %26 {offsets = [0, 64], sizes = [8, 32], strides = [1, 1]} : vector<8x128xf32> to vector<8x32xf32>
    %40 = math.tanh %39 : vector<8x32xf32>
    %41 = vector.extract_strided_slice %26 {offsets = [0, 96], sizes = [8, 32], strides = [1, 1]} : vector<8x128xf32> to vector<8x32xf32>
    %42 = arith.negf %41 : vector<8x32xf32>
    %43 = math.exp %42 : vector<8x32xf32>
    %cst_30 = arith.constant 1.000000e+00 : f32
    %44 = vector.broadcast %cst_30 : f32 to vector<8x32xf32>
    %45 = arith.addf %44, %43 : vector<8x32xf32>
    %46 = arith.divf %44, %45 : vector<8x32xf32>
    %47 = arith.mulf %38, %0 : vector<8x32xf32>
    %48 = arith.mulf %32, %40 : vector<8x32xf32>
    %49 = arith.addf %47, %48 : vector<8x32xf32>
    %50 = math.tanh %49 : vector<8x32xf32>
    %51 = arith.mulf %46, %50 : vector<8x32xf32>
    %52 = arith.index_cast %c0_i32 : i32 to index
    %c0_31 = arith.constant 0 : index
    %c0_32 = arith.constant 0 : index
    %53 = vector.load %arg18[%52, %c0_31, %c0_32] : memref<8x8x32xf32, #tpu.memory_space<vmem>>, vector<1x8x32xf32>
    %54 = vector.shape_cast %53 : vector<1x8x32xf32> to vector<8x32xf32>
    %55 = vector.shape_cast %51 : vector<8x32xf32> to vector<1x8x32xf32>
    tpu.vector_store %arg18[%52, %c0_31, %c0_32], %55 {strides = array<i32>} : memref<8x8x32xf32, #tpu.memory_space<vmem>>, vector<1x8x32xf32>,
    %56 = arith.index_cast %21 : i32 to index
    %c0_33 = arith.constant 0 : index
    %c0_34 = arith.constant 0 : index
    %57 = vector.load %arg17[%56, %c0_33, %c0_34] : memref<8x8x128xf32, #tpu.memory_space<vmem>>, vector<1x8x128xf32>
    %58 = vector.shape_cast %57 : vector<1x8x128xf32> to vector<8x128xf32>
    %cst_35 = arith.constant dense<0.000000e+00> : vector<8x128xf32>
    %59 = tpu.matmul %0, %11, %cst_35 {dimension_numbers = #tpu.dot_dimension_numbers<[1], [0], [0], [1], [0, 0, 1, 1], [], []>} : vector<8x32xf32>, vector<32x128xf32>, vector<8x128xf32> -> vector<8x128xf32>
    %60 = arith.addf %58, %59 : vector<8x128xf32>
    %61 = vector.extract_strided_slice %60 {offsets = [0, 0], sizes = [8, 32], strides = [1, 1]} : vector<8x128xf32> to vector<8x32xf32>
    %62 = arith.negf %61 : vector<8x32xf32>
    %63 = math.exp %62 : vector<8x32xf32>
    %cst_36 = arith.constant 1.000000e+00 : f32
    %64 = vector.broadcast %cst_36 : f32 to vector<8x32xf32>
    %65 = arith.addf %64, %63 : vector<8x32xf32>
    %66 = arith.divf %64, %65 : vector<8x32xf32>
    %67 = vector.extract_strided_slice %60 {offsets = [0, 32], sizes = [8, 32], strides = [1, 1]} : vector<8x128xf32> to vector<8x32xf32>
    %68 = arith.negf %67 : vector<8x32xf32>
    %69 = math.exp %68 : vector<8x32xf32>
    %cst_37 = arith.constant 1.000000e+00 : f32
    %70 = vector.broadcast %cst_37 : f32 to vector<8x32xf32>
    %71 = arith.addf %70, %69 : vector<8x32xf32>
    %72 = arith.divf %70, %71 : vector<8x32xf32>
    %73 = vector.extract_strided_slice %60 {offsets = [0, 64], sizes = [8, 32], strides = [1, 1]} : vector<8x128xf32> to vector<8x32xf32>
    %74 = math.tanh %73 : vector<8x32xf32>
    %75 = vector.extract_strided_slice %60 {offsets = [0, 96], sizes = [8, 32], strides = [1, 1]} : vector<8x128xf32> to vector<8x32xf32>
    %76 = arith.negf %75 : vector<8x32xf32>
    %77 = math.exp %76 : vector<8x32xf32>
    %cst_38 = arith.constant 1.000000e+00 : f32
    %78 = vector.broadcast %cst_38 : f32 to vector<8x32xf32>
    %79 = arith.addf %78, %77 : vector<8x32xf32>
    %80 = arith.divf %78, %79 : vector<8x32xf32>
    %81 = arith.mulf %72, %0 : vector<8x32xf32>
    %82 = arith.mulf %66, %74 : vector<8x32xf32>
    %83 = arith.addf %81, %82 : vector<8x32xf32>
    %84 = math.tanh %83 : vector<8x32xf32>
    %85 = arith.mulf %80, %84 : vector<8x32xf32>
    %86 = arith.index_cast %21 : i32 to index
    %c0_39 = arith.constant 0 : index
    %c0_40 = arith.constant 0 : index
    %87 = vector.load %arg19[%86, %c0_39, %c0_40] : memref<8x8x32xf32, #tpu.memory_space<vmem>>, vector<1x8x32xf32>
    %88 = vector.shape_cast %87 : vector<1x8x32xf32> to vector<8x32xf32>
    %89 = vector.shape_cast %85 : vector<8x32xf32> to vector<1x8x32xf32>
    tpu.vector_store %arg19[%86, %c0_39, %c0_40], %89 {strides = array<i32>} : memref<8x8x32xf32, #tpu.memory_space<vmem>>, vector<1x8x32xf32>,
    %c1_i32 = arith.constant 1 : i32
    %c7_i32_41 = arith.constant 7 : i32
    %90 = arith.subi %c7_i32_41, %c1_i32 : i32
    %91 = arith.index_cast %c1_i32 : i32 to index
    %c0_42 = arith.constant 0 : index
    %c0_43 = arith.constant 0 : index
    %92 = vector.load %arg16[%91, %c0_42, %c0_43] : memref<8x8x128xf32, #tpu.memory_space<vmem>>, vector<1x8x128xf32>
    %93 = vector.shape_cast %92 : vector<1x8x128xf32> to vector<8x128xf32>
    %cst_44 = arith.constant dense<0.000000e+00> : vector<8x128xf32>
    %94 = tpu.matmul %51, %1, %cst_44 {dimension_numbers = #tpu.dot_dimension_numbers<[1], [0], [0], [1], [0, 0, 1, 1], [], []>} : vector<8x32xf32>, vector<32x128xf32>, vector<8x128xf32> -> vector<8x128xf32>
    %95 = arith.addf %93, %94 : vector<8x128xf32>
    %96 = vector.extract_strided_slice %95 {offsets = [0, 0], sizes = [8, 32], strides = [1, 1]} : vector<8x128xf32> to vector<8x32xf32>
    %97 = arith.negf %96 : vector<8x32xf32>
    %98 = math.exp %97 : vector<8x32xf32>
    %cst_45 = arith.constant 1.000000e+00 : f32
    %99 = vector.broadcast %cst_45 : f32 to vector<8x32xf32>
    %100 = arith.addf %99, %98 : vector<8x32xf32>
    %101 = arith.divf %99, %100 : vector<8x32xf32>
    %102 = vector.extract_strided_slice %95 {offsets = [0, 32], sizes = [8, 32], strides = [1, 1]} : vector<8x128xf32> to vector<8x32xf32>
    %103 = arith.negf %102 : vector<8x32xf32>
    %104 = math.exp %103 : vector<8x32xf32>
    %cst_46 = arith.constant 1.000000e+00 : f32
    %105 = vector.broadcast %cst_46 : f32 to vector<8x32xf32>
    %106 = arith.addf %105, %104 : vector<8x32xf32>
    %107 = arith.divf %105, %106 : vector<8x32xf32>
    %108 = vector.extract_strided_slice %95 {offsets = [0, 64], sizes = [8, 32], strides = [1, 1]} : vector<8x128xf32> to vector<8x32xf32>
    %109 = math.tanh %108 : vector<8x32xf32>
    %110 = vector.extract_strided_slice %95 {offsets = [0, 96], sizes = [8, 32], strides = [1, 1]} : vector<8x128xf32> to vector<8x32xf32>
    %111 = arith.negf %110 : vector<8x32xf32>
    %112 = math.exp %111 : vector<8x32xf32>
    %cst_47 = arith.constant 1.000000e+00 : f32
    %113 = vector.broadcast %cst_47 : f32 to vector<8x32xf32>
    %114 = arith.addf %113, %112 : vector<8x32xf32>
    %115 = arith.divf %113, %114 : vector<8x32xf32>
    %116 = arith.mulf %107, %49 : vector<8x32xf32>
    %117 = arith.mulf %101, %109 : vector<8x32xf32>
    %118 = arith.addf %116, %117 : vector<8x32xf32>
    %119 = math.tanh %118 : vector<8x32xf32>
    %120 = arith.mulf %115, %119 : vector<8x32xf32>
    %121 = arith.index_cast %c1_i32 : i32 to index
    %c0_48 = arith.constant 0 : index
    %c0_49 = arith.constant 0 : index
    %122 = vector.load %arg18[%121, %c0_48, %c0_49] : memref<8x8x32xf32, #tpu.memory_space<vmem>>, vector<1x8x32xf32>
    %123 = vector.shape_cast %122 : vector<1x8x32xf32> to vector<8x32xf32>
    %124 = vector.shape_cast %120 : vector<8x32xf32> to vector<1x8x32xf32>
    tpu.vector_store %arg18[%121, %c0_48, %c0_49], %124 {strides = array<i32>} : memref<8x8x32xf32, #tpu.memory_space<vmem>>, vector<1x8x32xf32>,
    %125 = arith.index_cast %90 : i32 to index
    %c0_50 = arith.constant 0 : index
    %c0_51 = arith.constant 0 : index
    %126 = vector.load %arg17[%125, %c0_50, %c0_51] : memref<8x8x128xf32, #tpu.memory_space<vmem>>, vector<1x8x128xf32>
    %127 = vector.shape_cast %126 : vector<1x8x128xf32> to vector<8x128xf32>
    %cst_52 = arith.constant dense<0.000000e+00> : vector<8x128xf32>
    %128 = tpu.matmul %85, %11, %cst_52 {dimension_numbers = #tpu.dot_dimension_numbers<[1], [0], [0], [1], [0, 0, 1, 1], [], []>} : vector<8x32xf32>, vector<32x128xf32>, vector<8x128xf32> -> vector<8x128xf32>
    %129 = arith.addf %127, %128 : vector<8x128xf32>
    %130 = vector.extract_strided_slice %129 {offsets = [0, 0], sizes = [8, 32], strides = [1, 1]} : vector<8x128xf32> to vector<8x32xf32>
    %131 = arith.negf %130 : vector<8x32xf32>
    %132 = math.exp %131 : vector<8x32xf32>
    %cst_53 = arith.constant 1.000000e+00 : f32
    %133 = vector.broadcast %cst_53 : f32 to vector<8x32xf32>
    %134 = arith.addf %133, %132 : vector<8x32xf32>
    %135 = arith.divf %133, %134 : vector<8x32xf32>
    %136 = vector.extract_strided_slice %129 {offsets = [0, 32], sizes = [8, 32], strides = [1, 1]} : vector<8x128xf32> to vector<8x32xf32>
    %137 = arith.negf %136 : vector<8x32xf32>
    %138 = math.exp %137 : vector<8x32xf32>
    %cst_54 = arith.constant 1.000000e+00 : f32
    %139 = vector.broadcast %cst_54 : f32 to vector<8x32xf32>
    %140 = arith.addf %139, %138 : vector<8x32xf32>
    %141 = arith.divf %139, %140 : vector<8x32xf32>
    %142 = vector.extract_strided_slice %129 {offsets = [0, 64], sizes = [8, 32], strides = [1, 1]} : vector<8x128xf32> to vector<8x32xf32>
    %143 = math.tanh %142 : vector<8x32xf32>
    %144 = vector.extract_strided_slice %129 {offsets = [0, 96], sizes = [8, 32], strides = [1, 1]} : vector<8x128xf32> to vector<8x32xf32>
    %145 = arith.negf %144 : vector<8x32xf32>
    %146 = math.exp %145 : vector<8x32xf32>
    %cst_55 = arith.constant 1.000000e+00 : f32
    %147 = vector.broadcast %cst_55 : f32 to vector<8x32xf32>
    %148 = arith.addf %147, %146 : vector<8x32xf32>
    %149 = arith.divf %147, %148 : vector<8x32xf32>
    %150 = arith.mulf %141, %83 : vector<8x32xf32>
    %151 = arith.mulf %135, %143 : vector<8x32xf32>
    %152 = arith.addf %150, %151 : vector<8x32xf32>
    %153 = math.tanh %152 : vector<8x32xf32>
    %154 = arith.mulf %149, %153 : vector<8x32xf32>
    %155 = arith.index_cast %90 : i32 to index
    %c0_56 = arith.constant 0 : index
    %c0_57 = arith.constant 0 : index
    %156 = vector.load %arg19[%155, %c0_56, %c0_57] : memref<8x8x32xf32, #tpu.memory_space<vmem>>, vector<1x8x32xf32>
    %157 = vector.shape_cast %156 : vector<1x8x32xf32> to vector<8x32xf32>
    %158 = vector.shape_cast %154 : vector<8x32xf32> to vector<1x8x32xf32>
    tpu.vector_store %arg19[%155, %c0_56, %c0_57], %158 {strides = array<i32>} : memref<8x8x32xf32, #tpu.memory_space<vmem>>, vector<1x8x32xf32>,
    %c2_i32 = arith.constant 2 : i32
    %c7_i32_58 = arith.constant 7 : i32
    %159 = arith.subi %c7_i32_58, %c2_i32 : i32
    %160 = arith.index_cast %c2_i32 : i32 to index
    %c0_59 = arith.constant 0 : index
    %c0_60 = arith.constant 0 : index
    %161 = vector.load %arg16[%160, %c0_59, %c0_60] : memref<8x8x128xf32, #tpu.memory_space<vmem>>, vector<1x8x128xf32>
    %162 = vector.shape_cast %161 : vector<1x8x128xf32> to vector<8x128xf32>
    %cst_61 = arith.constant dense<0.000000e+00> : vector<8x128xf32>
    %163 = tpu.matmul %120, %1, %cst_61 {dimension_numbers = #tpu.dot_dimension_numbers<[1], [0], [0], [1], [0, 0, 1, 1], [], []>} : vector<8x32xf32>, vector<32x128xf32>, vector<8x128xf32> -> vector<8x128xf32>
    %164 = arith.addf %162, %163 : vector<8x128xf32>
    %165 = vector.extract_strided_slice %164 {offsets = [0, 0], sizes = [8, 32], strides = [1, 1]} : vector<8x128xf32> to vector<8x32xf32>
    %166 = arith.negf %165 : vector<8x32xf32>
    %167 = math.exp %166 : vector<8x32xf32>
    %cst_62 = arith.constant 1.000000e+00 : f32
    %168 = vector.broadcast %cst_62 : f32 to vector<8x32xf32>
    %169 = arith.addf %168, %167 : vector<8x32xf32>
    %170 = arith.divf %168, %169 : vector<8x32xf32>
    %171 = vector.extract_strided_slice %164 {offsets = [0, 32], sizes = [8, 32], strides = [1, 1]} : vector<8x128xf32> to vector<8x32xf32>
    %172 = arith.negf %171 : vector<8x32xf32>
    %173 = math.exp %172 : vector<8x32xf32>
    %cst_63 = arith.constant 1.000000e+00 : f32
    %174 = vector.broadcast %cst_63 : f32 to vector<8x32xf32>
    %175 = arith.addf %174, %173 : vector<8x32xf32>
    %176 = arith.divf %174, %175 : vector<8x32xf32>
    %177 = vector.extract_strided_slice %164 {offsets = [0, 64], sizes = [8, 32], strides = [1, 1]} : vector<8x128xf32> to vector<8x32xf32>
    %178 = math.tanh %177 : vector<8x32xf32>
    %179 = vector.extract_strided_slice %164 {offsets = [0, 96], sizes = [8, 32], strides = [1, 1]} : vector<8x128xf32> to vector<8x32xf32>
    %180 = arith.negf %179 : vector<8x32xf32>
    %181 = math.exp %180 : vector<8x32xf32>
    %cst_64 = arith.constant 1.000000e+00 : f32
    %182 = vector.broadcast %cst_64 : f32 to vector<8x32xf32>
    %183 = arith.addf %182, %181 : vector<8x32xf32>
    %184 = arith.divf %182, %183 : vector<8x32xf32>
    %185 = arith.mulf %176, %118 : vector<8x32xf32>
    %186 = arith.mulf %170, %178 : vector<8x32xf32>
    %187 = arith.addf %185, %186 : vector<8x32xf32>
    %188 = math.tanh %187 : vector<8x32xf32>
    %189 = arith.mulf %184, %188 : vector<8x32xf32>
    %190 = arith.index_cast %c2_i32 : i32 to index
    %c0_65 = arith.constant 0 : index
    %c0_66 = arith.constant 0 : index
    %191 = vector.load %arg18[%190, %c0_65, %c0_66] : memref<8x8x32xf32, #tpu.memory_space<vmem>>, vector<1x8x32xf32>
    %192 = vector.shape_cast %191 : vector<1x8x32xf32> to vector<8x32xf32>
    %193 = vector.shape_cast %189 : vector<8x32xf32> to vector<1x8x32xf32>
    tpu.vector_store %arg18[%190, %c0_65, %c0_66], %193 {strides = array<i32>} : memref<8x8x32xf32, #tpu.memory_space<vmem>>, vector<1x8x32xf32>,
    %194 = arith.index_cast %159 : i32 to index
    %c0_67 = arith.constant 0 : index
    %c0_68 = arith.constant 0 : index
    %195 = vector.load %arg17[%194, %c0_67, %c0_68] : memref<8x8x128xf32, #tpu.memory_space<vmem>>, vector<1x8x128xf32>
    %196 = vector.shape_cast %195 : vector<1x8x128xf32> to vector<8x128xf32>
    %cst_69 = arith.constant dense<0.000000e+00> : vector<8x128xf32>
    %197 = tpu.matmul %154, %11, %cst_69 {dimension_numbers = #tpu.dot_dimension_numbers<[1], [0], [0], [1], [0, 0, 1, 1], [], []>} : vector<8x32xf32>, vector<32x128xf32>, vector<8x128xf32> -> vector<8x128xf32>
    %198 = arith.addf %196, %197 : vector<8x128xf32>
    %199 = vector.extract_strided_slice %198 {offsets = [0, 0], sizes = [8, 32], strides = [1, 1]} : vector<8x128xf32> to vector<8x32xf32>
    %200 = arith.negf %199 : vector<8x32xf32>
    %201 = math.exp %200 : vector<8x32xf32>
    %cst_70 = arith.constant 1.000000e+00 : f32
    %202 = vector.broadcast %cst_70 : f32 to vector<8x32xf32>
    %203 = arith.addf %202, %201 : vector<8x32xf32>
    %204 = arith.divf %202, %203 : vector<8x32xf32>
    %205 = vector.extract_strided_slice %198 {offsets = [0, 32], sizes = [8, 32], strides = [1, 1]} : vector<8x128xf32> to vector<8x32xf32>
    %206 = arith.negf %205 : vector<8x32xf32>
    %207 = math.exp %206 : vector<8x32xf32>
    %cst_71 = arith.constant 1.000000e+00 : f32
    %208 = vector.broadcast %cst_71 : f32 to vector<8x32xf32>
    %209 = arith.addf %208, %207 : vector<8x32xf32>
    %210 = arith.divf %208, %209 : vector<8x32xf32>
    %211 = vector.extract_strided_slice %198 {offsets = [0, 64], sizes = [8, 32], strides = [1, 1]} : vector<8x128xf32> to vector<8x32xf32>
    %212 = math.tanh %211 : vector<8x32xf32>
    %213 = vector.extract_strided_slice %198 {offsets = [0, 96], sizes = [8, 32], strides = [1, 1]} : vector<8x128xf32> to vector<8x32xf32>
    %214 = arith.negf %213 : vector<8x32xf32>
    %215 = math.exp %214 : vector<8x32xf32>
    %cst_72 = arith.constant 1.000000e+00 : f32
    %216 = vector.broadcast %cst_72 : f32 to vector<8x32xf32>
    %217 = arith.addf %216, %215 : vector<8x32xf32>
    %218 = arith.divf %216, %217 : vector<8x32xf32>
    %219 = arith.mulf %210, %152 : vector<8x32xf32>
    %220 = arith.mulf %204, %212 : vector<8x32xf32>
    %221 = arith.addf %219, %220 : vector<8x32xf32>
    %222 = math.tanh %221 : vector<8x32xf32>
    %223 = arith.mulf %218, %222 : vector<8x32xf32>
    %224 = arith.index_cast %159 : i32 to index
    %c0_73 = arith.constant 0 : index
    %c0_74 = arith.constant 0 : index
    %225 = vector.load %arg19[%224, %c0_73, %c0_74] : memref<8x8x32xf32, #tpu.memory_space<vmem>>, vector<1x8x32xf32>
    %226 = vector.shape_cast %225 : vector<1x8x32xf32> to vector<8x32xf32>
    %227 = vector.shape_cast %223 : vector<8x32xf32> to vector<1x8x32xf32>
    tpu.vector_store %arg19[%224, %c0_73, %c0_74], %227 {strides = array<i32>} : memref<8x8x32xf32, #tpu.memory_space<vmem>>, vector<1x8x32xf32>,
    %c3_i32 = arith.constant 3 : i32
    %c7_i32_75 = arith.constant 7 : i32
    %228 = arith.subi %c7_i32_75, %c3_i32 : i32
    %229 = arith.index_cast %c3_i32 : i32 to index
    %c0_76 = arith.constant 0 : index
    %c0_77 = arith.constant 0 : index
    %230 = vector.load %arg16[%229, %c0_76, %c0_77] : memref<8x8x128xf32, #tpu.memory_space<vmem>>, vector<1x8x128xf32>
    %231 = vector.shape_cast %230 : vector<1x8x128xf32> to vector<8x128xf32>
    %cst_78 = arith.constant dense<0.000000e+00> : vector<8x128xf32>
    %232 = tpu.matmul %189, %1, %cst_78 {dimension_numbers = #tpu.dot_dimension_numbers<[1], [0], [0], [1], [0, 0, 1, 1], [], []>} : vector<8x32xf32>, vector<32x128xf32>, vector<8x128xf32> -> vector<8x128xf32>
    %233 = arith.addf %231, %232 : vector<8x128xf32>
    %234 = vector.extract_strided_slice %233 {offsets = [0, 0], sizes = [8, 32], strides = [1, 1]} : vector<8x128xf32> to vector<8x32xf32>
    %235 = arith.negf %234 : vector<8x32xf32>
    %236 = math.exp %235 : vector<8x32xf32>
    %cst_79 = arith.constant 1.000000e+00 : f32
    %237 = vector.broadcast %cst_79 : f32 to vector<8x32xf32>
    %238 = arith.addf %237, %236 : vector<8x32xf32>
    %239 = arith.divf %237, %238 : vector<8x32xf32>
    %240 = vector.extract_strided_slice %233 {offsets = [0, 32], sizes = [8, 32], strides = [1, 1]} : vector<8x128xf32> to vector<8x32xf32>
    %241 = arith.negf %240 : vector<8x32xf32>
    %242 = math.exp %241 : vector<8x32xf32>
    %cst_80 = arith.constant 1.000000e+00 : f32
    %243 = vector.broadcast %cst_80 : f32 to vector<8x32xf32>
    %244 = arith.addf %243, %242 : vector<8x32xf32>
    %245 = arith.divf %243, %244 : vector<8x32xf32>
    %246 = vector.extract_strided_slice %233 {offsets = [0, 64], sizes = [8, 32], strides = [1, 1]} : vector<8x128xf32> to vector<8x32xf32>
    %247 = math.tanh %246 : vector<8x32xf32>
    %248 = vector.extract_strided_slice %233 {offsets = [0, 96], sizes = [8, 32], strides = [1, 1]} : vector<8x128xf32> to vector<8x32xf32>
    %249 = arith.negf %248 : vector<8x32xf32>
    %250 = math.exp %249 : vector<8x32xf32>
    %cst_81 = arith.constant 1.000000e+00 : f32
    %251 = vector.broadcast %cst_81 : f32 to vector<8x32xf32>
    %252 = arith.addf %251, %250 : vector<8x32xf32>
    %253 = arith.divf %251, %252 : vector<8x32xf32>
    %254 = arith.mulf %245, %187 : vector<8x32xf32>
    %255 = arith.mulf %239, %247 : vector<8x32xf32>
    %256 = arith.addf %254, %255 : vector<8x32xf32>
    %257 = math.tanh %256 : vector<8x32xf32>
    %258 = arith.mulf %253, %257 : vector<8x32xf32>
    %259 = arith.index_cast %c3_i32 : i32 to index
    %c0_82 = arith.constant 0 : index
    %c0_83 = arith.constant 0 : index
    %260 = vector.load %arg18[%259, %c0_82, %c0_83] : memref<8x8x32xf32, #tpu.memory_space<vmem>>, vector<1x8x32xf32>
    %261 = vector.shape_cast %260 : vector<1x8x32xf32> to vector<8x32xf32>
    %262 = vector.shape_cast %258 : vector<8x32xf32> to vector<1x8x32xf32>
    tpu.vector_store %arg18[%259, %c0_82, %c0_83], %262 {strides = array<i32>} : memref<8x8x32xf32, #tpu.memory_space<vmem>>, vector<1x8x32xf32>,
    %263 = arith.index_cast %228 : i32 to index
    %c0_84 = arith.constant 0 : index
    %c0_85 = arith.constant 0 : index
    %264 = vector.load %arg17[%263, %c0_84, %c0_85] : memref<8x8x128xf32, #tpu.memory_space<vmem>>, vector<1x8x128xf32>
    %265 = vector.shape_cast %264 : vector<1x8x128xf32> to vector<8x128xf32>
    %cst_86 = arith.constant dense<0.000000e+00> : vector<8x128xf32>
    %266 = tpu.matmul %223, %11, %cst_86 {dimension_numbers = #tpu.dot_dimension_numbers<[1], [0], [0], [1], [0, 0, 1, 1], [], []>} : vector<8x32xf32>, vector<32x128xf32>, vector<8x128xf32> -> vector<8x128xf32>
    %267 = arith.addf %265, %266 : vector<8x128xf32>
    %268 = vector.extract_strided_slice %267 {offsets = [0, 0], sizes = [8, 32], strides = [1, 1]} : vector<8x128xf32> to vector<8x32xf32>
    %269 = arith.negf %268 : vector<8x32xf32>
    %270 = math.exp %269 : vector<8x32xf32>
    %cst_87 = arith.constant 1.000000e+00 : f32
    %271 = vector.broadcast %cst_87 : f32 to vector<8x32xf32>
    %272 = arith.addf %271, %270 : vector<8x32xf32>
    %273 = arith.divf %271, %272 : vector<8x32xf32>
    %274 = vector.extract_strided_slice %267 {offsets = [0, 32], sizes = [8, 32], strides = [1, 1]} : vector<8x128xf32> to vector<8x32xf32>
    %275 = arith.negf %274 : vector<8x32xf32>
    %276 = math.exp %275 : vector<8x32xf32>
    %cst_88 = arith.constant 1.000000e+00 : f32
    %277 = vector.broadcast %cst_88 : f32 to vector<8x32xf32>
    %278 = arith.addf %277, %276 : vector<8x32xf32>
    %279 = arith.divf %277, %278 : vector<8x32xf32>
    %280 = vector.extract_strided_slice %267 {offsets = [0, 64], sizes = [8, 32], strides = [1, 1]} : vector<8x128xf32> to vector<8x32xf32>
    %281 = math.tanh %280 : vector<8x32xf32>
    %282 = vector.extract_strided_slice %267 {offsets = [0, 96], sizes = [8, 32], strides = [1, 1]} : vector<8x128xf32> to vector<8x32xf32>
    %283 = arith.negf %282 : vector<8x32xf32>
    %284 = math.exp %283 : vector<8x32xf32>
    %cst_89 = arith.constant 1.000000e+00 : f32
    %285 = vector.broadcast %cst_89 : f32 to vector<8x32xf32>
    %286 = arith.addf %285, %284 : vector<8x32xf32>
    %287 = arith.divf %285, %286 : vector<8x32xf32>
    %288 = arith.mulf %279, %221 : vector<8x32xf32>
    %289 = arith.mulf %273, %281 : vector<8x32xf32>
    %290 = arith.addf %288, %289 : vector<8x32xf32>
    %291 = math.tanh %290 : vector<8x32xf32>
    %292 = arith.mulf %287, %291 : vector<8x32xf32>
    %293 = arith.index_cast %228 : i32 to index
    %c0_90 = arith.constant 0 : index
    %c0_91 = arith.constant 0 : index
    %294 = vector.load %arg19[%293, %c0_90, %c0_91] : memref<8x8x32xf32, #tpu.memory_space<vmem>>, vector<1x8x32xf32>
    %295 = vector.shape_cast %294 : vector<1x8x32xf32> to vector<8x32xf32>
    %296 = vector.shape_cast %292 : vector<8x32xf32> to vector<1x8x32xf32>
    tpu.vector_store %arg19[%293, %c0_90, %c0_91], %296 {strides = array<i32>} : memref<8x8x32xf32, #tpu.memory_space<vmem>>, vector<1x8x32xf32>,
    %c4_i32 = arith.constant 4 : i32
    %c7_i32_92 = arith.constant 7 : i32
    %297 = arith.subi %c7_i32_92, %c4_i32 : i32
    %298 = arith.index_cast %c4_i32 : i32 to index
    %c0_93 = arith.constant 0 : index
    %c0_94 = arith.constant 0 : index
    %299 = vector.load %arg16[%298, %c0_93, %c0_94] : memref<8x8x128xf32, #tpu.memory_space<vmem>>, vector<1x8x128xf32>
    %300 = vector.shape_cast %299 : vector<1x8x128xf32> to vector<8x128xf32>
    %cst_95 = arith.constant dense<0.000000e+00> : vector<8x128xf32>
    %301 = tpu.matmul %258, %1, %cst_95 {dimension_numbers = #tpu.dot_dimension_numbers<[1], [0], [0], [1], [0, 0, 1, 1], [], []>} : vector<8x32xf32>, vector<32x128xf32>, vector<8x128xf32> -> vector<8x128xf32>
    %302 = arith.addf %300, %301 : vector<8x128xf32>
    %303 = vector.extract_strided_slice %302 {offsets = [0, 0], sizes = [8, 32], strides = [1, 1]} : vector<8x128xf32> to vector<8x32xf32>
    %304 = arith.negf %303 : vector<8x32xf32>
    %305 = math.exp %304 : vector<8x32xf32>
    %cst_96 = arith.constant 1.000000e+00 : f32
    %306 = vector.broadcast %cst_96 : f32 to vector<8x32xf32>
    %307 = arith.addf %306, %305 : vector<8x32xf32>
    %308 = arith.divf %306, %307 : vector<8x32xf32>
    %309 = vector.extract_strided_slice %302 {offsets = [0, 32], sizes = [8, 32], strides = [1, 1]} : vector<8x128xf32> to vector<8x32xf32>
    %310 = arith.negf %309 : vector<8x32xf32>
    %311 = math.exp %310 : vector<8x32xf32>
    %cst_97 = arith.constant 1.000000e+00 : f32
    %312 = vector.broadcast %cst_97 : f32 to vector<8x32xf32>
    %313 = arith.addf %312, %311 : vector<8x32xf32>
    %314 = arith.divf %312, %313 : vector<8x32xf32>
    %315 = vector.extract_strided_slice %302 {offsets = [0, 64], sizes = [8, 32], strides = [1, 1]} : vector<8x128xf32> to vector<8x32xf32>
    %316 = math.tanh %315 : vector<8x32xf32>
    %317 = vector.extract_strided_slice %302 {offsets = [0, 96], sizes = [8, 32], strides = [1, 1]} : vector<8x128xf32> to vector<8x32xf32>
    %318 = arith.negf %317 : vector<8x32xf32>
    %319 = math.exp %318 : vector<8x32xf32>
    %cst_98 = arith.constant 1.000000e+00 : f32
    %320 = vector.broadcast %cst_98 : f32 to vector<8x32xf32>
    %321 = arith.addf %320, %319 : vector<8x32xf32>
    %322 = arith.divf %320, %321 : vector<8x32xf32>
    %323 = arith.mulf %314, %256 : vector<8x32xf32>
    %324 = arith.mulf %308, %316 : vector<8x32xf32>
    %325 = arith.addf %323, %324 : vector<8x32xf32>
    %326 = math.tanh %325 : vector<8x32xf32>
    %327 = arith.mulf %322, %326 : vector<8x32xf32>
    %328 = arith.index_cast %c4_i32 : i32 to index
    %c0_99 = arith.constant 0 : index
    %c0_100 = arith.constant 0 : index
    %329 = vector.load %arg18[%328, %c0_99, %c0_100] : memref<8x8x32xf32, #tpu.memory_space<vmem>>, vector<1x8x32xf32>
    %330 = vector.shape_cast %329 : vector<1x8x32xf32> to vector<8x32xf32>
    %331 = vector.shape_cast %327 : vector<8x32xf32> to vector<1x8x32xf32>
    tpu.vector_store %arg18[%328, %c0_99, %c0_100], %331 {strides = array<i32>} : memref<8x8x32xf32, #tpu.memory_space<vmem>>, vector<1x8x32xf32>,
    %332 = arith.index_cast %297 : i32 to index
    %c0_101 = arith.constant 0 : index
    %c0_102 = arith.constant 0 : index
    %333 = vector.load %arg17[%332, %c0_101, %c0_102] : memref<8x8x128xf32, #tpu.memory_space<vmem>>, vector<1x8x128xf32>
    %334 = vector.shape_cast %333 : vector<1x8x128xf32> to vector<8x128xf32>
    %cst_103 = arith.constant dense<0.000000e+00> : vector<8x128xf32>
    %335 = tpu.matmul %292, %11, %cst_103 {dimension_numbers = #tpu.dot_dimension_numbers<[1], [0], [0], [1], [0, 0, 1, 1], [], []>} : vector<8x32xf32>, vector<32x128xf32>, vector<8x128xf32> -> vector<8x128xf32>
    %336 = arith.addf %334, %335 : vector<8x128xf32>
    %337 = vector.extract_strided_slice %336 {offsets = [0, 0], sizes = [8, 32], strides = [1, 1]} : vector<8x128xf32> to vector<8x32xf32>
    %338 = arith.negf %337 : vector<8x32xf32>
    %339 = math.exp %338 : vector<8x32xf32>
    %cst_104 = arith.constant 1.000000e+00 : f32
    %340 = vector.broadcast %cst_104 : f32 to vector<8x32xf32>
    %341 = arith.addf %340, %339 : vector<8x32xf32>
    %342 = arith.divf %340, %341 : vector<8x32xf32>
    %343 = vector.extract_strided_slice %336 {offsets = [0, 32], sizes = [8, 32], strides = [1, 1]} : vector<8x128xf32> to vector<8x32xf32>
    %344 = arith.negf %343 : vector<8x32xf32>
    %345 = math.exp %344 : vector<8x32xf32>
    %cst_105 = arith.constant 1.000000e+00 : f32
    %346 = vector.broadcast %cst_105 : f32 to vector<8x32xf32>
    %347 = arith.addf %346, %345 : vector<8x32xf32>
    %348 = arith.divf %346, %347 : vector<8x32xf32>
    %349 = vector.extract_strided_slice %336 {offsets = [0, 64], sizes = [8, 32], strides = [1, 1]} : vector<8x128xf32> to vector<8x32xf32>
    %350 = math.tanh %349 : vector<8x32xf32>
    %351 = vector.extract_strided_slice %336 {offsets = [0, 96], sizes = [8, 32], strides = [1, 1]} : vector<8x128xf32> to vector<8x32xf32>
    %352 = arith.negf %351 : vector<8x32xf32>
    %353 = math.exp %352 : vector<8x32xf32>
    %cst_106 = arith.constant 1.000000e+00 : f32
    %354 = vector.broadcast %cst_106 : f32 to vector<8x32xf32>
    %355 = arith.addf %354, %353 : vector<8x32xf32>
    %356 = arith.divf %354, %355 : vector<8x32xf32>
    %357 = arith.mulf %348, %290 : vector<8x32xf32>
    %358 = arith.mulf %342, %350 : vector<8x32xf32>
    %359 = arith.addf %357, %358 : vector<8x32xf32>
    %360 = math.tanh %359 : vector<8x32xf32>
    %361 = arith.mulf %356, %360 : vector<8x32xf32>
    %362 = arith.index_cast %297 : i32 to index
    %c0_107 = arith.constant 0 : index
    %c0_108 = arith.constant 0 : index
    %363 = vector.load %arg19[%362, %c0_107, %c0_108] : memref<8x8x32xf32, #tpu.memory_space<vmem>>, vector<1x8x32xf32>
    %364 = vector.shape_cast %363 : vector<1x8x32xf32> to vector<8x32xf32>
    %365 = vector.shape_cast %361 : vector<8x32xf32> to vector<1x8x32xf32>
    tpu.vector_store %arg19[%362, %c0_107, %c0_108], %365 {strides = array<i32>} : memref<8x8x32xf32, #tpu.memory_space<vmem>>, vector<1x8x32xf32>,
    %c5_i32 = arith.constant 5 : i32
    %c7_i32_109 = arith.constant 7 : i32
    %366 = arith.subi %c7_i32_109, %c5_i32 : i32
    %367 = arith.index_cast %c5_i32 : i32 to index
    %c0_110 = arith.constant 0 : index
    %c0_111 = arith.constant 0 : index
    %368 = vector.load %arg16[%367, %c0_110, %c0_111] : memref<8x8x128xf32, #tpu.memory_space<vmem>>, vector<1x8x128xf32>
    %369 = vector.shape_cast %368 : vector<1x8x128xf32> to vector<8x128xf32>
    %cst_112 = arith.constant dense<0.000000e+00> : vector<8x128xf32>
    %370 = tpu.matmul %327, %1, %cst_112 {dimension_numbers = #tpu.dot_dimension_numbers<[1], [0], [0], [1], [0, 0, 1, 1], [], []>} : vector<8x32xf32>, vector<32x128xf32>, vector<8x128xf32> -> vector<8x128xf32>
    %371 = arith.addf %369, %370 : vector<8x128xf32>
    %372 = vector.extract_strided_slice %371 {offsets = [0, 0], sizes = [8, 32], strides = [1, 1]} : vector<8x128xf32> to vector<8x32xf32>
    %373 = arith.negf %372 : vector<8x32xf32>
    %374 = math.exp %373 : vector<8x32xf32>
    %cst_113 = arith.constant 1.000000e+00 : f32
    %375 = vector.broadcast %cst_113 : f32 to vector<8x32xf32>
    %376 = arith.addf %375, %374 : vector<8x32xf32>
    %377 = arith.divf %375, %376 : vector<8x32xf32>
    %378 = vector.extract_strided_slice %371 {offsets = [0, 32], sizes = [8, 32], strides = [1, 1]} : vector<8x128xf32> to vector<8x32xf32>
    %379 = arith.negf %378 : vector<8x32xf32>
    %380 = math.exp %379 : vector<8x32xf32>
    %cst_114 = arith.constant 1.000000e+00 : f32
    %381 = vector.broadcast %cst_114 : f32 to vector<8x32xf32>
    %382 = arith.addf %381, %380 : vector<8x32xf32>
    %383 = arith.divf %381, %382 : vector<8x32xf32>
    %384 = vector.extract_strided_slice %371 {offsets = [0, 64], sizes = [8, 32], strides = [1, 1]} : vector<8x128xf32> to vector<8x32xf32>
    %385 = math.tanh %384 : vector<8x32xf32>
    %386 = vector.extract_strided_slice %371 {offsets = [0, 96], sizes = [8, 32], strides = [1, 1]} : vector<8x128xf32> to vector<8x32xf32>
    %387 = arith.negf %386 : vector<8x32xf32>
    %388 = math.exp %387 : vector<8x32xf32>
    %cst_115 = arith.constant 1.000000e+00 : f32
    %389 = vector.broadcast %cst_115 : f32 to vector<8x32xf32>
    %390 = arith.addf %389, %388 : vector<8x32xf32>
    %391 = arith.divf %389, %390 : vector<8x32xf32>
    %392 = arith.mulf %383, %325 : vector<8x32xf32>
    %393 = arith.mulf %377, %385 : vector<8x32xf32>
    %394 = arith.addf %392, %393 : vector<8x32xf32>
    %395 = math.tanh %394 : vector<8x32xf32>
    %396 = arith.mulf %391, %395 : vector<8x32xf32>
    %397 = arith.index_cast %c5_i32 : i32 to index
    %c0_116 = arith.constant 0 : index
    %c0_117 = arith.constant 0 : index
    %398 = vector.load %arg18[%397, %c0_116, %c0_117] : memref<8x8x32xf32, #tpu.memory_space<vmem>>, vector<1x8x32xf32>
    %399 = vector.shape_cast %398 : vector<1x8x32xf32> to vector<8x32xf32>
    %400 = vector.shape_cast %396 : vector<8x32xf32> to vector<1x8x32xf32>
    tpu.vector_store %arg18[%397, %c0_116, %c0_117], %400 {strides = array<i32>} : memref<8x8x32xf32, #tpu.memory_space<vmem>>, vector<1x8x32xf32>,
    %401 = arith.index_cast %366 : i32 to index
    %c0_118 = arith.constant 0 : index
    %c0_119 = arith.constant 0 : index
    %402 = vector.load %arg17[%401, %c0_118, %c0_119] : memref<8x8x128xf32, #tpu.memory_space<vmem>>, vector<1x8x128xf32>
    %403 = vector.shape_cast %402 : vector<1x8x128xf32> to vector<8x128xf32>
    %cst_120 = arith.constant dense<0.000000e+00> : vector<8x128xf32>
    %404 = tpu.matmul %361, %11, %cst_120 {dimension_numbers = #tpu.dot_dimension_numbers<[1], [0], [0], [1], [0, 0, 1, 1], [], []>} : vector<8x32xf32>, vector<32x128xf32>, vector<8x128xf32> -> vector<8x128xf32>
    %405 = arith.addf %403, %404 : vector<8x128xf32>
    %406 = vector.extract_strided_slice %405 {offsets = [0, 0], sizes = [8, 32], strides = [1, 1]} : vector<8x128xf32> to vector<8x32xf32>
    %407 = arith.negf %406 : vector<8x32xf32>
    %408 = math.exp %407 : vector<8x32xf32>
    %cst_121 = arith.constant 1.000000e+00 : f32
    %409 = vector.broadcast %cst_121 : f32 to vector<8x32xf32>
    %410 = arith.addf %409, %408 : vector<8x32xf32>
    %411 = arith.divf %409, %410 : vector<8x32xf32>
    %412 = vector.extract_strided_slice %405 {offsets = [0, 32], sizes = [8, 32], strides = [1, 1]} : vector<8x128xf32> to vector<8x32xf32>
    %413 = arith.negf %412 : vector<8x32xf32>
    %414 = math.exp %413 : vector<8x32xf32>
    %cst_122 = arith.constant 1.000000e+00 : f32
    %415 = vector.broadcast %cst_122 : f32 to vector<8x32xf32>
    %416 = arith.addf %415, %414 : vector<8x32xf32>
    %417 = arith.divf %415, %416 : vector<8x32xf32>
    %418 = vector.extract_strided_slice %405 {offsets = [0, 64], sizes = [8, 32], strides = [1, 1]} : vector<8x128xf32> to vector<8x32xf32>
    %419 = math.tanh %418 : vector<8x32xf32>
    %420 = vector.extract_strided_slice %405 {offsets = [0, 96], sizes = [8, 32], strides = [1, 1]} : vector<8x128xf32> to vector<8x32xf32>
    %421 = arith.negf %420 : vector<8x32xf32>
    %422 = math.exp %421 : vector<8x32xf32>
    %cst_123 = arith.constant 1.000000e+00 : f32
    %423 = vector.broadcast %cst_123 : f32 to vector<8x32xf32>
    %424 = arith.addf %423, %422 : vector<8x32xf32>
    %425 = arith.divf %423, %424 : vector<8x32xf32>
    %426 = arith.mulf %417, %359 : vector<8x32xf32>
    %427 = arith.mulf %411, %419 : vector<8x32xf32>
    %428 = arith.addf %426, %427 : vector<8x32xf32>
    %429 = math.tanh %428 : vector<8x32xf32>
    %430 = arith.mulf %425, %429 : vector<8x32xf32>
    %431 = arith.index_cast %366 : i32 to index
    %c0_124 = arith.constant 0 : index
    %c0_125 = arith.constant 0 : index
    %432 = vector.load %arg19[%431, %c0_124, %c0_125] : memref<8x8x32xf32, #tpu.memory_space<vmem>>, vector<1x8x32xf32>
    %433 = vector.shape_cast %432 : vector<1x8x32xf32> to vector<8x32xf32>
    %434 = vector.shape_cast %430 : vector<8x32xf32> to vector<1x8x32xf32>
    tpu.vector_store %arg19[%431, %c0_124, %c0_125], %434 {strides = array<i32>} : memref<8x8x32xf32, #tpu.memory_space<vmem>>, vector<1x8x32xf32>,
    %c6_i32 = arith.constant 6 : i32
    %c7_i32_126 = arith.constant 7 : i32
    %435 = arith.subi %c7_i32_126, %c6_i32 : i32
    %436 = arith.index_cast %c6_i32 : i32 to index
    %c0_127 = arith.constant 0 : index
    %c0_128 = arith.constant 0 : index
    %437 = vector.load %arg16[%436, %c0_127, %c0_128] : memref<8x8x128xf32, #tpu.memory_space<vmem>>, vector<1x8x128xf32>
    %438 = vector.shape_cast %437 : vector<1x8x128xf32> to vector<8x128xf32>
    %cst_129 = arith.constant dense<0.000000e+00> : vector<8x128xf32>
    %439 = tpu.matmul %396, %1, %cst_129 {dimension_numbers = #tpu.dot_dimension_numbers<[1], [0], [0], [1], [0, 0, 1, 1], [], []>} : vector<8x32xf32>, vector<32x128xf32>, vector<8x128xf32> -> vector<8x128xf32>
    %440 = arith.addf %438, %439 : vector<8x128xf32>
    %441 = vector.extract_strided_slice %440 {offsets = [0, 0], sizes = [8, 32], strides = [1, 1]} : vector<8x128xf32> to vector<8x32xf32>
    %442 = arith.negf %441 : vector<8x32xf32>
    %443 = math.exp %442 : vector<8x32xf32>
    %cst_130 = arith.constant 1.000000e+00 : f32
    %444 = vector.broadcast %cst_130 : f32 to vector<8x32xf32>
    %445 = arith.addf %444, %443 : vector<8x32xf32>
    %446 = arith.divf %444, %445 : vector<8x32xf32>
    %447 = vector.extract_strided_slice %440 {offsets = [0, 32], sizes = [8, 32], strides = [1, 1]} : vector<8x128xf32> to vector<8x32xf32>
    %448 = arith.negf %447 : vector<8x32xf32>
    %449 = math.exp %448 : vector<8x32xf32>
    %cst_131 = arith.constant 1.000000e+00 : f32
    %450 = vector.broadcast %cst_131 : f32 to vector<8x32xf32>
    %451 = arith.addf %450, %449 : vector<8x32xf32>
    %452 = arith.divf %450, %451 : vector<8x32xf32>
    %453 = vector.extract_strided_slice %440 {offsets = [0, 64], sizes = [8, 32], strides = [1, 1]} : vector<8x128xf32> to vector<8x32xf32>
    %454 = math.tanh %453 : vector<8x32xf32>
    %455 = vector.extract_strided_slice %440 {offsets = [0, 96], sizes = [8, 32], strides = [1, 1]} : vector<8x128xf32> to vector<8x32xf32>
    %456 = arith.negf %455 : vector<8x32xf32>
    %457 = math.exp %456 : vector<8x32xf32>
    %cst_132 = arith.constant 1.000000e+00 : f32
    %458 = vector.broadcast %cst_132 : f32 to vector<8x32xf32>
    %459 = arith.addf %458, %457 : vector<8x32xf32>
    %460 = arith.divf %458, %459 : vector<8x32xf32>
    %461 = arith.mulf %452, %394 : vector<8x32xf32>
    %462 = arith.mulf %446, %454 : vector<8x32xf32>
    %463 = arith.addf %461, %462 : vector<8x32xf32>
    %464 = math.tanh %463 : vector<8x32xf32>
    %465 = arith.mulf %460, %464 : vector<8x32xf32>
    %466 = arith.index_cast %c6_i32 : i32 to index
    %c0_133 = arith.constant 0 : index
    %c0_134 = arith.constant 0 : index
    %467 = vector.load %arg18[%466, %c0_133, %c0_134] : memref<8x8x32xf32, #tpu.memory_space<vmem>>, vector<1x8x32xf32>
    %468 = vector.shape_cast %467 : vector<1x8x32xf32> to vector<8x32xf32>
    %469 = vector.shape_cast %465 : vector<8x32xf32> to vector<1x8x32xf32>
    tpu.vector_store %arg18[%466, %c0_133, %c0_134], %469 {strides = array<i32>} : memref<8x8x32xf32, #tpu.memory_space<vmem>>, vector<1x8x32xf32>,
    %470 = arith.index_cast %435 : i32 to index
    %c0_135 = arith.constant 0 : index
    %c0_136 = arith.constant 0 : index
    %471 = vector.load %arg17[%470, %c0_135, %c0_136] : memref<8x8x128xf32, #tpu.memory_space<vmem>>, vector<1x8x128xf32>
    %472 = vector.shape_cast %471 : vector<1x8x128xf32> to vector<8x128xf32>
    %cst_137 = arith.constant dense<0.000000e+00> : vector<8x128xf32>
    %473 = tpu.matmul %430, %11, %cst_137 {dimension_numbers = #tpu.dot_dimension_numbers<[1], [0], [0], [1], [0, 0, 1, 1], [], []>} : vector<8x32xf32>, vector<32x128xf32>, vector<8x128xf32> -> vector<8x128xf32>
    %474 = arith.addf %472, %473 : vector<8x128xf32>
    %475 = vector.extract_strided_slice %474 {offsets = [0, 0], sizes = [8, 32], strides = [1, 1]} : vector<8x128xf32> to vector<8x32xf32>
    %476 = arith.negf %475 : vector<8x32xf32>
    %477 = math.exp %476 : vector<8x32xf32>
    %cst_138 = arith.constant 1.000000e+00 : f32
    %478 = vector.broadcast %cst_138 : f32 to vector<8x32xf32>
    %479 = arith.addf %478, %477 : vector<8x32xf32>
    %480 = arith.divf %478, %479 : vector<8x32xf32>
    %481 = vector.extract_strided_slice %474 {offsets = [0, 32], sizes = [8, 32], strides = [1, 1]} : vector<8x128xf32> to vector<8x32xf32>
    %482 = arith.negf %481 : vector<8x32xf32>
    %483 = math.exp %482 : vector<8x32xf32>
    %cst_139 = arith.constant 1.000000e+00 : f32
    %484 = vector.broadcast %cst_139 : f32 to vector<8x32xf32>
    %485 = arith.addf %484, %483 : vector<8x32xf32>
    %486 = arith.divf %484, %485 : vector<8x32xf32>
    %487 = vector.extract_strided_slice %474 {offsets = [0, 64], sizes = [8, 32], strides = [1, 1]} : vector<8x128xf32> to vector<8x32xf32>
    %488 = math.tanh %487 : vector<8x32xf32>
    %489 = vector.extract_strided_slice %474 {offsets = [0, 96], sizes = [8, 32], strides = [1, 1]} : vector<8x128xf32> to vector<8x32xf32>
    %490 = arith.negf %489 : vector<8x32xf32>
    %491 = math.exp %490 : vector<8x32xf32>
    %cst_140 = arith.constant 1.000000e+00 : f32
    %492 = vector.broadcast %cst_140 : f32 to vector<8x32xf32>
    %493 = arith.addf %492, %491 : vector<8x32xf32>
    %494 = arith.divf %492, %493 : vector<8x32xf32>
    %495 = arith.mulf %486, %428 : vector<8x32xf32>
    %496 = arith.mulf %480, %488 : vector<8x32xf32>
    %497 = arith.addf %495, %496 : vector<8x32xf32>
    %498 = math.tanh %497 : vector<8x32xf32>
    %499 = arith.mulf %494, %498 : vector<8x32xf32>
    %500 = arith.index_cast %435 : i32 to index
    %c0_141 = arith.constant 0 : index
    %c0_142 = arith.constant 0 : index
    %501 = vector.load %arg19[%500, %c0_141, %c0_142] : memref<8x8x32xf32, #tpu.memory_space<vmem>>, vector<1x8x32xf32>
    %502 = vector.shape_cast %501 : vector<1x8x32xf32> to vector<8x32xf32>
    %503 = vector.shape_cast %499 : vector<8x32xf32> to vector<1x8x32xf32>
    tpu.vector_store %arg19[%500, %c0_141, %c0_142], %503 {strides = array<i32>} : memref<8x8x32xf32, #tpu.memory_space<vmem>>, vector<1x8x32xf32>,
    %c7_i32_143 = arith.constant 7 : i32
    %c7_i32_144 = arith.constant 7 : i32
    %504 = arith.subi %c7_i32_144, %c7_i32_143 : i32
    %505 = arith.index_cast %c7_i32_143 : i32 to index
    %c0_145 = arith.constant 0 : index
    %c0_146 = arith.constant 0 : index
    %506 = vector.load %arg16[%505, %c0_145, %c0_146] : memref<8x8x128xf32, #tpu.memory_space<vmem>>, vector<1x8x128xf32>
    %507 = vector.shape_cast %506 : vector<1x8x128xf32> to vector<8x128xf32>
    %cst_147 = arith.constant dense<0.000000e+00> : vector<8x128xf32>
    %508 = tpu.matmul %465, %1, %cst_147 {dimension_numbers = #tpu.dot_dimension_numbers<[1], [0], [0], [1], [0, 0, 1, 1], [], []>} : vector<8x32xf32>, vector<32x128xf32>, vector<8x128xf32> -> vector<8x128xf32>
    %509 = arith.addf %507, %508 : vector<8x128xf32>
    %510 = vector.extract_strided_slice %509 {offsets = [0, 0], sizes = [8, 32], strides = [1, 1]} : vector<8x128xf32> to vector<8x32xf32>
    %511 = arith.negf %510 : vector<8x32xf32>
    %512 = math.exp %511 : vector<8x32xf32>
    %cst_148 = arith.constant 1.000000e+00 : f32
    %513 = vector.broadcast %cst_148 : f32 to vector<8x32xf32>
    %514 = arith.addf %513, %512 : vector<8x32xf32>
    %515 = arith.divf %513, %514 : vector<8x32xf32>
    %516 = vector.extract_strided_slice %509 {offsets = [0, 32], sizes = [8, 32], strides = [1, 1]} : vector<8x128xf32> to vector<8x32xf32>
    %517 = arith.negf %516 : vector<8x32xf32>
    %518 = math.exp %517 : vector<8x32xf32>
    %cst_149 = arith.constant 1.000000e+00 : f32
    %519 = vector.broadcast %cst_149 : f32 to vector<8x32xf32>
    %520 = arith.addf %519, %518 : vector<8x32xf32>
    %521 = arith.divf %519, %520 : vector<8x32xf32>
    %522 = vector.extract_strided_slice %509 {offsets = [0, 64], sizes = [8, 32], strides = [1, 1]} : vector<8x128xf32> to vector<8x32xf32>
    %523 = math.tanh %522 : vector<8x32xf32>
    %524 = vector.extract_strided_slice %509 {offsets = [0, 96], sizes = [8, 32], strides = [1, 1]} : vector<8x128xf32> to vector<8x32xf32>
    %525 = arith.negf %524 : vector<8x32xf32>
    %526 = math.exp %525 : vector<8x32xf32>
    %cst_150 = arith.constant 1.000000e+00 : f32
    %527 = vector.broadcast %cst_150 : f32 to vector<8x32xf32>
    %528 = arith.addf %527, %526 : vector<8x32xf32>
    %529 = arith.divf %527, %528 : vector<8x32xf32>
    %530 = arith.mulf %521, %463 : vector<8x32xf32>
    %531 = arith.mulf %515, %523 : vector<8x32xf32>
    %532 = arith.addf %530, %531 : vector<8x32xf32>
    %533 = math.tanh %532 : vector<8x32xf32>
    %534 = arith.mulf %529, %533 : vector<8x32xf32>
    %535 = arith.index_cast %c7_i32_143 : i32 to index
    %c0_151 = arith.constant 0 : index
    %c0_152 = arith.constant 0 : index
    %536 = vector.load %arg18[%535, %c0_151, %c0_152] : memref<8x8x32xf32, #tpu.memory_space<vmem>>, vector<1x8x32xf32>
    %537 = vector.shape_cast %536 : vector<1x8x32xf32> to vector<8x32xf32>
    %538 = vector.shape_cast %534 : vector<8x32xf32> to vector<1x8x32xf32>
    tpu.vector_store %arg18[%535, %c0_151, %c0_152], %538 {strides = array<i32>} : memref<8x8x32xf32, #tpu.memory_space<vmem>>, vector<1x8x32xf32>,
    %539 = arith.index_cast %504 : i32 to index
    %c0_153 = arith.constant 0 : index
    %c0_154 = arith.constant 0 : index
    %540 = vector.load %arg17[%539, %c0_153, %c0_154] : memref<8x8x128xf32, #tpu.memory_space<vmem>>, vector<1x8x128xf32>
    %541 = vector.shape_cast %540 : vector<1x8x128xf32> to vector<8x128xf32>
    %cst_155 = arith.constant dense<0.000000e+00> : vector<8x128xf32>
    %542 = tpu.matmul %499, %11, %cst_155 {dimension_numbers = #tpu.dot_dimension_numbers<[1], [0], [0], [1], [0, 0, 1, 1], [], []>} : vector<8x32xf32>, vector<32x128xf32>, vector<8x128xf32> -> vector<8x128xf32>
    %543 = arith.addf %541, %542 : vector<8x128xf32>
    %544 = vector.extract_strided_slice %543 {offsets = [0, 0], sizes = [8, 32], strides = [1, 1]} : vector<8x128xf32> to vector<8x32xf32>
    %545 = arith.negf %544 : vector<8x32xf32>
    %546 = math.exp %545 : vector<8x32xf32>
    %cst_156 = arith.constant 1.000000e+00 : f32
    %547 = vector.broadcast %cst_156 : f32 to vector<8x32xf32>
    %548 = arith.addf %547, %546 : vector<8x32xf32>
    %549 = arith.divf %547, %548 : vector<8x32xf32>
    %550 = vector.extract_strided_slice %543 {offsets = [0, 32], sizes = [8, 32], strides = [1, 1]} : vector<8x128xf32> to vector<8x32xf32>
    %551 = arith.negf %550 : vector<8x32xf32>
    %552 = math.exp %551 : vector<8x32xf32>
    %cst_157 = arith.constant 1.000000e+00 : f32
    %553 = vector.broadcast %cst_157 : f32 to vector<8x32xf32>
    %554 = arith.addf %553, %552 : vector<8x32xf32>
    %555 = arith.divf %553, %554 : vector<8x32xf32>
    %556 = vector.extract_strided_slice %543 {offsets = [0, 64], sizes = [8, 32], strides = [1, 1]} : vector<8x128xf32> to vector<8x32xf32>
    %557 = math.tanh %556 : vector<8x32xf32>
    %558 = vector.extract_strided_slice %543 {offsets = [0, 96], sizes = [8, 32], strides = [1, 1]} : vector<8x128xf32> to vector<8x32xf32>
    %559 = arith.negf %558 : vector<8x32xf32>
    %560 = math.exp %559 : vector<8x32xf32>
    %cst_158 = arith.constant 1.000000e+00 : f32
    %561 = vector.broadcast %cst_158 : f32 to vector<8x32xf32>
    %562 = arith.addf %561, %560 : vector<8x32xf32>
    %563 = arith.divf %561, %562 : vector<8x32xf32>
    %564 = arith.mulf %555, %497 : vector<8x32xf32>
    %565 = arith.mulf %549, %557 : vector<8x32xf32>
    %566 = arith.addf %564, %565 : vector<8x32xf32>
    %567 = math.tanh %566 : vector<8x32xf32>
    %568 = arith.mulf %563, %567 : vector<8x32xf32>
    %569 = arith.index_cast %504 : i32 to index
    %c0_159 = arith.constant 0 : index
    %c0_160 = arith.constant 0 : index
    %570 = vector.load %arg19[%569, %c0_159, %c0_160] : memref<8x8x32xf32, #tpu.memory_space<vmem>>, vector<1x8x32xf32>
    %571 = vector.shape_cast %570 : vector<1x8x32xf32> to vector<8x32xf32>
    %572 = vector.shape_cast %568 : vector<8x32xf32> to vector<1x8x32xf32>
    tpu.vector_store %arg19[%569, %c0_159, %c0_160], %572 {strides = array<i32>} : memref<8x8x32xf32, #tpu.memory_space<vmem>>, vector<1x8x32xf32>,
    %c8_i32 = arith.constant 8 : i32
    %c0_161 = arith.constant 0 : index
    %c0_162 = arith.constant 0 : index
    %573 = vector.load %arg8[%c0_161, %c0_162] : memref<32x128xf32, #tpu.memory_space<vmem>>, vector<32x128xf32>
    %c0_163 = arith.constant 0 : index
    %c0_164 = arith.constant 0 : index
    %574 = vector.load %arg7[%c0_163, %c0_164] : memref<64x128xf32, #tpu.memory_space<vmem>>, vector<64x128xf32>
    %c0_165 = arith.constant 0 : index
    %c0_166 = arith.constant 0 : index
    %575 = vector.load %arg9[%c0_165, %c0_166] : memref<1x128xf32, #tpu.memory_space<vmem>>, vector<1x128xf32>
    %c0_167 = arith.constant 0 : index
    %c0_168 = arith.constant 0 : index
    %c0_169 = arith.constant 0 : index
    %576 = vector.load %arg18[%c0_167, %c0_168, %c0_169] : memref<8x8x32xf32, #tpu.memory_space<vmem>>, vector<8x8x32xf32>
    %577 = vector.shape_cast %576 : vector<8x8x32xf32> to vector<64x32xf32>
    %c0_170 = arith.constant 0 : index
    %c0_171 = arith.constant 0 : index
    %c0_172 = arith.constant 0 : index
    %578 = vector.load %arg19[%c0_170, %c0_171, %c0_172] : memref<8x8x32xf32, #tpu.memory_space<vmem>>, vector<8x8x32xf32>
    %579 = vector.shape_cast %578 : vector<8x8x32xf32> to vector<64x32xf32>
    %580 = tpu.concatenate %577, %579 in 1 : vector<64x32xf32>, vector<64x32xf32> -> vector<64x64xf32>
    %cst_173 = arith.constant dense<0.000000e+00> : vector<64x128xf32>
    %581 = tpu.matmul %580, %574, %cst_173 {dimension_numbers = #tpu.dot_dimension_numbers<[1], [0], [0], [1], [0, 0, 1, 1], [], []>} : vector<64x64xf32>, vector<64x128xf32>, vector<64x128xf32> -> vector<64x128xf32>
    %582 = vector.broadcast %575 : vector<1x128xf32> to vector<64x128xf32>
    %583 = arith.addf %581, %582 : vector<64x128xf32>
    %584 = vector.shape_cast %583 : vector<64x128xf32> to vector<8x8x128xf32>
    %c0_174 = arith.constant 0 : index
    %c0_175 = arith.constant 0 : index
    %c0_176 = arith.constant 0 : index
    %585 = vector.load %arg16[%c0_174, %c0_175, %c0_176] : memref<8x8x128xf32, #tpu.memory_space<vmem>>, vector<8x8x128xf32>
    tpu.vector_store %arg16[%c0_174, %c0_175, %c0_176], %584 {strides = array<i32>} : memref<8x8x128xf32, #tpu.memory_space<vmem>>, vector<8x8x128xf32>,
    %c0_i32_177 = arith.constant 0 : i32
    %586 = arith.index_cast %c0_i32_177 : i32 to index
    %c0_178 = arith.constant 0 : index
    %c0_179 = arith.constant 0 : index
    %587 = vector.load %arg16[%586, %c0_178, %c0_179] : memref<8x8x128xf32, #tpu.memory_space<vmem>>, vector<1x8x128xf32>
    %588 = vector.shape_cast %587 : vector<1x8x128xf32> to vector<8x128xf32>
    %cst_180 = arith.constant dense<0.000000e+00> : vector<8x128xf32>
    %589 = tpu.matmul %0, %573, %cst_180 {dimension_numbers = #tpu.dot_dimension_numbers<[1], [0], [0], [1], [0, 0, 1, 1], [], []>} : vector<8x32xf32>, vector<32x128xf32>, vector<8x128xf32> -> vector<8x128xf32>
    %590 = arith.addf %588, %589 : vector<8x128xf32>
    %591 = vector.extract_strided_slice %590 {offsets = [0, 0], sizes = [8, 32], strides = [1, 1]} : vector<8x128xf32> to vector<8x32xf32>
    %592 = arith.negf %591 : vector<8x32xf32>
    %593 = math.exp %592 : vector<8x32xf32>
    %cst_181 = arith.constant 1.000000e+00 : f32
    %594 = vector.broadcast %cst_181 : f32 to vector<8x32xf32>
    %595 = arith.addf %594, %593 : vector<8x32xf32>
    %596 = arith.divf %594, %595 : vector<8x32xf32>
    %597 = vector.extract_strided_slice %590 {offsets = [0, 32], sizes = [8, 32], strides = [1, 1]} : vector<8x128xf32> to vector<8x32xf32>
    %598 = arith.negf %597 : vector<8x32xf32>
    %599 = math.exp %598 : vector<8x32xf32>
    %cst_182 = arith.constant 1.000000e+00 : f32
    %600 = vector.broadcast %cst_182 : f32 to vector<8x32xf32>
    %601 = arith.addf %600, %599 : vector<8x32xf32>
    %602 = arith.divf %600, %601 : vector<8x32xf32>
    %603 = vector.extract_strided_slice %590 {offsets = [0, 64], sizes = [8, 32], strides = [1, 1]} : vector<8x128xf32> to vector<8x32xf32>
    %604 = math.tanh %603 : vector<8x32xf32>
    %605 = vector.extract_strided_slice %590 {offsets = [0, 96], sizes = [8, 32], strides = [1, 1]} : vector<8x128xf32> to vector<8x32xf32>
    %606 = arith.negf %605 : vector<8x32xf32>
    %607 = math.exp %606 : vector<8x32xf32>
    %cst_183 = arith.constant 1.000000e+00 : f32
    %608 = vector.broadcast %cst_183 : f32 to vector<8x32xf32>
    %609 = arith.addf %608, %607 : vector<8x32xf32>
    %610 = arith.divf %608, %609 : vector<8x32xf32>
    %611 = arith.mulf %602, %0 : vector<8x32xf32>
    %612 = arith.mulf %596, %604 : vector<8x32xf32>
    %613 = arith.addf %611, %612 : vector<8x32xf32>
    %614 = math.tanh %613 : vector<8x32xf32>
    %615 = arith.mulf %610, %614 : vector<8x32xf32>
    %c1_i32_184 = arith.constant 1 : i32
    %616 = arith.index_cast %c1_i32_184 : i32 to index
    %c0_185 = arith.constant 0 : index
    %c0_186 = arith.constant 0 : index
    %617 = vector.load %arg16[%616, %c0_185, %c0_186] : memref<8x8x128xf32, #tpu.memory_space<vmem>>, vector<1x8x128xf32>
    %618 = vector.shape_cast %617 : vector<1x8x128xf32> to vector<8x128xf32>
    %cst_187 = arith.constant dense<0.000000e+00> : vector<8x128xf32>
    %619 = tpu.matmul %615, %573, %cst_187 {dimension_numbers = #tpu.dot_dimension_numbers<[1], [0], [0], [1], [0, 0, 1, 1], [], []>} : vector<8x32xf32>, vector<32x128xf32>, vector<8x128xf32> -> vector<8x128xf32>
    %620 = arith.addf %618, %619 : vector<8x128xf32>
    %621 = vector.extract_strided_slice %620 {offsets = [0, 0], sizes = [8, 32], strides = [1, 1]} : vector<8x128xf32> to vector<8x32xf32>
    %622 = arith.negf %621 : vector<8x32xf32>
    %623 = math.exp %622 : vector<8x32xf32>
    %cst_188 = arith.constant 1.000000e+00 : f32
    %624 = vector.broadcast %cst_188 : f32 to vector<8x32xf32>
    %625 = arith.addf %624, %623 : vector<8x32xf32>
    %626 = arith.divf %624, %625 : vector<8x32xf32>
    %627 = vector.extract_strided_slice %620 {offsets = [0, 32], sizes = [8, 32], strides = [1, 1]} : vector<8x128xf32> to vector<8x32xf32>
    %628 = arith.negf %627 : vector<8x32xf32>
    %629 = math.exp %628 : vector<8x32xf32>
    %cst_189 = arith.constant 1.000000e+00 : f32
    %630 = vector.broadcast %cst_189 : f32 to vector<8x32xf32>
    %631 = arith.addf %630, %629 : vector<8x32xf32>
    %632 = arith.divf %630, %631 : vector<8x32xf32>
    %633 = vector.extract_strided_slice %620 {offsets = [0, 64], sizes = [8, 32], strides = [1, 1]} : vector<8x128xf32> to vector<8x32xf32>
    %634 = math.tanh %633 : vector<8x32xf32>
    %635 = vector.extract_strided_slice %620 {offsets = [0, 96], sizes = [8, 32], strides = [1, 1]} : vector<8x128xf32> to vector<8x32xf32>
    %636 = arith.negf %635 : vector<8x32xf32>
    %637 = math.exp %636 : vector<8x32xf32>
    %cst_190 = arith.constant 1.000000e+00 : f32
    %638 = vector.broadcast %cst_190 : f32 to vector<8x32xf32>
    %639 = arith.addf %638, %637 : vector<8x32xf32>
    %640 = arith.divf %638, %639 : vector<8x32xf32>
    %641 = arith.mulf %632, %613 : vector<8x32xf32>
    %642 = arith.mulf %626, %634 : vector<8x32xf32>
    %643 = arith.addf %641, %642 : vector<8x32xf32>
    %644 = math.tanh %643 : vector<8x32xf32>
    %645 = arith.mulf %640, %644 : vector<8x32xf32>
    %c2_i32_191 = arith.constant 2 : i32
    %646 = arith.index_cast %c2_i32_191 : i32 to index
    %c0_192 = arith.constant 0 : index
    %c0_193 = arith.constant 0 : index
    %647 = vector.load %arg16[%646, %c0_192, %c0_193] : memref<8x8x128xf32, #tpu.memory_space<vmem>>, vector<1x8x128xf32>
    %648 = vector.shape_cast %647 : vector<1x8x128xf32> to vector<8x128xf32>
    %cst_194 = arith.constant dense<0.000000e+00> : vector<8x128xf32>
    %649 = tpu.matmul %645, %573, %cst_194 {dimension_numbers = #tpu.dot_dimension_numbers<[1], [0], [0], [1], [0, 0, 1, 1], [], []>} : vector<8x32xf32>, vector<32x128xf32>, vector<8x128xf32> -> vector<8x128xf32>
    %650 = arith.addf %648, %649 : vector<8x128xf32>
    %651 = vector.extract_strided_slice %650 {offsets = [0, 0], sizes = [8, 32], strides = [1, 1]} : vector<8x128xf32> to vector<8x32xf32>
    %652 = arith.negf %651 : vector<8x32xf32>
    %653 = math.exp %652 : vector<8x32xf32>
    %cst_195 = arith.constant 1.000000e+00 : f32
    %654 = vector.broadcast %cst_195 : f32 to vector<8x32xf32>
    %655 = arith.addf %654, %653 : vector<8x32xf32>
    %656 = arith.divf %654, %655 : vector<8x32xf32>
    %657 = vector.extract_strided_slice %650 {offsets = [0, 32], sizes = [8, 32], strides = [1, 1]} : vector<8x128xf32> to vector<8x32xf32>
    %658 = arith.negf %657 : vector<8x32xf32>
    %659 = math.exp %658 : vector<8x32xf32>
    %cst_196 = arith.constant 1.000000e+00 : f32
    %660 = vector.broadcast %cst_196 : f32 to vector<8x32xf32>
    %661 = arith.addf %660, %659 : vector<8x32xf32>
    %662 = arith.divf %660, %661 : vector<8x32xf32>
    %663 = vector.extract_strided_slice %650 {offsets = [0, 64], sizes = [8, 32], strides = [1, 1]} : vector<8x128xf32> to vector<8x32xf32>
    %664 = math.tanh %663 : vector<8x32xf32>
    %665 = vector.extract_strided_slice %650 {offsets = [0, 96], sizes = [8, 32], strides = [1, 1]} : vector<8x128xf32> to vector<8x32xf32>
    %666 = arith.negf %665 : vector<8x32xf32>
    %667 = math.exp %666 : vector<8x32xf32>
    %cst_197 = arith.constant 1.000000e+00 : f32
    %668 = vector.broadcast %cst_197 : f32 to vector<8x32xf32>
    %669 = arith.addf %668, %667 : vector<8x32xf32>
    %670 = arith.divf %668, %669 : vector<8x32xf32>
    %671 = arith.mulf %662, %643 : vector<8x32xf32>
    %672 = arith.mulf %656, %664 : vector<8x32xf32>
    %673 = arith.addf %671, %672 : vector<8x32xf32>
    %674 = math.tanh %673 : vector<8x32xf32>
    %675 = arith.mulf %670, %674 : vector<8x32xf32>
    %c3_i32_198 = arith.constant 3 : i32
    %676 = arith.index_cast %c3_i32_198 : i32 to index
    %c0_199 = arith.constant 0 : index
    %c0_200 = arith.constant 0 : index
    %677 = vector.load %arg16[%676, %c0_199, %c0_200] : memref<8x8x128xf32, #tpu.memory_space<vmem>>, vector<1x8x128xf32>
    %678 = vector.shape_cast %677 : vector<1x8x128xf32> to vector<8x128xf32>
    %cst_201 = arith.constant dense<0.000000e+00> : vector<8x128xf32>
    %679 = tpu.matmul %675, %573, %cst_201 {dimension_numbers = #tpu.dot_dimension_numbers<[1], [0], [0], [1], [0, 0, 1, 1], [], []>} : vector<8x32xf32>, vector<32x128xf32>, vector<8x128xf32> -> vector<8x128xf32>
    %680 = arith.addf %678, %679 : vector<8x128xf32>
    %681 = vector.extract_strided_slice %680 {offsets = [0, 0], sizes = [8, 32], strides = [1, 1]} : vector<8x128xf32> to vector<8x32xf32>
    %682 = arith.negf %681 : vector<8x32xf32>
    %683 = math.exp %682 : vector<8x32xf32>
    %cst_202 = arith.constant 1.000000e+00 : f32
    %684 = vector.broadcast %cst_202 : f32 to vector<8x32xf32>
    %685 = arith.addf %684, %683 : vector<8x32xf32>
    %686 = arith.divf %684, %685 : vector<8x32xf32>
    %687 = vector.extract_strided_slice %680 {offsets = [0, 32], sizes = [8, 32], strides = [1, 1]} : vector<8x128xf32> to vector<8x32xf32>
    %688 = arith.negf %687 : vector<8x32xf32>
    %689 = math.exp %688 : vector<8x32xf32>
    %cst_203 = arith.constant 1.000000e+00 : f32
    %690 = vector.broadcast %cst_203 : f32 to vector<8x32xf32>
    %691 = arith.addf %690, %689 : vector<8x32xf32>
    %692 = arith.divf %690, %691 : vector<8x32xf32>
    %693 = vector.extract_strided_slice %680 {offsets = [0, 64], sizes = [8, 32], strides = [1, 1]} : vector<8x128xf32> to vector<8x32xf32>
    %694 = math.tanh %693 : vector<8x32xf32>
    %695 = vector.extract_strided_slice %680 {offsets = [0, 96], sizes = [8, 32], strides = [1, 1]} : vector<8x128xf32> to vector<8x32xf32>
    %696 = arith.negf %695 : vector<8x32xf32>
    %697 = math.exp %696 : vector<8x32xf32>
    %cst_204 = arith.constant 1.000000e+00 : f32
    %698 = vector.broadcast %cst_204 : f32 to vector<8x32xf32>
    %699 = arith.addf %698, %697 : vector<8x32xf32>
    %700 = arith.divf %698, %699 : vector<8x32xf32>
    %701 = arith.mulf %692, %673 : vector<8x32xf32>
    %702 = arith.mulf %686, %694 : vector<8x32xf32>
    %703 = arith.addf %701, %702 : vector<8x32xf32>
    %704 = math.tanh %703 : vector<8x32xf32>
    %705 = arith.mulf %700, %704 : vector<8x32xf32>
    %c4_i32_205 = arith.constant 4 : i32
    %706 = arith.index_cast %c4_i32_205 : i32 to index
    %c0_206 = arith.constant 0 : index
    %c0_207 = arith.constant 0 : index
    %707 = vector.load %arg16[%706, %c0_206, %c0_207] : memref<8x8x128xf32, #tpu.memory_space<vmem>>, vector<1x8x128xf32>
    %708 = vector.shape_cast %707 : vector<1x8x128xf32> to vector<8x128xf32>
    %cst_208 = arith.constant dense<0.000000e+00> : vector<8x128xf32>
    %709 = tpu.matmul %705, %573, %cst_208 {dimension_numbers = #tpu.dot_dimension_numbers<[1], [0], [0], [1], [0, 0, 1, 1], [], []>} : vector<8x32xf32>, vector<32x128xf32>, vector<8x128xf32> -> vector<8x128xf32>
    %710 = arith.addf %708, %709 : vector<8x128xf32>
    %711 = vector.extract_strided_slice %710 {offsets = [0, 0], sizes = [8, 32], strides = [1, 1]} : vector<8x128xf32> to vector<8x32xf32>
    %712 = arith.negf %711 : vector<8x32xf32>
    %713 = math.exp %712 : vector<8x32xf32>
    %cst_209 = arith.constant 1.000000e+00 : f32
    %714 = vector.broadcast %cst_209 : f32 to vector<8x32xf32>
    %715 = arith.addf %714, %713 : vector<8x32xf32>
    %716 = arith.divf %714, %715 : vector<8x32xf32>
    %717 = vector.extract_strided_slice %710 {offsets = [0, 32], sizes = [8, 32], strides = [1, 1]} : vector<8x128xf32> to vector<8x32xf32>
    %718 = arith.negf %717 : vector<8x32xf32>
    %719 = math.exp %718 : vector<8x32xf32>
    %cst_210 = arith.constant 1.000000e+00 : f32
    %720 = vector.broadcast %cst_210 : f32 to vector<8x32xf32>
    %721 = arith.addf %720, %719 : vector<8x32xf32>
    %722 = arith.divf %720, %721 : vector<8x32xf32>
    %723 = vector.extract_strided_slice %710 {offsets = [0, 64], sizes = [8, 32], strides = [1, 1]} : vector<8x128xf32> to vector<8x32xf32>
    %724 = math.tanh %723 : vector<8x32xf32>
    %725 = vector.extract_strided_slice %710 {offsets = [0, 96], sizes = [8, 32], strides = [1, 1]} : vector<8x128xf32> to vector<8x32xf32>
    %726 = arith.negf %725 : vector<8x32xf32>
    %727 = math.exp %726 : vector<8x32xf32>
    %cst_211 = arith.constant 1.000000e+00 : f32
    %728 = vector.broadcast %cst_211 : f32 to vector<8x32xf32>
    %729 = arith.addf %728, %727 : vector<8x32xf32>
    %730 = arith.divf %728, %729 : vector<8x32xf32>
    %731 = arith.mulf %722, %703 : vector<8x32xf32>
    %732 = arith.mulf %716, %724 : vector<8x32xf32>
    %733 = arith.addf %731, %732 : vector<8x32xf32>
    %734 = math.tanh %733 : vector<8x32xf32>
    %735 = arith.mulf %730, %734 : vector<8x32xf32>
    %c5_i32_212 = arith.constant 5 : i32
    %736 = arith.index_cast %c5_i32_212 : i32 to index
    %c0_213 = arith.constant 0 : index
    %c0_214 = arith.constant 0 : index
    %737 = vector.load %arg16[%736, %c0_213, %c0_214] : memref<8x8x128xf32, #tpu.memory_space<vmem>>, vector<1x8x128xf32>
    %738 = vector.shape_cast %737 : vector<1x8x128xf32> to vector<8x128xf32>
    %cst_215 = arith.constant dense<0.000000e+00> : vector<8x128xf32>
    %739 = tpu.matmul %735, %573, %cst_215 {dimension_numbers = #tpu.dot_dimension_numbers<[1], [0], [0], [1], [0, 0, 1, 1], [], []>} : vector<8x32xf32>, vector<32x128xf32>, vector<8x128xf32> -> vector<8x128xf32>
    %740 = arith.addf %738, %739 : vector<8x128xf32>
    %741 = vector.extract_strided_slice %740 {offsets = [0, 0], sizes = [8, 32], strides = [1, 1]} : vector<8x128xf32> to vector<8x32xf32>
    %742 = arith.negf %741 : vector<8x32xf32>
    %743 = math.exp %742 : vector<8x32xf32>
    %cst_216 = arith.constant 1.000000e+00 : f32
    %744 = vector.broadcast %cst_216 : f32 to vector<8x32xf32>
    %745 = arith.addf %744, %743 : vector<8x32xf32>
    %746 = arith.divf %744, %745 : vector<8x32xf32>
    %747 = vector.extract_strided_slice %740 {offsets = [0, 32], sizes = [8, 32], strides = [1, 1]} : vector<8x128xf32> to vector<8x32xf32>
    %748 = arith.negf %747 : vector<8x32xf32>
    %749 = math.exp %748 : vector<8x32xf32>
    %cst_217 = arith.constant 1.000000e+00 : f32
    %750 = vector.broadcast %cst_217 : f32 to vector<8x32xf32>
    %751 = arith.addf %750, %749 : vector<8x32xf32>
    %752 = arith.divf %750, %751 : vector<8x32xf32>
    %753 = vector.extract_strided_slice %740 {offsets = [0, 64], sizes = [8, 32], strides = [1, 1]} : vector<8x128xf32> to vector<8x32xf32>
    %754 = math.tanh %753 : vector<8x32xf32>
    %755 = vector.extract_strided_slice %740 {offsets = [0, 96], sizes = [8, 32], strides = [1, 1]} : vector<8x128xf32> to vector<8x32xf32>
    %756 = arith.negf %755 : vector<8x32xf32>
    %757 = math.exp %756 : vector<8x32xf32>
    %cst_218 = arith.constant 1.000000e+00 : f32
    %758 = vector.broadcast %cst_218 : f32 to vector<8x32xf32>
    %759 = arith.addf %758, %757 : vector<8x32xf32>
    %760 = arith.divf %758, %759 : vector<8x32xf32>
    %761 = arith.mulf %752, %733 : vector<8x32xf32>
    %762 = arith.mulf %746, %754 : vector<8x32xf32>
    %763 = arith.addf %761, %762 : vector<8x32xf32>
    %764 = math.tanh %763 : vector<8x32xf32>
    %765 = arith.mulf %760, %764 : vector<8x32xf32>
    %c6_i32_219 = arith.constant 6 : i32
    %766 = arith.index_cast %c6_i32_219 : i32 to index
    %c0_220 = arith.constant 0 : index
    %c0_221 = arith.constant 0 : index
    %767 = vector.load %arg16[%766, %c0_220, %c0_221] : memref<8x8x128xf32, #tpu.memory_space<vmem>>, vector<1x8x128xf32>
    %768 = vector.shape_cast %767 : vector<1x8x128xf32> to vector<8x128xf32>
    %cst_222 = arith.constant dense<0.000000e+00> : vector<8x128xf32>
    %769 = tpu.matmul %765, %573, %cst_222 {dimension_numbers = #tpu.dot_dimension_numbers<[1], [0], [0], [1], [0, 0, 1, 1], [], []>} : vector<8x32xf32>, vector<32x128xf32>, vector<8x128xf32> -> vector<8x128xf32>
    %770 = arith.addf %768, %769 : vector<8x128xf32>
    %771 = vector.extract_strided_slice %770 {offsets = [0, 0], sizes = [8, 32], strides = [1, 1]} : vector<8x128xf32> to vector<8x32xf32>
    %772 = arith.negf %771 : vector<8x32xf32>
    %773 = math.exp %772 : vector<8x32xf32>
    %cst_223 = arith.constant 1.000000e+00 : f32
    %774 = vector.broadcast %cst_223 : f32 to vector<8x32xf32>
    %775 = arith.addf %774, %773 : vector<8x32xf32>
    %776 = arith.divf %774, %775 : vector<8x32xf32>
    %777 = vector.extract_strided_slice %770 {offsets = [0, 32], sizes = [8, 32], strides = [1, 1]} : vector<8x128xf32> to vector<8x32xf32>
    %778 = arith.negf %777 : vector<8x32xf32>
    %779 = math.exp %778 : vector<8x32xf32>
    %cst_224 = arith.constant 1.000000e+00 : f32
    %780 = vector.broadcast %cst_224 : f32 to vector<8x32xf32>
    %781 = arith.addf %780, %779 : vector<8x32xf32>
    %782 = arith.divf %780, %781 : vector<8x32xf32>
    %783 = vector.extract_strided_slice %770 {offsets = [0, 64], sizes = [8, 32], strides = [1, 1]} : vector<8x128xf32> to vector<8x32xf32>
    %784 = math.tanh %783 : vector<8x32xf32>
    %785 = vector.extract_strided_slice %770 {offsets = [0, 96], sizes = [8, 32], strides = [1, 1]} : vector<8x128xf32> to vector<8x32xf32>
    %786 = arith.negf %785 : vector<8x32xf32>
    %787 = math.exp %786 : vector<8x32xf32>
    %cst_225 = arith.constant 1.000000e+00 : f32
    %788 = vector.broadcast %cst_225 : f32 to vector<8x32xf32>
    %789 = arith.addf %788, %787 : vector<8x32xf32>
    %790 = arith.divf %788, %789 : vector<8x32xf32>
    %791 = arith.mulf %782, %763 : vector<8x32xf32>
    %792 = arith.mulf %776, %784 : vector<8x32xf32>
    %793 = arith.addf %791, %792 : vector<8x32xf32>
    %794 = math.tanh %793 : vector<8x32xf32>
    %795 = arith.mulf %790, %794 : vector<8x32xf32>
    %c7_i32_226 = arith.constant 7 : i32
    %796 = arith.index_cast %c7_i32_226 : i32 to index
    %c0_227 = arith.constant 0 : index
    %c0_228 = arith.constant 0 : index
    %797 = vector.load %arg16[%796, %c0_227, %c0_228] : memref<8x8x128xf32, #tpu.memory_space<vmem>>, vector<1x8x128xf32>
    %798 = vector.shape_cast %797 : vector<1x8x128xf32> to vector<8x128xf32>
    %cst_229 = arith.constant dense<0.000000e+00> : vector<8x128xf32>
    %799 = tpu.matmul %795, %573, %cst_229 {dimension_numbers = #tpu.dot_dimension_numbers<[1], [0], [0], [1], [0, 0, 1, 1], [], []>} : vector<8x32xf32>, vector<32x128xf32>, vector<8x128xf32> -> vector<8x128xf32>
    %800 = arith.addf %798, %799 : vector<8x128xf32>
    %801 = vector.extract_strided_slice %800 {offsets = [0, 0], sizes = [8, 32], strides = [1, 1]} : vector<8x128xf32> to vector<8x32xf32>
    %802 = arith.negf %801 : vector<8x32xf32>
    %803 = math.exp %802 : vector<8x32xf32>
    %cst_230 = arith.constant 1.000000e+00 : f32
    %804 = vector.broadcast %cst_230 : f32 to vector<8x32xf32>
    %805 = arith.addf %804, %803 : vector<8x32xf32>
    %806 = arith.divf %804, %805 : vector<8x32xf32>
    %807 = vector.extract_strided_slice %800 {offsets = [0, 32], sizes = [8, 32], strides = [1, 1]} : vector<8x128xf32> to vector<8x32xf32>
    %808 = arith.negf %807 : vector<8x32xf32>
    %809 = math.exp %808 : vector<8x32xf32>
    %cst_231 = arith.constant 1.000000e+00 : f32
    %810 = vector.broadcast %cst_231 : f32 to vector<8x32xf32>
    %811 = arith.addf %810, %809 : vector<8x32xf32>
    %812 = arith.divf %810, %811 : vector<8x32xf32>
    %813 = vector.extract_strided_slice %800 {offsets = [0, 64], sizes = [8, 32], strides = [1, 1]} : vector<8x128xf32> to vector<8x32xf32>
    %814 = math.tanh %813 : vector<8x32xf32>
    %815 = vector.extract_strided_slice %800 {offsets = [0, 96], sizes = [8, 32], strides = [1, 1]} : vector<8x128xf32> to vector<8x32xf32>
    %816 = arith.negf %815 : vector<8x32xf32>
    %817 = math.exp %816 : vector<8x32xf32>
    %cst_232 = arith.constant 1.000000e+00 : f32
    %818 = vector.broadcast %cst_232 : f32 to vector<8x32xf32>
    %819 = arith.addf %818, %817 : vector<8x32xf32>
    %820 = arith.divf %818, %819 : vector<8x32xf32>
    %821 = arith.mulf %812, %793 : vector<8x32xf32>
    %822 = arith.mulf %806, %814 : vector<8x32xf32>
    %823 = arith.addf %821, %822 : vector<8x32xf32>
    %824 = math.tanh %823 : vector<8x32xf32>
    %825 = arith.mulf %820, %824 : vector<8x32xf32>
    %c8_i32_233 = arith.constant 8 : i32
    %c7 = arith.constant 7 : index
    %c0_234 = arith.constant 0 : index
    %c0_235 = arith.constant 0 : index
    %826 = vector.load %arg18[%c7, %c0_234, %c0_235] : memref<8x8x32xf32, #tpu.memory_space<vmem>>, vector<1x8x32xf32>
    %827 = vector.shape_cast %826 : vector<1x8x32xf32> to vector<8x32xf32>
    %c7_236 = arith.constant 7 : index
    %c0_237 = arith.constant 0 : index
    %c0_238 = arith.constant 0 : index
    %828 = vector.load %arg19[%c7_236, %c0_237, %c0_238] : memref<8x8x32xf32, #tpu.memory_space<vmem>>, vector<1x8x32xf32>
    %829 = vector.shape_cast %828 : vector<1x8x32xf32> to vector<8x32xf32>
    %830 = tpu.concatenate %827, %829 in 1 : vector<8x32xf32>, vector<8x32xf32> -> vector<8x64xf32>
    %c0_239 = arith.constant 0 : index
    %c0_240 = arith.constant 0 : index
    %831 = vector.load %arg10[%c0_239, %c0_240] : memref<64x128xf32, #tpu.memory_space<vmem>>, vector<64x128xf32>
    %cst_241 = arith.constant dense<0.000000e+00> : vector<8x128xf32>
    %832 = tpu.matmul %830, %831, %cst_241 {dimension_numbers = #tpu.dot_dimension_numbers<[1], [0], [0], [1], [0, 0, 1, 1], [], []>} : vector<8x64xf32>, vector<64x128xf32>, vector<8x128xf32> -> vector<8x128xf32>
    %c0_242 = arith.constant 0 : index
    %c0_243 = arith.constant 0 : index
    %833 = vector.load %arg12[%c0_242, %c0_243] : memref<1x128xf32, #tpu.memory_space<vmem>>, vector<1x128xf32>
    %834 = vector.broadcast %833 : vector<1x128xf32> to vector<8x128xf32>
    %835 = arith.addf %832, %834 : vector<8x128xf32>
    %836 = vector.extract_strided_slice %835 {offsets = [0, 0], sizes = [8, 32], strides = [1, 1]} : vector<8x128xf32> to vector<8x32xf32>
    %837 = arith.negf %836 : vector<8x32xf32>
    %838 = math.exp %837 : vector<8x32xf32>
    %cst_244 = arith.constant 1.000000e+00 : f32
    %839 = vector.broadcast %cst_244 : f32 to vector<8x32xf32>
    %840 = arith.addf %839, %838 : vector<8x32xf32>
    %841 = arith.divf %839, %840 : vector<8x32xf32>
    %842 = vector.extract_strided_slice %835 {offsets = [0, 64], sizes = [8, 32], strides = [1, 1]} : vector<8x128xf32> to vector<8x32xf32>
    %843 = math.tanh %842 : vector<8x32xf32>
    %844 = vector.extract_strided_slice %835 {offsets = [0, 96], sizes = [8, 32], strides = [1, 1]} : vector<8x128xf32> to vector<8x32xf32>
    %845 = arith.negf %844 : vector<8x32xf32>
    %846 = math.exp %845 : vector<8x32xf32>
    %cst_245 = arith.constant 1.000000e+00 : f32
    %847 = vector.broadcast %cst_245 : f32 to vector<8x32xf32>
    %848 = arith.addf %847, %846 : vector<8x32xf32>
    %849 = arith.divf %847, %848 : vector<8x32xf32>
    %850 = arith.mulf %841, %843 : vector<8x32xf32>
    %851 = math.tanh %850 : vector<8x32xf32>
    %852 = arith.mulf %849, %851 : vector<8x32xf32>
    %853 = tpu.concatenate %825, %852 in 1 : vector<8x32xf32>, vector<8x32xf32> -> vector<8x64xf32>
    %c0_246 = arith.constant 0 : index
    %c0_247 = arith.constant 0 : index
    %854 = vector.load %arg13[%c0_246, %c0_247] : memref<64x128xf32, #tpu.memory_space<vmem>>, vector<64x128xf32>
    %cst_248 = arith.constant dense<0.000000e+00> : vector<8x128xf32>
    %855 = tpu.matmul %853, %854, %cst_248 {dimension_numbers = #tpu.dot_dimension_numbers<[1], [0], [0], [1], [0, 0, 1, 1], [], []>} : vector<8x64xf32>, vector<64x128xf32>, vector<8x128xf32> -> vector<8x128xf32>
    %c0_249 = arith.constant 0 : index
    %c0_250 = arith.constant 0 : index
    %856 = vector.load %arg14[%c0_249, %c0_250] : memref<1x128xf32, #tpu.memory_space<vmem>>, vector<1x128xf32>
    %857 = vector.broadcast %856 : vector<1x128xf32> to vector<8x128xf32>
    %858 = arith.addf %855, %857 : vector<8x128xf32>
    %c0_251 = arith.constant 0 : index
    %c0_252 = arith.constant 0 : index
    %859 = vector.load %arg15[%c0_251, %c0_252] : memref<8x128xf32, #tpu.memory_space<vmem>>, vector<8x128xf32>
    tpu.vector_store %arg15[%c0_251, %c0_252], %858 {strides = array<i32>} : memref<8x128xf32, #tpu.memory_space<vmem>>, vector<8x128xf32>,
    return
  }
}

</mosaic_0001>

<bundles_post_ra>
// kernel: model6_forward.1
= control target key start
LH: loop header
LB: loop body
LE: loop exit
PB: predicated region body
PF: predicated region fallthrough
CT: control target
= control target key end

     0   :  { %vm71_vm0 = vcmask 130048   ;;  %v4287_v12 = vmov 0.0|0.0   ;;  %vm4288_vm1 = vmmov 0   ;;  %v4289_v21 = vmov 0.0   ;;  %s4290_s20 = smov 64   ;;  %s5016_s1 = inlined_call_operand.vmem [shape: f32[16,128], index: 1, kind: input, shape index: {}]   ;;  %s5017_s0 = inlined_call_operand.vmem [shape: f32[8,8,16], index: 0, kind: input, shape index: {}]   ;;  %s5018_s4 = inlined_call_operand.vmem [shape: f32[16,128], index: 4, kind: input, shape index: {}]   ;;  %s5019_s11 = inlined_call_operand.vmem [shape: f32[32,128], index: 11, kind: input, shape index: {}]   ;;  %s5020_s5 = inlined_call_operand.vmem [shape: f32[32,128], index: 5, kind: input, shape index: {}]   ;;  %s5021_s6 = inlined_call_operand.vmem [shape: f32[1,128], index: 6, kind: input, shape index: {}]   ;;  %s5022_s2 = inlined_call_operand.vmem [shape: f32[32,128], index: 2, kind: input, shape index: {}]   ;;  %s5023_s3 = inlined_call_operand.vmem [shape: f32[1,128], index: 3, kind: input, shape index: {}]   ;;  %s5024_s7 = inlined_call_operand.vmem [shape: f32[64,128], index: 7, kind: input, shape index: {}]   ;;  %s5025_s8 = inlined_call_operand.vmem [shape: f32[32,128], index: 8, kind: input, shape index: {}]   ;;  %s5026_s9 = inlined_call_operand.vmem [shape: f32[1,128], index: 9, kind: input, shape index: {}]   ;;  %s5027_s10 = inlined_call_operand.vmem [shape: f32[64,128], index: 10, kind: input, shape index: {}]   ;;  %s5028_s12 = inlined_call_operand.vmem [shape: f32[1,128], index: 12, kind: input, shape index: {}]   ;;  %s5029_s13 = inlined_call_operand.vmem [shape: f32[64,128], index: 13, kind: input, shape index: {}]   ;;  %s5030_s14 = inlined_call_operand.vmem [shape: f32[1,128], index: 14, kind: input, shape index: {}]   ;;  %s5031_s15 = inlined_call_operand.vmem [shape: f32[8,128], index: 15, kind: output, shape index: {}]  }
   0x1   :  { %v54_v0 = vld [vmem:[%s5016_s1] sm:$0xff]  ;;  %v55_v1 = vld [vmem:[%s5016_s1 + $0x8] sm:$0xff]  ;;  %v63_v2 = vld [vmem:[%s5017_s0 + $0x30] sm:$0xff]  ;;  %vm368_vm2 = vcmask 261120   ;;  %vm2118_vm3 = vcmask 523264  }
   0x2   :  { %v3887_v3 = vpack.c.bf16 %v55_v1, %v54_v0  ;;  %3538 = vmatprep.mubr.msk.f32.mxu1 %vm71_vm0, %v63_v2  ;;  %v213_v4 = vld [vmem:[%s5018_s4] sm:$0xff]  ;;  %v214_v5 = vld [vmem:[%s5018_s4 + $0x8] sm:$0xff]  ;;  %v64_v7 = vld [vmem:[%s5017_s0 + $0x38] sm:$0xff] }
   0x3   :  { %v3891_v6 = vpack.c.bf16 %v214_v5, %v213_v4  ;;  %v216_v8 = vld [vmem:[%s5017_s0] sm:$0xff]  ;;  %v210_v10 = vld [vmem:[%s5020_s5 + $0x8] sm:$0xff]  ;;  %v218_v14 = vld [vmem:[%s5017_s0 + $0x10] sm:$0xff] }
   0x4   :  { %4079 = vmatprep.subr.bf16.mxu1 %v3887_v3  ;;  %3888 = vmatprep.subr.bf16.mxu0 %v3887_v3  ;;  %v209_v9 = vld [vmem:[%s5020_s5] sm:$0xff]  ;;  %v217_v11 = vld [vmem:[%s5017_s0 + $0x8] sm:$0xff]  ;;  %v211_v15 = vld [vmem:[%s5020_s5 + $0x10] sm:$0xff] }
   0x5   :  { %4080 = vmatpush3.bf16.msra.mxu1 %v3887_v3  ;;  %3890 = vmatpush3.bf16.msra.mxu0 %v3887_v3  ;;  %v4409_v13 = vpack.c.bf16 %v210_v10, %v209_v9  ;;  %v212_v16 = vld [vmem:[%s5020_s5 + $0x18] sm:$0xff]  ;;  %v220_v18 = vld [vmem:[%s5017_s0 + $0x20] sm:$0xff]  ;;  %v221_v20 = vld [vmem:[%s5017_s0 + $0x28] sm:$0xff] }
   0x6   :  { %3892 = vmatprep.subr.bf16.mxu1 %v3891_v6  ;;  %3529 = vmatprep.mubr.msk.f32.mxu0 %vm71_vm0, %v216_v8  ;;  %v219_v17 = vld [vmem:[%s5017_s0 + $0x18] sm:$0xff]  ;;  %v4432_v19 = vpack.c.bf16 %v212_v16, %v211_v15  ;;  %v3283_v24 = vld [vmem:[%s5021_s6] ss:$0 sm:$0xff]  ;;  %v51_v45 = vld [vmem:[%s5022_s2 + $0x8] sm:$0xff] }
   0x7   :  { %3895 = vmatprep.subr.bf16.mxu0 %v4287_v12  ;;  %v50_v44 = vld [vmem:[%s5022_s2] sm:$0xff]  ;;  %v52_v46 = vld [vmem:[%s5022_s2 + $0x10] sm:$0xff]  ;;  %v53_v48 = vld [vmem:[%s5022_s2 + $0x18] sm:$0xff]  ;;  %s4291_s2 = smov 32  }
   0x8   :  { %3539 = vmatmul.mubr.msk.f32.vlgmr.msra.gmra.mrb[0].mxu1 %vm71_vm0, %v64_v7  ;;  %3530 = vmatmul.mubr.msk.f32.vlgmr.msra.gmra.mrb[0].mxu0 %vm71_vm0, %v217_v11  ;;  %v4488_v47 = vpack.c.bf16 %v51_v45, %v50_v44  ;;  %v4494_v49 = vpack.c.bf16 %v53_v48, %v52_v46  ;;  %v4521_v63 = vld [vmem:[%s5023_s3] ss:$0 sm:$0xff] }
   0x9   :  { %3894 = vmatpush3.bf16.msra.mxu1 %v3891_v6  ;;  %3545 = vmatprep.mubr.msk.f32.mxu1 %vm71_vm0, %v216_v8 }
   0xa   :  { %3901 = vmatprep.subr.bf16.mxu1 %v4287_v12  ;;  %3532 = vmatprep.mubr.msk.f32.mxu0 %vm71_vm0, %v218_v14 }
   0xb   :  { %3897 = vmatpush3.bf16.msra.mxu0 %v4488_v47 }
   0xc   :  { %3546 = vmatmul.mubr.msk.f32.vlgmr.msra.gmra.mrb[2].mxu1 %vm71_vm0, %v217_v11  ;;  %3533 = vmatmul.mubr.msk.f32.gmra.mrb[2].mxu0 %vm71_vm0, %v219_v17 }
   0xd   :  { %3903 = vmatpush3.bf16.msra.mxu1 %v4409_v13  ;;  %3548 = vmatprep.mubr.msk.f32.mxu1 %vm71_vm0, %v218_v14 }
   0xe   :  { %3904 = vmatprep.subr.bf16.mxu1 %v4287_v12  ;;  %3535 = vmatprep.mubr.msk.f32.mxu0 %vm71_vm0, %v220_v18 }
   0xf   :  { %3898 = vmatprep.subr.bf16.mxu0 %v4287_v12 }
  0x10   :  { %3549 = vmatmul.mubr.msk.f32.gmra.mrb[4].mxu1 %vm71_vm0, %v219_v17  ;;  %3536 = vmatmul.mubr.msk.f32.gmra.mrb[4].mxu0 %vm71_vm0, %v221_v20 }
  0x11   :  { %3551 = vmatprep.mubr.msk.f32.mxu1 %vm71_vm0, %v220_v18  ;;  %3906 = vmatpush3.bf16.msra.mxu1 %v4432_v19 }
  0x12   :  { %3565 = vmatprep.mubr.msk.f32.mxu0 %vm4288_vm1, %v4289_v21  ;;  %3913 = vmatprep.subr.bf16.mxu1 %v4287_v12 }
  0x13   :  { %3900 = vmatpush3.bf16.msra.mxu0 %v4494_v49 }
  0x14   :  { %3552 = vmatmul.mubr.msk.f32.gmra.mrb[6].mxu1 %vm71_vm0, %v221_v20  ;;  %3907 = vmatprep.subr.bf16.mxu0 %v4287_v12 }
  0x15   :  { %3554 = vmatprep.mubr.msk.f32.mxu1 %vm71_vm0, %v63_v2 }
  0x16   :  { %3566 = vmatmul.mubr.f32.vlgmr.msra.gmra.mrb[6].mxu0 %v4289_v21 }
  0x17   :  { %3909 = vmatpush3.bf16.msra.mxu0 %v4488_v47  ;;  %3587 = vmatprep.mubr.msk.f32.mxu0 %vm4288_vm1, %v4289_v21 }
  0x18   :  { %3555 = vmatmul.mubr.msk.f32.gmra.mrb[8].mxu1 %vm71_vm0, %v64_v7  ;;  %3910 = vmatprep.subr.bf16.mxu0 %v4287_v12 }
  0x19   :  { %3576 = vmatprep.mubr.msk.f32.mxu1 %vm4288_vm1, %v4289_v21 }
  0x1b   :  { %3912 = vmatpush3.bf16.msra.mxu0 %v4494_v49 }
  0x1c   :  { %3577 = vmatmul.mubr.f32.vlgmr.msra.gmra.mrb[10].mxu1 %v4289_v21  ;;  %3919 = vmatprep.subr.bf16.mxu0 %v4287_v12 }
  0x1d   :  { %3915 = vmatpush3.bf16.msra.mxu1 %v4409_v13  ;;  %3598 = vmatprep.mubr.msk.f32.mxu1 %vm4288_vm1, %v4289_v21 }
  0x1e   :  { %3916 = vmatprep.subr.bf16.mxu1 %v4287_v12 }
  0x21   :  { %3918 = vmatpush3.bf16.msra.mxu1 %v4432_v19 }
  0x22   :  { %3925 = vmatprep.subr.bf16.mxu1 %v4287_v12 }
  0xdb   :  { %v4458_v22 = vpop.f32.mrb[0].mxu1  ;;  %v4508_v57 = vpop.f32.mrb[0].mxu0 }
  0xdc   :  { %v4460_v23 = vpop.f32.mrb[1].mxu1  ;;  %v162_v58 = vpop.f32.mrb[1].mxu0 }
  0xdd   :  { %v163_v0 = vadd.f32 %v4521_v63, %v162_v58 }
  0xdf   :  { %v3547_v25 = vpop.f32.mrb[2].mxu1  ;;  %v4510_v59 = vpop.f32.mrb[2].mxu0 }
  0xe0   :  { %v4465_v26 = vadd.f32 %v3547_v25, %v3283_v24  ;;  %v320_v27 = vpop.f32.mrb[3].mxu1  ;;  %v4512_v60 = vpop.f32.mrb[3].mxu0 }
  0xe1   :  { %v4467_v28 = vadd.f32 %v3283_v24, %v320_v27 }
  0xe3   :  { %v3550_v29 = vpop.f32.mrb[4].mxu1  ;;  %v4514_v61 = vpop.f32.mrb[4].mxu0 }
  0xe4   :  { %v4469_v30 = vadd.f32 %v3550_v29, %v3283_v24  ;;  %v330_v31 = vpop.f32.mrb[5].mxu1  ;;  %v4516_v62 = vpop.f32.mrb[5].mxu0 }
  0xe5   :  { %v4471_v32 = vadd.f32 %v3283_v24, %v330_v31 }
  0xe7   :  { %v3553_v33 = vpop.f32.mrb[6].mxu1 }
  0xe8   :  { %v4473_v34 = vadd.f32 %v3553_v33, %v3283_v24  ;;  %v340_v35 = vpop.f32.mrb[7].mxu1 }
  0xe9   :  { %v4475_v36 = vadd.f32 %v3283_v24, %v340_v35  ;;  %v438_v1 = vpop.f32.mrb[6].mxu0 }
  0xea   :  { %v442_v2 = vadd.f32 %v438_v1, %v163_v0  ;;  %v3567_v3 = vpop.f32.mrb[7].mxu0 }
  0xeb   :  { %v3556_v37 = vpop.f32.mrb[8].mxu1 }
  0xec   :  { %v350_v38 = vpop.f32.mrb[9].mxu1  ;;  %v356_v40 = vadd.f32 %v3556_v37, %v3283_v24  ;;  %v3292_v11 = vmul.f32 -1.442695, %v442_v2 }
  0xed   :  { %v4477_v39 = vadd.f32 %v3283_v24, %v350_v38 }
  0xef   :  { %v540_v41 = vpop.f32.mrb[10].mxu1 }
  0xf0   :  { %v544_v42 = vadd.f32 %v540_v41, %v356_v40  ;;  %v3578_v43 = vpop.f32.mrb[11].mxu1 }
  0xf2   :  { %4087 = vtanh.f32 %v544_v42  ;;  %v3293_v51 = vmul.f32 -1.442695, %v544_v42 }
  0xf4   :  { %4089 = vpow2.f32 %v3293_v51 }
  0xfc   :  { %v4088_v50 = vpop.eup %4087 }
  0xfd   :  { %554 = vrot.lane.b32.xlu0 %v4088_v50, %s4290_s20 }
  0xfe   :  { %v4090_v52 = vpop.eup %4089 }
  0xff   :  { %v548_v53 = vadd.f32 1.0, %v4090_v52 }
 0x101   :  { %4091 = vrcp.f32 %v548_v53  ;;  %v168_v53 = vadd.f32 %v4508_v57, %v4521_v63 }
 0x10b   :  { %v4092_v54 = vpop.eup %4091 }
 0x10c   :  { %v552_v4 = vmul.f32 0.0, %v4092_v54 }
 0x16f   :  { %v555_v55 = vpop.permute.xlu0 %554 }
 0x170   :  { %v557_v56 = vmul.f32 %v4092_v54, %v555_v55 }
 0x172   :  { %559 = vrot.lane.b32.xlu0 %v557_v56, %s4291_s2 }
 0x1e4   :  { %v560_v5 = vpop.permute.xlu0 %559 }
 0x1e5   :  { %v562_v6 = vadd.f32 %v560_v5, %v552_v4 }
 0x1e7   :  { %4093 = vtanh.f32 %v562_v6 }
 0x1e8   :  { %4095 = vtanh.f32 %v442_v2 }
 0x1e9   :  { %4097 = vpow2.f32 %v3292_v11 }
 0x1f1   :  { %v4094_v7 = vpop.eup %4093 }
 0x1f2   :  { %565 = vrot.lane.b32.xlu1 %v4094_v7, %s4290_s20  ;;  %v4096_v10 = vpop.eup %4095 }
 0x1f3   :  { %v4098_v14 = vpop.eup %4097 }
 0x1f4   :  { %v446_v15 = vadd.f32 1.0, %v4098_v14 }
 0x1f6   :  { %4099 = vrcp.f32 %v446_v15 }
 0x200   :  { %v4100_v17 = vpop.eup %4099 }
 0x201   :  { %v450_v24 = vmul.f32 0.0, %v4100_v17 }
 0x264   :  { %v566_v8 = vpop.permute.xlu1 %565 }
 0x265   :  { %v568_v9 = vmul.f32 %v4092_v54, %v566_v8 }
 0x267   :  { %570 = vrot.lane.b32.xlu1 %v568_v9, %s4291_s2 }
 0x26b   :  { %452 = vrot.lane.b32.xlu1 %v4096_v10, %s4290_s20 }
 0x2d9   :  { %v571_v16 = vpop.permute.xlu1 %570 }
 0x2da   :  { %574 = vst.msk [vmem:[#allocation5 + $0x38] sm:$0xff] %vm368_vm2, %v571_v16  ;;  %3599 = vmatmul.mubr.msk.f32.vlgmr.msra.gmra.mrb[12].mxu1 %vm368_vm2, %v571_v16 }
 0x2db   :  { %3927 = vmatpush3.bf16.msra.mxu1 %v4409_v13  ;;  %3620 = vmatprep.mubr.msk.f32.mxu1 %vm4288_vm1, %v4289_v21 }
 0x2dc   :  { %3928 = vmatprep.subr.bf16.mxu1 %v4287_v12 }
 0x2dd   :  { %v453_v18 = vpop.permute.xlu1 %452 }
 0x2de   :  { %v455_v20 = vmul.f32 %v4100_v17, %v453_v18 }
 0x2df   :  { %3930 = vmatpush3.bf16.msra.mxu1 %v4432_v19 }
 0x2e0   :  { %457 = vrot.lane.b32.xlu1 %v455_v20, %s4291_s2  ;;  %3937 = vmatprep.subr.bf16.mxu1 %v4287_v12 }
 0x352   :  { %v458_v25 = vpop.permute.xlu1 %457 }
 0x353   :  { %v4536_v27 = vadd.f32 %v458_v25, %v450_v24 }
 0x355   :  { %4101 = vtanh.f32 %v4536_v27 }
 0x35f   :  { %v4102_v29 = vpop.eup %4101 }
 0x360   :  { %463 = vrot.lane.b32.xlu1 %v4102_v29, %s4290_s20 }
 0x3ad   :  { %v750_v31 = vpop.f32.mrb[12].mxu1 }
 0x3ae   :  { %v754_v33 = vadd.f32 %v750_v31, %v4477_v39  ;;  %v3600_v35 = vpop.f32.mrb[13].mxu1 }
 0x3b0   :  { %4103 = vtanh.f32 %v754_v33  ;;  %v3297_v41 = vmul.f32 -1.442695, %v754_v33 }
 0x3b2   :  { %4105 = vpow2.f32 %v3297_v41  ;;  %v173_v41 = vadd.f32 %v4521_v63, %v4512_v60 }
 0x3ba   :  { %v4104_v37 = vpop.eup %4103 }
 0x3bb   :  { %764 = vrot.lane.b32.xlu0 %v4104_v37, %s4290_s20 }
 0x3bc   :  { %v4106_v42 = vpop.eup %4105 }
 0x3bd   :  { %v758_v43 = vadd.f32 1.0, %v4106_v42 }
 0x3bf   :  { %4107 = vrcp.f32 %v758_v43 }
 0x3c9   :  { %v4108_v44 = vpop.eup %4107 }
 0x3ca   :  { %v762_v48 = vmul.f32 %v4108_v44, %v562_v6 }
 0x3d2   :  { %v464_v38 = vpop.permute.xlu1 %463 }
 0x3d3   :  { %v466_v40 = vmul.f32 %v4100_v17, %v464_v38 }
 0x3d5   :  { %468 = vrot.lane.b32.xlu1 %v466_v40, %s4291_s2 }
 0x42d   :  { %v765_v45 = vpop.permute.xlu0 %764 }
 0x42e   :  { %v767_v46 = vmul.f32 %v4108_v44, %v765_v45 }
 0x430   :  { %769 = vrot.lane.b32.xlu0 %v767_v46, %s4291_s2 }
 0x447   :  { %v469_v39 = vpop.permute.xlu1 %468 }
 0x448   :  { %471 = vst.msk [vmem:[#allocation4] sm:$0xff] %vm368_vm2, %v469_v39  ;;  %3588 = vmatmul.mubr.msk.f32.vlgmr.msra.gmra.mrb[8].mxu0 %vm368_vm2, %v469_v39 }
 0x449   :  { %3921 = vmatpush3.bf16.msra.mxu0 %v4488_v47  ;;  %3609 = vmatprep.mubr.msk.f32.mxu0 %vm4288_vm1, %v4289_v21 }
 0x44a   :  { %3922 = vmatprep.subr.bf16.mxu0 %v4287_v12 }
 0x44d   :  { %3924 = vmatpush3.bf16.msra.mxu0 %v4494_v49 }
 0x44e   :  { %3931 = vmatprep.subr.bf16.mxu0 %v4287_v12 }
 0x4a2   :  { %v770_v50 = vpop.permute.xlu0 %769 }
 0x4a3   :  { %v4552_v51 = vadd.f32 %v770_v50, %v762_v48 }
 0x4a5   :  { %4109 = vtanh.f32 %v4552_v51 }
 0x4af   :  { %v4110_v52 = vpop.eup %4109 }
 0x4b0   :  { %775 = vrot.lane.b32.xlu0 %v4110_v52, %s4290_s20 }
 0x51b   :  { %v645_v54 = vpop.f32.mrb[8].mxu0 }
 0x51c   :  { %v649_v55 = vadd.f32 %v645_v54, %v168_v53  ;;  %v3589_v56 = vpop.f32.mrb[9].mxu0 }
 0x51e   :  { %4111 = vtanh.f32 %v649_v55  ;;  %v3295_v2 = vmul.f32 -1.442695, %v649_v55 }
 0x520   :  { %4113 = vpow2.f32 %v3295_v2 }
 0x522   :  { %v776_v58 = vpop.permute.xlu0 %775 }
 0x523   :  { %v778_v0 = vmul.f32 %v4108_v44, %v776_v58 }
 0x525   :  { %780 = vrot.lane.b32.xlu0 %v778_v0, %s4291_s2 }
 0x528   :  { %v4112_v1 = vpop.eup %4111 }
 0x529   :  { %659 = vrot.lane.b32.xlu1 %v4112_v1, %s4290_s20 }
 0x52a   :  { %v4114_v3 = vpop.eup %4113 }
 0x52b   :  { %v653_v4 = vadd.f32 1.0, %v4114_v3 }
 0x52d   :  { %4115 = vrcp.f32 %v653_v4 }
 0x537   :  { %v4116_v57 = vpop.eup %4115 }
 0x538   :  { %v657_v8 = vmul.f32 %v4116_v57, %v4536_v27 }
 0x597   :  { %v781_v5 = vpop.permute.xlu0 %780 }
 0x598   :  { %784 = vst.msk [vmem:[#allocation5 + $0x30] sm:$0xff] %vm368_vm2, %v781_v5  ;;  %3621 = vmatmul.mubr.msk.f32.vlgmr.msra.gmra.mrb[14].mxu1 %vm368_vm2, %v781_v5 }
 0x599   :  { %3939 = vmatpush3.bf16.msra.mxu1 %v4409_v13  ;;  %3642 = vmatprep.mubr.msk.f32.mxu1 %vm4288_vm1, %v4289_v21 }
 0x59a   :  { %3940 = vmatprep.subr.bf16.mxu1 %v4287_v12 }
 0x59b   :  { %v660_v6 = vpop.permute.xlu1 %659 }
 0x59c   :  { %v662_v7 = vmul.f32 %v4116_v57, %v660_v6 }
 0x59d   :  { %3942 = vmatpush3.bf16.msra.mxu1 %v4432_v19 }
 0x59e   :  { %664 = vrot.lane.b32.xlu1 %v662_v7, %s4291_s2  ;;  %3949 = vmatprep.subr.bf16.mxu1 %v4287_v12 }
 0x610   :  { %v665_v9 = vpop.permute.xlu1 %664 }
 0x611   :  { %v4570_v10 = vadd.f32 %v665_v9, %v657_v8 }
 0x613   :  { %4117 = vtanh.f32 %v4570_v10 }
 0x61d   :  { %v4118_v11 = vpop.eup %4117 }
 0x61e   :  { %670 = vrot.lane.b32.xlu1 %v4118_v11, %s4290_s20 }
 0x66b   :  { %v960_v14 = vpop.f32.mrb[14].mxu1 }
 0x66c   :  { %v964_v15 = vadd.f32 %v960_v14, %v4473_v34  ;;  %v3622_v16 = vpop.f32.mrb[15].mxu1 }
 0x66e   :  { %4119 = vtanh.f32 %v964_v15  ;;  %v3301_v24 = vmul.f32 -1.442695, %v964_v15 }
 0x670   :  { %4121 = vpow2.f32 %v3301_v24 }
 0x678   :  { %v4120_v17 = vpop.eup %4119 }
 0x679   :  { %974 = vrot.lane.b32.xlu0 %v4120_v17, %s4290_s20 }
 0x67a   :  { %v4122_v25 = vpop.eup %4121 }
 0x67b   :  { %v968_v27 = vadd.f32 1.0, %v4122_v25 }
 0x67d   :  { %4123 = vrcp.f32 %v968_v27 }
 0x687   :  { %v4124_v29 = vpop.eup %4123 }
 0x688   :  { %v972_v35 = vmul.f32 %v4124_v29, %v4552_v51 }
 0x690   :  { %v671_v18 = vpop.permute.xlu1 %670 }
 0x691   :  { %v673_v20 = vmul.f32 %v4116_v57, %v671_v18  ;;  %v178_v18 = vadd.f32 %v4510_v59, %v4521_v63 }
 0x693   :  { %675 = vrot.lane.b32.xlu1 %v673_v20, %s4291_s2 }
 0x6eb   :  { %v975_v31 = vpop.permute.xlu0 %974 }
 0x6ec   :  { %v977_v33 = vmul.f32 %v4124_v29, %v975_v31 }
 0x6ee   :  { %979 = vrot.lane.b32.xlu0 %v977_v33, %s4291_s2 }
 0x705   :  { %v676_v34 = vpop.permute.xlu1 %675 }
 0x706   :  { %679 = vst.msk [vmem:[#allocation4 + $0x8] sm:$0xff] %vm368_vm2, %v676_v34  ;;  %3610 = vmatmul.mubr.msk.f32.vlgmr.msra.gmra.mrb[10].mxu0 %vm368_vm2, %v676_v34 }
 0x707   :  { %3933 = vmatpush3.bf16.msra.mxu0 %v4488_v47  ;;  %3631 = vmatprep.mubr.msk.f32.mxu0 %vm4288_vm1, %v4289_v21 }
 0x708   :  { %3934 = vmatprep.subr.bf16.mxu0 %v4287_v12 }
 0x70b   :  { %3936 = vmatpush3.bf16.msra.mxu0 %v4494_v49 }
 0x70c   :  { %3943 = vmatprep.subr.bf16.mxu0 %v4287_v12 }
 0x760   :  { %v980_v37 = vpop.permute.xlu0 %979 }
 0x761   :  { %v4587_v38 = vadd.f32 %v980_v37, %v972_v35 }
 0x763   :  { %4125 = vtanh.f32 %v4587_v38 }
 0x76d   :  { %v4126_v40 = vpop.eup %4125 }
 0x76e   :  { %985 = vrot.lane.b32.xlu0 %v4126_v40, %s4290_s20 }
 0x7d9   :  { %v855_v42 = vpop.f32.mrb[10].mxu0 }
 0x7da   :  { %v859_v43 = vadd.f32 %v855_v42, %v173_v41  ;;  %v3611_v44 = vpop.f32.mrb[11].mxu0 }
 0x7dc   :  { %4127 = vtanh.f32 %v859_v43  ;;  %v3299_v48 = vmul.f32 -1.442695, %v859_v43 }
 0x7de   :  { %4129 = vpow2.f32 %v3299_v48 }
 0x7e0   :  { %v986_v45 = vpop.permute.xlu0 %985 }
 0x7e1   :  { %v988_v46 = vmul.f32 %v4124_v29, %v986_v45 }
 0x7e3   :  { %990 = vrot.lane.b32.xlu0 %v988_v46, %s4291_s2 }
 0x7e6   :  { %v4128_v39 = vpop.eup %4127 }
 0x7e7   :  { %869 = vrot.lane.b32.xlu1 %v4128_v39, %s4290_s20 }
 0x7e8   :  { %v4130_v50 = vpop.eup %4129 }
 0x7e9   :  { %v863_v51 = vadd.f32 1.0, %v4130_v50 }
 0x7eb   :  { %4131 = vrcp.f32 %v863_v51 }
 0x7f5   :  { %v4132_v60 = vpop.eup %4131 }
 0x7f6   :  { %v867_v55 = vmul.f32 %v4132_v60, %v4570_v10 }
 0x855   :  { %v991_v52 = vpop.permute.xlu0 %990 }
 0x856   :  { %994 = vst.msk [vmem:[#allocation5 + $0x28] sm:$0xff] %vm368_vm2, %v991_v52  ;;  %3643 = vmatmul.mubr.msk.f32.vlgmr.msra.gmra.mrb[16].mxu1 %vm368_vm2, %v991_v52 }
 0x857   :  { %3951 = vmatpush3.bf16.msra.mxu1 %v4409_v13  ;;  %3664 = vmatprep.mubr.msk.f32.mxu1 %vm4288_vm1, %v4289_v21 }
 0x858   :  { %3952 = vmatprep.subr.bf16.mxu1 %v4287_v12 }
 0x859   :  { %v870_v53 = vpop.permute.xlu1 %869 }
 0x85a   :  { %v872_v54 = vmul.f32 %v4132_v60, %v870_v53 }
 0x85b   :  { %3954 = vmatpush3.bf16.msra.mxu1 %v4432_v19 }
 0x85c   :  { %874 = vrot.lane.b32.xlu1 %v872_v54, %s4291_s2  ;;  %3961 = vmatprep.subr.bf16.mxu1 %v4287_v12 }
 0x8ce   :  { %v875_v56 = vpop.permute.xlu1 %874 }
 0x8cf   :  { %v4605_v58 = vadd.f32 %v875_v56, %v867_v55 }
 0x8d1   :  { %4133 = vtanh.f32 %v4605_v58 }
 0x8db   :  { %v4134_v0 = vpop.eup %4133 }
 0x8dc   :  { %880 = vrot.lane.b32.xlu1 %v4134_v0, %s4290_s20 }
 0x929   :  { %v1170_v1 = vpop.f32.mrb[16].mxu1 }
 0x92a   :  { %v1174_v2 = vadd.f32 %v1170_v1, %v4475_v36  ;;  %v3644_v3 = vpop.f32.mrb[17].mxu1 }
 0x92b   :  { %v183_v3 = vadd.f32 %v4521_v63, %v4516_v62 }
 0x92c   :  { %4135 = vtanh.f32 %v1174_v2  ;;  %v3305_v6 = vmul.f32 -1.442695, %v1174_v2 }
 0x92e   :  { %4137 = vpow2.f32 %v3305_v6 }
 0x936   :  { %v4136_v4 = vpop.eup %4135 }
 0x937   :  { %1184 = vrot.lane.b32.xlu0 %v4136_v4, %s4290_s20 }
 0x938   :  { %v4138_v7 = vpop.eup %4137 }
 0x939   :  { %v1178_v8 = vadd.f32 1.0, %v4138_v7 }
 0x93b   :  { %4139 = vrcp.f32 %v1178_v8 }
 0x945   :  { %v4140_v9 = vpop.eup %4139 }
 0x946   :  { %v1182_v14 = vmul.f32 %v4140_v9, %v4587_v38 }
 0x94e   :  { %v881_v5 = vpop.permute.xlu1 %880 }
 0x94f   :  { %v883_v57 = vmul.f32 %v4132_v60, %v881_v5 }
 0x951   :  { %885 = vrot.lane.b32.xlu1 %v883_v57, %s4291_s2 }
 0x9a9   :  { %v1185_v10 = vpop.permute.xlu0 %1184 }
 0x9aa   :  { %v1187_v11 = vmul.f32 %v4140_v9, %v1185_v10 }
 0x9ac   :  { %1189 = vrot.lane.b32.xlu0 %v1187_v11, %s4291_s2 }
 0x9c3   :  { %v886_v36 = vpop.permute.xlu1 %885 }
 0x9c4   :  { %889 = vst.msk [vmem:[#allocation4 + $0x10] sm:$0xff] %vm368_vm2, %v886_v36  ;;  %3632 = vmatmul.mubr.msk.f32.vlgmr.msra.gmra.mrb[12].mxu0 %vm368_vm2, %v886_v36 }
 0x9c5   :  { %3945 = vmatpush3.bf16.msra.mxu0 %v4488_v47  ;;  %3653 = vmatprep.mubr.msk.f32.mxu0 %vm4288_vm1, %v4289_v21 }
 0x9c6   :  { %3946 = vmatprep.subr.bf16.mxu0 %v4287_v12 }
 0x9c9   :  { %3948 = vmatpush3.bf16.msra.mxu0 %v4494_v49 }
 0x9ca   :  { %3955 = vmatprep.subr.bf16.mxu0 %v4287_v12 }
 0xa1e   :  { %v1190_v15 = vpop.permute.xlu0 %1189 }
 0xa1f   :  { %v4622_v16 = vadd.f32 %v1190_v15, %v1182_v14 }
 0xa21   :  { %4141 = vtanh.f32 %v4622_v16 }
 0xa2b   :  { %v4142_v17 = vpop.eup %4141 }
 0xa2c   :  { %1195 = vrot.lane.b32.xlu0 %v4142_v17, %s4290_s20 }
 0xa97   :  { %v1065_v20 = vpop.f32.mrb[12].mxu0 }
 0xa98   :  { %v1069_v24 = vadd.f32 %v1065_v20, %v178_v18  ;;  %v3633_v25 = vpop.f32.mrb[13].mxu0 }
 0xa9a   :  { %4143 = vtanh.f32 %v1069_v24  ;;  %v3303_v33 = vmul.f32 -1.442695, %v1069_v24 }
 0xa9c   :  { %4145 = vpow2.f32 %v3303_v33 }
 0xa9e   :  { %v1196_v27 = vpop.permute.xlu0 %1195 }
 0xa9f   :  { %v1198_v29 = vmul.f32 %v4140_v9, %v1196_v27 }
 0xaa1   :  { %1200 = vrot.lane.b32.xlu0 %v1198_v29, %s4291_s2 }
 0xaa4   :  { %v4144_v31 = vpop.eup %4143 }
 0xaa5   :  { %1079 = vrot.lane.b32.xlu1 %v4144_v31, %s4290_s20 }
 0xaa6   :  { %v4146_v34 = vpop.eup %4145 }
 0xaa7   :  { %v1073_v35 = vadd.f32 1.0, %v4146_v34 }
 0xaa9   :  { %4147 = vrcp.f32 %v1073_v35 }
 0xab3   :  { %v4148_v59 = vpop.eup %4147 }
 0xab4   :  { %v1077_v41 = vmul.f32 %v4148_v59, %v4605_v58 }
 0xb13   :  { %v1201_v37 = vpop.permute.xlu0 %1200 }
 0xb14   :  { %1204 = vst.msk [vmem:[#allocation5 + $0x20] sm:$0xff] %vm368_vm2, %v1201_v37  ;;  %3665 = vmatmul.mubr.msk.f32.vlgmr.msra.gmra.mrb[18].mxu1 %vm368_vm2, %v1201_v37 }
 0xb15   :  { %3963 = vmatpush3.bf16.msra.mxu1 %v4409_v13  ;;  %3686 = vmatprep.mubr.msk.f32.mxu1 %vm4288_vm1, %v4289_v21 }
 0xb16   :  { %3964 = vmatprep.subr.bf16.mxu1 %v4287_v12 }
 0xb17   :  { %v1080_v38 = vpop.permute.xlu1 %1079 }
 0xb18   :  { %v1082_v40 = vmul.f32 %v4148_v59, %v1080_v38 }
 0xb19   :  { %3966 = vmatpush3.bf16.msra.mxu1 %v4432_v19 }
 0xb1a   :  { %1084 = vrot.lane.b32.xlu1 %v1082_v40, %s4291_s2  ;;  %3973 = vmatprep.subr.bf16.mxu1 %v4287_v12 }
 0xb8c   :  { %v1085_v42 = vpop.permute.xlu1 %1084 }
 0xb8d   :  { %v4640_v43 = vadd.f32 %v1085_v42, %v1077_v41 }
 0xb8f   :  { %4149 = vtanh.f32 %v4640_v43 }
 0xb99   :  { %v4150_v44 = vpop.eup %4149 }
 0xb9a   :  { %1090 = vrot.lane.b32.xlu1 %v4150_v44, %s4290_s20 }
 0xbe7   :  { %v1380_v45 = vpop.f32.mrb[18].mxu1 }
 0xbe8   :  { %v1384_v46 = vadd.f32 %v1380_v45, %v4469_v30  ;;  %v3666_v39 = vpop.f32.mrb[19].mxu1  ;;  %v188_v45 = vadd.f32 %v4514_v61, %v4521_v63 }
 0xbea   :  { %4151 = vtanh.f32 %v1384_v46  ;;  %v3309_v52 = vmul.f32 -1.442695, %v1384_v46 }
 0xbec   :  { %4153 = vpow2.f32 %v3309_v52 }
 0xbf4   :  { %v4152_v48 = vpop.eup %4151 }
 0xbf5   :  { %1394 = vrot.lane.b32.xlu0 %v4152_v48, %s4290_s20 }
 0xbf6   :  { %v4154_v60 = vpop.eup %4153 }
 0xbf7   :  { %v1388_v53 = vadd.f32 1.0, %v4154_v60 }
 0xbf9   :  { %4155 = vrcp.f32 %v1388_v53 }
 0xc03   :  { %v4156_v54 = vpop.eup %4155 }
 0xc04   :  { %v1392_v58 = vmul.f32 %v4156_v54, %v4622_v16 }
 0xc0c   :  { %v1091_v50 = vpop.permute.xlu1 %1090 }
 0xc0d   :  { %v1093_v51 = vmul.f32 %v4148_v59, %v1091_v50 }
 0xc0f   :  { %1095 = vrot.lane.b32.xlu1 %v1093_v51, %s4291_s2 }
 0xc67   :  { %v1395_v55 = vpop.permute.xlu0 %1394 }
 0xc68   :  { %v1397_v56 = vmul.f32 %v4156_v54, %v1395_v55 }
 0xc6a   :  { %1399 = vrot.lane.b32.xlu0 %v1397_v56, %s4291_s2 }
 0xc81   :  { %v1096_v30 = vpop.permute.xlu1 %1095 }
 0xc82   :  { %1099 = vst.msk [vmem:[#allocation4 + $0x18] sm:$0xff] %vm368_vm2, %v1096_v30  ;;  %3654 = vmatmul.mubr.msk.f32.vlgmr.msra.gmra.mrb[14].mxu0 %vm368_vm2, %v1096_v30 }
 0xc83   :  { %3957 = vmatpush3.bf16.msra.mxu0 %v4488_v47  ;;  %3675 = vmatprep.mubr.msk.f32.mxu0 %vm4288_vm1, %v4289_v21 }
 0xc84   :  { %3958 = vmatprep.subr.bf16.mxu0 %v4287_v12 }
 0xc87   :  { %3960 = vmatpush3.bf16.msra.mxu0 %v4494_v49 }
 0xc88   :  { %3967 = vmatprep.subr.bf16.mxu0 %v4287_v12 }
 0xcdc   :  { %v1400_v0 = vpop.permute.xlu0 %1399 }
 0xcdd   :  { %v4657_v1 = vadd.f32 %v1400_v0, %v1392_v58 }
 0xcdf   :  { %4157 = vtanh.f32 %v4657_v1 }
 0xce9   :  { %v4158_v2 = vpop.eup %4157 }
 0xcea   :  { %1405 = vrot.lane.b32.xlu0 %v4158_v2, %s4290_s20 }
 0xd55   :  { %v1275_v4 = vpop.f32.mrb[14].mxu0 }
 0xd56   :  { %v1279_v5 = vadd.f32 %v1275_v4, %v183_v3  ;;  %v3655_v57 = vpop.f32.mrb[15].mxu0 }
 0xd58   :  { %4159 = vtanh.f32 %v1279_v5  ;;  %v3307_v9 = vmul.f32 -1.442695, %v1279_v5 }
 0xd5a   :  { %4161 = vpow2.f32 %v3307_v9 }
 0xd5c   :  { %v1406_v6 = vpop.permute.xlu0 %1405 }
 0xd5d   :  { %v1408_v7 = vmul.f32 %v4156_v54, %v1406_v6 }
 0xd5f   :  { %1410 = vrot.lane.b32.xlu0 %v1408_v7, %s4291_s2 }
 0xd62   :  { %v4160_v8 = vpop.eup %4159 }
 0xd63   :  { %1289 = vrot.lane.b32.xlu1 %v4160_v8, %s4290_s20 }
 0xd64   :  { %v4162_v10 = vpop.eup %4161 }
 0xd65   :  { %v1283_v11 = vadd.f32 1.0, %v4162_v10 }
 0xd67   :  { %4163 = vrcp.f32 %v1283_v11 }
 0xd71   :  { %v4164_v62 = vpop.eup %4163 }
 0xd72   :  { %v1287_v16 = vmul.f32 %v4164_v62, %v4640_v43 }
 0xdd1   :  { %v1411_v36 = vpop.permute.xlu0 %1410 }
 0xdd2   :  { %1414 = vst.msk [vmem:[#allocation5 + $0x18] sm:$0xff] %vm368_vm2, %v1411_v36  ;;  %3687 = vmatmul.mubr.msk.f32.vlgmr.msra.gmra.mrb[20].mxu1 %vm368_vm2, %v1411_v36 }
 0xdd3   :  { %3975 = vmatpush3.bf16.msra.mxu1 %v4409_v13  ;;  %3708 = vmatprep.mubr.msk.f32.mxu1 %vm4288_vm1, %v4289_v21 }
 0xdd4   :  { %3976 = vmatprep.subr.bf16.mxu1 %v4287_v12 }
 0xdd5   :  { %v1290_v14 = vpop.permute.xlu1 %1289 }
 0xdd6   :  { %v1292_v15 = vmul.f32 %v4164_v62, %v1290_v14 }
 0xdd7   :  { %3978 = vmatpush3.bf16.msra.mxu1 %v4432_v19 }
 0xdd8   :  { %1294 = vrot.lane.b32.xlu1 %v1292_v15, %s4291_s2  ;;  %3985 = vmatprep.subr.bf16.mxu1 %v4287_v12 }
 0xe4a   :  { %v1295_v17 = vpop.permute.xlu1 %1294 }
 0xe4b   :  { %v4675_v18 = vadd.f32 %v1295_v17, %v1287_v16  ;;  %v193_v16 = vadd.f32 %v4521_v63, %v4460_v23 }
 0xe4d   :  { %4165 = vtanh.f32 %v4675_v18 }
 0xe57   :  { %v4166_v20 = vpop.eup %4165 }
 0xe58   :  { %1300 = vrot.lane.b32.xlu1 %v4166_v20, %s4290_s20 }
 0xea5   :  { %v1590_v24 = vpop.f32.mrb[20].mxu1 }
 0xea6   :  { %v1594_v25 = vadd.f32 %v1590_v24, %v4471_v32  ;;  %v3688_v27 = vpop.f32.mrb[21].mxu1 }
 0xea8   :  { %4167 = vtanh.f32 %v1594_v25  ;;  %v3313_v34 = vmul.f32 -1.442695, %v1594_v25 }
 0xeaa   :  { %4169 = vpow2.f32 %v3313_v34 }
 0xeb2   :  { %v4168_v29 = vpop.eup %4167 }
 0xeb3   :  { %1604 = vrot.lane.b32.xlu0 %v4168_v29, %s4290_s20 }
 0xeb4   :  { %v4170_v35 = vpop.eup %4169 }
 0xeb5   :  { %v1598_v37 = vadd.f32 1.0, %v4170_v35 }
 0xeb7   :  { %4171 = vrcp.f32 %v1598_v37 }
 0xec1   :  { %v4172_v59 = vpop.eup %4171 }
 0xec2   :  { %v1602_v41 = vmul.f32 %v4172_v59, %v4657_v1 }
 0xeca   :  { %v1301_v31 = vpop.permute.xlu1 %1300 }
 0xecb   :  { %v1303_v33 = vmul.f32 %v4164_v62, %v1301_v31 }
 0xecd   :  { %1305 = vrot.lane.b32.xlu1 %v1303_v33, %s4291_s2 }
 0xf25   :  { %v1605_v38 = vpop.permute.xlu0 %1604 }
 0xf26   :  { %v1607_v40 = vmul.f32 %v4172_v59, %v1605_v38 }
 0xf28   :  { %1609 = vrot.lane.b32.xlu0 %v1607_v40, %s4291_s2 }
 0xf3f   :  { %v1306_v32 = vpop.permute.xlu1 %1305 }
 0xf40   :  { %1309 = vst.msk [vmem:[#allocation4 + $0x20] sm:$0xff] %vm368_vm2, %v1306_v32  ;;  %3676 = vmatmul.mubr.msk.f32.vlgmr.msra.gmra.mrb[16].mxu0 %vm368_vm2, %v1306_v32 }
 0xf41   :  { %3969 = vmatpush3.bf16.msra.mxu0 %v4488_v47  ;;  %3697 = vmatprep.mubr.msk.f32.mxu0 %vm4288_vm1, %v4289_v21 }
 0xf42   :  { %3970 = vmatprep.subr.bf16.mxu0 %v4287_v12 }
 0xf45   :  { %3972 = vmatpush3.bf16.msra.mxu0 %v4494_v49 }
 0xf46   :  { %3979 = vmatprep.subr.bf16.mxu0 %v4287_v12 }
 0xf9a   :  { %v1610_v42 = vpop.permute.xlu0 %1609 }
 0xf9b   :  { %v1612_v43 = vadd.f32 %v1610_v42, %v1602_v41 }
 0xf9d   :  { %4173 = vtanh.f32 %v1612_v43 }
 0xfa7   :  { %v4174_v44 = vpop.eup %4173 }
 0xfa8   :  { %1615 = vrot.lane.b32.xlu0 %v4174_v44, %s4290_s20 }
0x1013   :  { %v1485_v46 = vpop.f32.mrb[16].mxu0 }
0x1014   :  { %v1489_v39 = vadd.f32 %v1485_v46, %v188_v45  ;;  %v3677_v48 = vpop.f32.mrb[17].mxu0 }
0x1016   :  { %4175 = vtanh.f32 %v1489_v39  ;;  %v3311_v60 = vmul.f32 -1.442695, %v1489_v39 }
0x1018   :  { %4177 = vpow2.f32 %v3311_v60 }
0x101a   :  { %v1616_v50 = vpop.permute.xlu0 %1615 }
0x101b   :  { %v1618_v51 = vmul.f32 %v4172_v59, %v1616_v50 }
0x101d   :  { %1620 = vrot.lane.b32.xlu0 %v1618_v51, %s4291_s2 }
0x1020   :  { %v4176_v52 = vpop.eup %4175 }
0x1021   :  { %1499 = vrot.lane.b32.xlu1 %v4176_v52, %s4290_s20 }
0x1022   :  { %v4178_v53 = vpop.eup %4177 }
0x1023   :  { %v1493_v54 = vadd.f32 1.0, %v4178_v53 }
0x1025   :  { %4179 = vrcp.f32 %v1493_v54 }
0x102f   :  { %v4180_v61 = vpop.eup %4179 }
0x1030   :  { %v1497_v58 = vmul.f32 %v4180_v61, %v4675_v18 }
0x108f   :  { %v1621_v55 = vpop.permute.xlu0 %1620 }
0x1090   :  { %1624 = vst.msk [vmem:[#allocation5 + $0x10] sm:$0xff] %vm368_vm2, %v1621_v55  ;;  %3709 = vmatmul.mubr.msk.f32.vlgmr.msra.gmra.mrb[22].mxu1 %vm368_vm2, %v1621_v55 }
0x1091   :  { %3987 = vmatpush3.bf16.msra.mxu1 %v4409_v13  ;;  %3730 = vmatprep.mubr.msk.f32.mxu1 %vm4288_vm1, %v4289_v21 }
0x1092   :  { %3988 = vmatprep.subr.bf16.mxu1 %v4287_v12 }
0x1093   :  { %v1500_v56 = vpop.permute.xlu1 %1499 }
0x1094   :  { %v1502_v30 = vmul.f32 %v4180_v61, %v1500_v56 }
0x1095   :  { %3990 = vmatpush3.bf16.msra.mxu1 %v4432_v19 }
0x1096   :  { %1504 = vrot.lane.b32.xlu1 %v1502_v30, %s4291_s2  ;;  %4007 = vmatprep.subr.bf16.mxu1 %v4287_v12 }
0x1108   :  { %v1505_v0 = vpop.permute.xlu1 %1504 }
0x1109   :  { %v1507_v1 = vadd.f32 %v1505_v0, %v1497_v58  ;;  %v2047_v0 = vld [vmem:[%s5024_s7] sm:$0xff] }
0x110b   :  { %4181 = vtanh.f32 %v1507_v1 }
0x1115   :  { %v4182_v13 = vpop.eup %4181 }
0x1116   :  { %1510 = vrot.lane.b32.xlu1 %v4182_v13, %s4290_s20  ;;  %v2049_v13 = vld [vmem:[%s5024_s7 + $0x10] sm:$0xff] }
0x1163   :  { %v1800_v2 = vpop.f32.mrb[22].mxu1 }
0x1164   :  { %v1804_v3 = vadd.f32 %v1800_v2, %v4465_v26  ;;  %v3710_v4 = vpop.f32.mrb[23].mxu1 }
0x1166   :  { %4183 = vtanh.f32 %v1804_v3  ;;  %v3317_v6 = vmul.f32 -1.442695, %v1804_v3 }
0x1168   :  { %4185 = vpow2.f32 %v3317_v6  ;;  %v2044_v6 = vld [vmem:[%s5025_s8 + $0x8] sm:$0xff] }
0x1170   :  { %v4184_v5 = vpop.eup %4183 }
0x1171   :  { %1814 = vrot.lane.b32.xlu0 %v4184_v5, %s4290_s20  ;;  %v2051_v5 = vld [vmem:[%s5024_s7 + $0x20] sm:$0xff] }
0x1172   :  { %v4186_v7 = vpop.eup %4185 }
0x1173   :  { %v1808_v8 = vadd.f32 1.0, %v4186_v7 }
0x1175   :  { %4187 = vrcp.f32 %v1808_v8 }
0x117f   :  { %v4188_v9 = vpop.eup %4187 }
0x1180   :  { %v1812_v36 = vmul.f32 %v4188_v9, %v1612_v43 }
0x1188   :  { %v1511_v19 = vpop.permute.xlu1 %1510 }
0x1189   :  { %v1513_v57 = vmul.f32 %v4180_v61, %v1511_v19  ;;  %v198_v61 = vadd.f32 %v4458_v22, %v4521_v63  ;;  %v2050_v22 = vld [vmem:[%s5024_s7 + $0x18] sm:$0xff]  ;;  %v2052_v19 = vld [vmem:[%s5024_s7 + $0x28] sm:$0xff] }
0x118a   :  { %v3995_v4 = vpack.c.bf16 %v2050_v22, %v2049_v13  ;;  %v3999_v8 = vpack.c.bf16 %v2052_v19, %v2051_v5  ;;  %v2067_v5 = vld [vmem:[#allocation5 + $0x18] sm:$0xff] }
0x118b   :  { %1515 = vrot.lane.b32.xlu1 %v1513_v57, %s4291_s2  ;;  %v2043_v57 = vld [vmem:[%s5025_s8] sm:$0xff] }
0x118c   :  { %v4770_v7 = vpack.c.bf16 %v2044_v6, %v2043_v57 }
0x11e3   :  { %v1815_v10 = vpop.permute.xlu0 %1814 }
0x11e4   :  { %v1817_v11 = vmul.f32 %v4188_v9, %v1815_v10  ;;  %v2054_v10 = vld [vmem:[%s5024_s7 + $0x38] sm:$0xff] }
0x11e6   :  { %1819 = vrot.lane.b32.xlu0 %v1817_v11, %s4291_s2 }
0x11fd   :  { %v1516_v26 = vpop.permute.xlu1 %1515 }
0x11fe   :  { %1519 = vst.msk [vmem:[#allocation4 + $0x28] sm:$0xff] %vm368_vm2, %v1516_v26  ;;  %3698 = vmatmul.mubr.msk.f32.vlgmr.msra.gmra.mrb[18].mxu0 %vm368_vm2, %v1516_v26  ;;  %v2045_v26 = vld [vmem:[%s5025_s8 + $0x10] sm:$0xff] }
0x11ff   :  { %3981 = vmatpush3.bf16.msra.mxu0 %v4488_v47  ;;  %3719 = vmatprep.mubr.msk.f32.mxu0 %vm4288_vm1, %v4289_v21 }
0x1200   :  { %3982 = vmatprep.subr.bf16.mxu0 %v4287_v12 }
0x1203   :  { %3984 = vmatpush3.bf16.msra.mxu0 %v4494_v49 }
0x1258   :  { %v1820_v62 = vpop.permute.xlu0 %1819 }
0x1259   :  { %v1822_v14 = vadd.f32 %v1820_v62, %v1812_v36  ;;  %v2046_v36 = vld [vmem:[%s5025_s8 + $0x18] sm:$0xff] }
0x125a   :  { %v4787_v62 = vpack.c.bf16 %v2046_v36, %v2045_v26 }
0x125b   :  { %4189 = vtanh.f32 %v1822_v14 }
0x1265   :  { %v4190_v15 = vpop.eup %4189 }
0x1266   :  { %1825 = vrot.lane.b32.xlu0 %v4190_v15, %s4290_s20 }
0x12d1   :  { %v1695_v17 = vpop.f32.mrb[18].mxu0 }
0x12d2   :  { %v1699_v18 = vadd.f32 %v1695_v17, %v193_v16  ;;  %v3699_v47 = vpop.f32.mrb[19].mxu0 }
0x12d3   :  { %v2057_v47 = vld [vmem:[#allocation4 + $0x8] sm:$0xff] }
0x12d4   :  { %4191 = vtanh.f32 %v1699_v18  ;;  %v3315_v49 = vmul.f32 -1.442695, %v1699_v18  ;;  %v2056_v18 = vld [vmem:[#allocation4] sm:$0xff] }
0x12d6   :  { %4193 = vpow2.f32 %v3315_v49 }
0x12d8   :  { %v1826_v20 = vpop.permute.xlu0 %1825 }
0x12d9   :  { %v1828_v24 = vmul.f32 %v4188_v9, %v1826_v20  ;;  %v2053_v9 = vld [vmem:[%s5024_s7 + $0x30] sm:$0xff] }
0x12da   :  { %v4003_v11 = vpack.c.bf16 %v2054_v10, %v2053_v9 }
0x12db   :  { %1830 = vrot.lane.b32.xlu0 %v1828_v24, %s4291_s2 }
0x12de   :  { %v4192_v25 = vpop.eup %4191 }
0x12df   :  { %1709 = vrot.lane.b32.xlu1 %v4192_v25, %s4290_s20 }
0x12e0   :  { %v4194_v27 = vpop.eup %4193 }
0x12e1   :  { %v1703_v29 = vadd.f32 1.0, %v4194_v27  ;;  %v4811_v27 = vld [vmem:[%s5026_s9] ss:$0 sm:$0xff] }
0x12e3   :  { %4195 = vrcp.f32 %v1703_v29 }
0x12ed   :  { %v4196_v23 = vpop.eup %4195 }
0x12ee   :  { %v1707_v35 = vmul.f32 %v4196_v23, %v1507_v1  ;;  %v2048_v1 = vld [vmem:[%s5024_s7 + $0x8] sm:$0xff] }
0x12ef   :  { %v3991_v3 = vpack.c.bf16 %v2048_v1, %v2047_v0  ;;  %v2066_v0 = vld [vmem:[#allocation5 + $0x10] sm:$0xff] }
0x12f1   :  { %3992 = vmatprep.subr.bf16.mxu0 %v3991_v3 }
0x134d   :  { %v1831_v31 = vpop.permute.xlu0 %1830 }
0x134e   :  { %1834 = vst.msk [vmem:[#allocation5 + $0x8] sm:$0xff] %vm368_vm2, %v1831_v31  ;;  %3731 = vmatmul.mubr.msk.f32.vlgmr.msra.gmra.mrb[24].mxu1 %vm368_vm2, %v1831_v31 }
0x134f   :  { %3769 = vmatprep.mubr.msk.f32.mxu1 %vm4288_vm1, %v4289_v21  ;;  %4009 = vmatpush3.bf16.msra.mxu1 %v4770_v7 }
0x1350   :  { %4010 = vmatprep.subr.bf16.mxu1 %v4287_v12 }
0x1351   :  { %v1710_v33 = vpop.permute.xlu1 %1709 }
0x1352   :  { %v1712_v34 = vmul.f32 %v4196_v23, %v1710_v33 }
0x1353   :  { %4012 = vmatpush3.bf16.msra.mxu1 %v4787_v62 }
0x1354   :  { %1714 = vrot.lane.b32.xlu1 %v1712_v34, %s4291_s2  ;;  %4013 = vmatprep.subr.bf16.mxu1 %v4287_v12 }
0x1355   :  { %v2065_v45 = vld [vmem:[#allocation5 + $0x8] sm:$0xff] }
0x1356   :  { %3770 = vmatmul.mubr.f32.vlgmr.msra.gmra.mrb[26].mxu1 %v4289_v21 }
0x1357   :  { %4015 = vmatpush3.bf16.msra.mxu1 %v4770_v7  ;;  %3780 = vmatprep.mubr.msk.f32.mxu1 %vm4288_vm1, %v4289_v21 }
0x1358   :  { %4016 = vmatprep.subr.bf16.mxu1 %v4287_v12 }
0x135b   :  { %4018 = vmatpush3.bf16.msra.mxu1 %v4787_v62 }
0x135c   :  { %4019 = vmatprep.subr.bf16.mxu1 %v4287_v12 }
0x13c6   :  { %v1715_v37 = vpop.permute.xlu1 %1714 }
0x13c7   :  { %v4729_v59 = vadd.f32 %v1715_v37, %v1707_v35 }
0x13c9   :  { %4197 = vtanh.f32 %v4729_v59 }
0x13d3   :  { %v4198_v38 = vpop.eup %4197 }
0x13d4   :  { %1720 = vrot.lane.b32.xlu1 %v4198_v38, %s4290_s20 }
0x1421   :  { %v2009_v40 = vpop.f32.mrb[24].mxu1 }
0x1422   :  { %v2013_v32 = vadd.f32 %v2009_v40, %v4467_v28  ;;  %v3732_v41 = vpop.f32.mrb[25].mxu1 }
0x1424   :  { %4199 = vtanh.f32 %v2013_v32  ;;  %v3321_v46 = vmul.f32 -1.442695, %v2013_v32 }
0x1426   :  { %4201 = vpow2.f32 %v3321_v46 }
0x1429   :  { %v2323_v25 = vpop.f32.mrb[26].mxu1 }
0x142a   :  { %v3771_v49 = vpop.f32.mrb[27].mxu1 }
0x142e   :  { %v4200_v42 = vpop.eup %4199 }
0x142f   :  { %2023 = vrot.lane.b32.xlu0 %v4200_v42, %s4290_s20 }
0x1430   :  { %v4202_v39 = vpop.eup %4201 }
0x1431   :  { %v2017_v48 = vadd.f32 1.0, %v4202_v39 }
0x1433   :  { %4203 = vrcp.f32 %v2017_v48 }
0x143d   :  { %v4204_v50 = vpop.eup %4203 }
0x143e   :  { %v2021_v60 = vmul.f32 %v4204_v50, %v1822_v14 }
0x1446   :  { %v1721_v43 = vpop.permute.xlu1 %1720 }
0x1447   :  { %v1723_v44 = vmul.f32 %v4196_v23, %v1721_v43 }
0x1449   :  { %1725 = vrot.lane.b32.xlu1 %v1723_v44, %s4291_s2 }
0x144d   :  { %2082 = vrot.lane.b32.xlu1 %v2065_v45, %s4291_s2 }
0x14a1   :  { %v2024_v51 = vpop.permute.xlu0 %2023 }
0x14a2   :  { %v2026_v28 = vmul.f32 %v4204_v50, %v2024_v51 }
0x14a4   :  { %2028 = vrot.lane.b32.xlu0 %v2026_v28, %s4291_s2 }
0x14bb   :  { %v1726_v52 = vpop.permute.xlu1 %1725 }
0x14bc   :  { %1729 = vst.msk [vmem:[#allocation4 + $0x30] sm:$0xff] %vm368_vm2, %v1726_v52  ;;  %3720 = vmatmul.mubr.msk.f32.vlgmr.msra.gmra.mrb[20].mxu0 %vm368_vm2, %v1726_v52 }
0x14bd   :  { %3994 = vmatpush3.bf16.msra.mxu0 %v3991_v3  ;;  %v2058_v3 = vld [vmem:[#allocation4 + $0x10] sm:$0xff] }
0x14be   :  { %3996 = vmatprep.subr.bf16.mxu0 %v3995_v4 }
0x14bf   :  { %v2083_v16 = vpop.permute.xlu1 %2082 }
0x14c0   :  { %v2105_v24 = vsel %vm368_vm2, %v2057_v47, %v2083_v16 }
0x14c1   :  { %3998 = vmatpush3.bf16.msra.mxu0 %v3995_v4 }
0x14c2   :  { %4000 = vmatprep.subr.bf16.mxu0 %v3999_v8 }
0x14c5   :  { %4002 = vmatpush3.bf16.msra.mxu0 %v3999_v8 }
0x14c6   :  { %4004 = vmatprep.subr.bf16.mxu0 %v4003_v11 }
0x14c9   :  { %4006 = vmatpush3.bf16.msra.mxu0 %v4003_v11  ;;  %v2059_v11 = vld [vmem:[#allocation4 + $0x18] sm:$0xff] }
0x14ca   :  { %4025 = vmatprep.subr.bf16.mxu0 %v4287_v12 }
0x1516   :  { %v2029_v53 = vpop.permute.xlu0 %2028 }
0x1517   :  { %v2031_v54 = vadd.f32 %v2029_v53, %v2021_v60 }
0x1519   :  { %4205 = vtanh.f32 %v2031_v54 }
0x1523   :  { %v4206_v55 = vpop.eup %4205 }
0x1524   :  { %2034 = vrot.lane.b32.xlu0 %v4206_v55, %s4290_s20 }
0x158f   :  { %v1905_v56 = vpop.f32.mrb[20].mxu0 }
0x1590   :  { %v4743_v30 = vadd.f32 %v1905_v56, %v198_v61  ;;  %v3721_v58 = vpop.f32.mrb[21].mxu0 }
0x1592   :  { %v3319_v57 = vmul.f32 -1.442695, %v4743_v30 }
0x1596   :  { %v2035_v2 = vpop.permute.xlu0 %2034 }
0x1597   :  { %v2037_v63 = vmul.f32 %v4204_v50, %v2035_v2 }
0x1599   :  { %2039 = vrot.lane.b32.xlu0 %v2037_v63, %s4291_s2 }
0x160b   :  { %v2040_v14 = vpop.permute.xlu0 %2039 }
0x160c   :  { %2042 = vst.msk [vmem:[#allocation5] sm:$0xff] %vm368_vm2, %v2040_v14 }
0x1613   :  { %v2064_v15 = vld [vmem:[#allocation5] sm:$0xff] }
0x1614   :  { %2080 = vrot.lane.b32.xlu0 %v2064_v15, %s4291_s2 }
0x1686   :  { %v2081_v17 = vpop.permute.xlu0 %2080 }
0x1687   :  { %v2104_v20 = vsel %vm368_vm2, %v2056_v18, %v2081_v17 }
0x1688   :  { %3749 = vmatprep.mubr.msk.f32.mxu0 %vm2118_vm3, %v2104_v20 }
0x1689   :  { %3750 = vmatmul.mubr.msk.f32.vlgmr.msra.gmra.mrb[22].mxu0 %vm2118_vm3, %v2105_v24 }
0x168a   :  { %4027 = vmatpush3.bf16.msra.mxu0 %v4770_v7 }
0x168b   :  { %4028 = vmatprep.subr.bf16.mxu0 %v4287_v12 }
0x168e   :  { %4030 = vmatpush3.bf16.msra.mxu0 %v4787_v62 }
0x168f   :  { %4037 = vmatprep.subr.bf16.mxu0 %v4287_v12 }
0x175c   :  { %v3751_v29 = vpop.f32.mrb[22].mxu0 }
0x175d   :  { %v2209_v31 = vpop.f32.mrb[23].mxu0  ;;  %v2215_v50 = vadd.f32 %v3751_v29, %v4811_v27 }
0x175e   :  { %v2210_v23 = vadd.f32 %v4811_v27, %v2209_v31  ;;  %v2069_v31 = vld [vmem:[#allocation5 + $0x28] sm:$0xff] }
0x1760   :  { %v2327_v33 = vadd.f32 %v2323_v25, %v2210_v23  ;;  %v4856_v23 = vld [vmem:[#allocation5 + $0x38] sm:$0xff] }
0x1762   :  { %4207 = vtanh.f32 %v2327_v33  ;;  %v3331_v35 = vmul.f32 -1.442695, %v2327_v33 }
0x1764   :  { %4209 = vpow2.f32 %v3331_v35 }
0x176c   :  { %v4208_v34 = vpop.eup %4207 }
0x176d   :  { %2337 = vrot.lane.b32.xlu0 %v4208_v34, %s4290_s20 }
0x176e   :  { %v4210_v37 = vpop.eup %4209 }
0x176f   :  { %v2331_v38 = vadd.f32 1.0, %v4210_v37 }
0x1771   :  { %4211 = vrcp.f32 %v2331_v38 }
0x177b   :  { %v4212_v40 = vpop.eup %4211 }
0x177c   :  { %v2335_v42 = vmul.f32 0.0, %v4212_v40 }
0x17df   :  { %v2338_v32 = vpop.permute.xlu0 %2337 }
0x17e0   :  { %v2340_v41 = vmul.f32 %v4212_v40, %v2338_v32 }
0x17e2   :  { %2342 = vrot.lane.b32.xlu1 %v2340_v41, %s4291_s2 }
0x1854   :  { %v2343_v43 = vpop.permute.xlu1 %2342 }
0x1855   :  { %v2345_v44 = vadd.f32 %v2343_v43, %v2335_v42 }
0x1857   :  { %4213 = vtanh.f32 %v2345_v44 }
0x1861   :  { %v4214_v45 = vpop.eup %4213 }
0x1862   :  { %2348 = vrot.lane.b32.xlu0 %v4214_v45, %s4290_s20 }
0x18d4   :  { %v2349_v46 = vpop.permute.xlu0 %2348 }
0x18d5   :  { %v2351_v39 = vmul.f32 %v4212_v40, %v2349_v46 }
0x18d7   :  { %2354 = vrot.lane.b32.xlu1 %v2351_v39, %s4291_s2 }
0x1949   :  { %v2355_v48 = vpop.permute.xlu1 %2354 }
0x194a   :  { %3781 = vmatmul.mubr.msk.f32.vlgmr.msra.gmra.mrb[28].mxu1 %vm368_vm2, %v2355_v48 }
0x194b   :  { %4021 = vmatpush3.bf16.msra.mxu1 %v4770_v7  ;;  %3791 = vmatprep.mubr.msk.f32.mxu1 %vm4288_vm1, %v4289_v21 }
0x194c   :  { %4022 = vmatprep.subr.bf16.mxu1 %v4287_v12 }
0x194f   :  { %4024 = vmatpush3.bf16.msra.mxu1 %v4787_v62 }
0x1950   :  { %4031 = vmatprep.subr.bf16.mxu1 %v4287_v12 }
0x1a1d   :  { %v2424_v51 = vpop.f32.mrb[28].mxu1 }
0x1a1e   :  { %v2428_v28 = vadd.f32 %v2424_v51, %v2215_v50  ;;  %v3782_v52 = vpop.f32.mrb[29].mxu1  ;;  %v2068_v50 = vld [vmem:[#allocation5 + $0x20] sm:$0xff]  ;;  %v2070_v51 = vld [vmem:[#allocation5 + $0x30] sm:$0xff] }
0x1a20   :  { %4215 = vtanh.f32 %v2428_v28  ;;  %v3333_v53 = vmul.f32 -1.442695, %v2428_v28 }
0x1a22   :  { %4217 = vpow2.f32 %v3333_v53  ;;  %v2060_v53 = vld [vmem:[#allocation4 + $0x20] sm:$0xff] }
0x1a2a   :  { %v4216_v60 = vpop.eup %4215 }
0x1a2b   :  { %2438 = vrot.lane.b32.xlu0 %v4216_v60, %s4290_s20 }
0x1a2c   :  { %v4218_v54 = vpop.eup %4217 }
0x1a2d   :  { %v2432_v55 = vadd.f32 1.0, %v4218_v54 }
0x1a2f   :  { %4219 = vrcp.f32 %v2432_v55  ;;  %v2061_v55 = vld [vmem:[#allocation4 + $0x28] sm:$0xff] }
0x1a39   :  { %v4220_v61 = vpop.eup %4219 }
0x1a3a   :  { %v2436_v1 = vmul.f32 %v4220_v61, %v2345_v44 }
0x1a9d   :  { %v2439_v56 = vpop.permute.xlu0 %2438 }
0x1a9e   :  { %v2441_v58 = vmul.f32 %v4220_v61, %v2439_v56 }
0x1aa0   :  { %2443 = vrot.lane.b32.xlu1 %v2441_v58, %s4291_s2 }
0x1aa4   :  { %2084 = vrot.lane.b32.xlu1 %v2066_v0, %s4291_s2 }
0x1b12   :  { %v2444_v13 = vpop.permute.xlu1 %2443 }
0x1b13   :  { %v4829_v2 = vadd.f32 %v2444_v13, %v2436_v1  ;;  %v2062_v1 = vld [vmem:[#allocation4 + $0x30] sm:$0xff] }
0x1b15   :  { %4221 = vtanh.f32 %v4829_v2 }
0x1b16   :  { %v2085_v22 = vpop.permute.xlu1 %2084  ;;  %4223 = vtanh.f32 %v4743_v30 }
0x1b17   :  { %v2106_v63 = vsel %vm368_vm2, %v2058_v3, %v2085_v22  ;;  %4225 = vpow2.f32 %v3319_v57 }
0x1b18   :  { %3752 = vmatprep.mubr.msk.f32.mxu0 %vm2118_vm3, %v2106_v63 }
0x1b1f   :  { %v4222_v4 = vpop.eup %4221 }
0x1b20   :  { %2449 = vrot.lane.b32.xlu0 %v4222_v4, %s4290_s20  ;;  %v4224_v19 = vpop.eup %4223 }
0x1b21   :  { %v4226_v6 = vpop.eup %4225 }
0x1b22   :  { %v1913_v8 = vadd.f32 1.0, %v4226_v6 }
0x1b24   :  { %2086 = vrot.lane.b32.xlu0 %v2067_v5, %s4291_s2  ;;  %4227 = vrcp.f32 %v1913_v8 }
0x1b28   :  { %1919 = vrot.lane.b32.xlu0 %v4224_v19, %s4290_s20 }
0x1b2e   :  { %v4228_v14 = vpop.eup %4227 }
0x1b2f   :  { %v1917_v17 = vmul.f32 %v4228_v14, %v4729_v59 }
0x1b92   :  { %v2450_v9 = vpop.permute.xlu0 %2449 }
0x1b93   :  { %v2452_v10 = vmul.f32 %v4220_v61, %v2450_v9 }
0x1b95   :  { %2455 = vrot.lane.b32.xlu1 %v2452_v10, %s4291_s2 }
0x1b96   :  { %v2087_v26 = vpop.permute.xlu0 %2086 }
0x1b97   :  { %v2107_v36 = vsel %vm368_vm2, %v2059_v11, %v2087_v26 }
0x1b98   :  { %3753 = vmatmul.mubr.msk.f32.gmra.mrb[24].mxu0 %vm2118_vm3, %v2107_v36 }
0x1b9a   :  { %v1920_v15 = vpop.permute.xlu0 %1919 }
0x1b9b   :  { %v1922_v16 = vmul.f32 %v4228_v14, %v1920_v15 }
0x1b9d   :  { %1924 = vrot.lane.b32.xlu0 %v1922_v16, %s4291_s2 }
0x1c07   :  { %v2456_v30 = vpop.permute.xlu1 %2455 }
0x1c08   :  { %3792 = vmatmul.mubr.msk.f32.vlgmr.msra.gmra.mrb[30].mxu1 %vm368_vm2, %v2456_v30 }
0x1c09   :  { %4033 = vmatpush3.bf16.msra.mxu1 %v4770_v7  ;;  %3813 = vmatprep.mubr.msk.f32.mxu1 %vm4288_vm1, %v4289_v21 }
0x1c0a   :  { %4034 = vmatprep.subr.bf16.mxu1 %v4287_v12 }
0x1c0d   :  { %4036 = vmatpush3.bf16.msra.mxu1 %v4787_v62 }
0x1c0e   :  { %4043 = vmatprep.subr.bf16.mxu1 %v4287_v12 }
0x1c0f   :  { %v1925_v18 = vpop.permute.xlu0 %1924 }
0x1c10   :  { %v1927_v47 = vadd.f32 %v1925_v18, %v1917_v17 }
0x1c12   :  { %4229 = vtanh.f32 %v1927_v47 }
0x1c1c   :  { %v4230_v20 = vpop.eup %4229 }
0x1c1d   :  { %1930 = vrot.lane.b32.xlu0 %v4230_v20, %s4290_s20 }
0x1c6b   :  { %v4852_v24 = vpop.f32.mrb[24].mxu0 }
0x1c6c   :  { %v2219_v25 = vpop.f32.mrb[25].mxu0  ;;  %v2225_v57 = vadd.f32 %v4852_v24, %v4811_v27 }
0x1c6d   :  { %v2220_v59 = vadd.f32 %v4811_v27, %v2219_v25 }
0x1c8f   :  { %v1931_v49 = vpop.permute.xlu0 %1930 }
0x1c90   :  { %v1933_v29 = vmul.f32 %v4228_v14, %v1931_v49 }
0x1c92   :  { %1935 = vrot.lane.b32.xlu0 %v1933_v29, %s4291_s2 }
0x1c96   :  { %2090 = vrot.lane.b32.xlu0 %v2069_v31, %s4291_s2 }
0x1c9a   :  { %2094 = vrot.lane.b32.xlu0 %v4856_v23, %s4291_s2 }
0x1cdb   :  { %v2525_v33 = vpop.f32.mrb[30].mxu1 }
0x1cdc   :  { %v2529_v34 = vadd.f32 %v2525_v33, %v2220_v59  ;;  %v3793_v35 = vpop.f32.mrb[31].mxu1 }
0x1cde   :  { %4231 = vtanh.f32 %v2529_v34  ;;  %v3335_v40 = vmul.f32 -1.442695, %v2529_v34 }
0x1ce0   :  { %4233 = vpow2.f32 %v3335_v40 }
0x1ce8   :  { %v4232_v37 = vpop.eup %4231 }
0x1ce9   :  { %2539 = vrot.lane.b32.xlu1 %v4232_v37, %s4290_s20 }
0x1cea   :  { %v4234_v32 = vpop.eup %4233 }
0x1ceb   :  { %v2533_v41 = vadd.f32 1.0, %v4234_v32 }
0x1ced   :  { %4235 = vrcp.f32 %v2533_v41 }
0x1cf7   :  { %v4236_v42 = vpop.eup %4235 }
0x1cf8   :  { %v2537_v45 = vmul.f32 %v4236_v42, %v4829_v2 }
0x1d04   :  { %v1936_v38 = vpop.permute.xlu0 %1935 }
0x1d05   :  { %1939 = vst.msk [vmem:[#allocation4 + $0x38] sm:$0xff] %vm368_vm2, %v1936_v38 }
0x1d08   :  { %v2091_v52 = vpop.permute.xlu0 %2090 }
0x1d09   :  { %v2109_v56 = vsel %vm368_vm2, %v2061_v55, %v2091_v52 }
0x1d0c   :  { %v4872_v58 = vld [vmem:[#allocation4 + $0x38] sm:$0xff]  ;;  %v2095_v0 = vpop.permute.xlu0 %2094 }
0x1d0d   :  { %v2111_v3 = vsel %vm368_vm2, %v4872_v58, %v2095_v0 }
0x1d5b   :  { %v2540_v43 = vpop.permute.xlu1 %2539 }
0x1d5c   :  { %v2542_v44 = vmul.f32 %v4236_v42, %v2540_v43 }
0x1d5e   :  { %2544 = vrot.lane.b32.xlu1 %v2542_v44, %s4291_s2 }
0x1dd0   :  { %v2545_v46 = vpop.permute.xlu1 %2544 }
0x1dd1   :  { %v2547_v39 = vadd.f32 %v2545_v46, %v2537_v45 }
0x1dd3   :  { %4237 = vtanh.f32 %v2547_v39 }
0x1ddd   :  { %v4238_v48 = vpop.eup %4237 }
0x1dde   :  { %2550 = vrot.lane.b32.xlu1 %v4238_v48, %s4290_s20 }
0x1de2   :  { %2088 = vrot.lane.b32.xlu1 %v2068_v50, %s4291_s2 }
0x1de6   :  { %2092 = vrot.lane.b32.xlu1 %v2070_v51, %s4291_s2 }
0x1e50   :  { %v2551_v28 = vpop.permute.xlu1 %2550 }
0x1e51   :  { %v2553_v60 = vmul.f32 %v4236_v42, %v2551_v28 }
0x1e53   :  { %2556 = vrot.lane.b32.xlu1 %v2553_v60, %s4291_s2 }
0x1e54   :  { %v2089_v54 = vpop.permute.xlu1 %2088 }
0x1e55   :  { %v2108_v61 = vsel %vm368_vm2, %v2060_v53, %v2089_v54 }
0x1e56   :  { %3755 = vmatprep.mubr.msk.f32.mxu0 %vm2118_vm3, %v2108_v61 }
0x1e57   :  { %3756 = vmatmul.mubr.msk.f32.gmra.mrb[26].mxu0 %vm2118_vm3, %v2109_v56 }
0x1e58   :  { %v2093_v13 = vpop.permute.xlu1 %2092 }
0x1e59   :  { %v2110_v2 = vsel %vm368_vm2, %v2062_v1, %v2093_v13 }
0x1e5a   :  { %3758 = vmatprep.mubr.msk.f32.mxu0 %vm2118_vm3, %v2110_v2 }
0x1e5b   :  { %3759 = vmatmul.mubr.msk.f32.gmra.mrb[28].mxu0 %vm2118_vm3, %v2111_v3 }
0x1e5c   :  { %3802 = vmatprep.mubr.msk.f32.mxu0 %vm4288_vm1, %v4289_v21 }
0x1ec5   :  { %v2557_v22 = vpop.permute.xlu1 %2556 }
0x1ec6   :  { %3803 = vmatmul.mubr.msk.f32.vlgmr.msra.gmra.mrb[30].mxu0 %vm368_vm2, %v2557_v22 }
0x1ec7   :  { %4039 = vmatpush3.bf16.msra.mxu0 %v4770_v7  ;;  %3824 = vmatprep.mubr.msk.f32.mxu0 %vm4288_vm1, %v4289_v21 }
0x1ec8   :  { %4040 = vmatprep.subr.bf16.mxu0 %v4287_v12 }
0x1ecb   :  { %4042 = vmatpush3.bf16.msra.mxu0 %v4787_v62 }
0x1ecc   :  { %4049 = vmatprep.subr.bf16.mxu0 %v4287_v12 }
0x1f2a   :  { %v4889_v63 = vpop.f32.mrb[26].mxu0 }
0x1f2b   :  { %v2229_v4 = vpop.f32.mrb[27].mxu0  ;;  %v2235_v48 = vadd.f32 %v4889_v63, %v4811_v27 }
0x1f2c   :  { %v2230_v49 = vadd.f32 %v4811_v27, %v2229_v4 }
0x1f2e   :  { %v4891_v5 = vpop.f32.mrb[28].mxu0 }
0x1f2f   :  { %v4893_v19 = vpop.f32.mrb[29].mxu0 }
0x1f30   :  { %v2240_v22 = vadd.f32 %v4811_v27, %v4893_v19  ;;  %v3066_v19 = vld [vmem:[%s5027_s10] sm:$0xff] }
0x1f99   :  { %v2626_v6 = vpop.f32.mrb[30].mxu0 }
0x1f9a   :  { %v2630_v8 = vadd.f32 %v2626_v6, %v2225_v57  ;;  %v3804_v9 = vpop.f32.mrb[31].mxu0 }
0x1f9c   :  { %4239 = vtanh.f32 %v2630_v8  ;;  %v3337_v11 = vmul.f32 -1.442695, %v2630_v8 }
0x1f9e   :  { %4241 = vpow2.f32 %v3337_v11 }
0x1fa6   :  { %v4240_v10 = vpop.eup %4239 }
0x1fa7   :  { %2640 = vrot.lane.b32.xlu0 %v4240_v10, %s4290_s20 }
0x1fa8   :  { %v4242_v26 = vpop.eup %4241 }
0x1fa9   :  { %v2634_v36 = vadd.f32 1.0, %v4242_v26 }
0x1fab   :  { %4243 = vrcp.f32 %v2634_v36 }
0x1fb5   :  { %v4244_v14 = vpop.eup %4243 }
0x1fb6   :  { %v2638_v30 = vmul.f32 %v4244_v14, %v2547_v39 }
0x2019   :  { %v2641_v15 = vpop.permute.xlu0 %2640 }
0x201a   :  { %v2643_v16 = vmul.f32 %v4244_v14, %v2641_v15  ;;  %v3068_v15 = vld [vmem:[%s5027_s10 + $0x10] sm:$0xff] }
0x201c   :  { %2645 = vrot.lane.b32.xlu1 %v2643_v16, %s4291_s2 }
0x208e   :  { %v2646_v17 = vpop.permute.xlu1 %2645 }
0x208f   :  { %v2648_v18 = vadd.f32 %v2646_v17, %v2638_v30  ;;  %v3069_v30 = vld [vmem:[%s5027_s10 + $0x18] sm:$0xff] }
0x2090   :  { %v4059_v17 = vpack.c.bf16 %v3069_v30, %v3068_v15  ;;  %v3349_v30 = vld [vmem:[%s5030_s14] ss:$0 sm:$0xff] }
0x2091   :  { %4245 = vtanh.f32 %v2648_v18 }
0x209b   :  { %v4246_v47 = vpop.eup %4245 }
0x209c   :  { %2651 = vrot.lane.b32.xlu0 %v4246_v47, %s4290_s20  ;;  %v3071_v47 = vld [vmem:[%s5027_s10 + $0x28] sm:$0xff] }
0x210e   :  { %v2652_v20 = vpop.permute.xlu0 %2651 }
0x210f   :  { %v2654_v24 = vmul.f32 %v4244_v14, %v2652_v20  ;;  %v3067_v14 = vld [vmem:[%s5027_s10 + $0x8] sm:$0xff] }
0x2110   :  { %v4056_v16 = vpack.c.bf16 %v3067_v14, %v3066_v19 }
0x2111   :  { %2657 = vrot.lane.b32.xlu1 %v2654_v24, %s4291_s2 }
0x2183   :  { %v2658_v25 = vpop.permute.xlu1 %2657 }
0x2184   :  { %3814 = vmatmul.mubr.msk.f32.vlgmr.msra.gmra.mrb[32].mxu1 %vm368_vm2, %v2658_v25 }
0x2185   :  { %4045 = vmatpush3.bf16.msra.mxu1 %v4770_v7  ;;  %3835 = vmatprep.mubr.msk.f32.mxu1 %vm4288_vm1, %v4289_v21 }
0x2186   :  { %4046 = vmatprep.subr.bf16.mxu1 %v4287_v12 }
0x2189   :  { %4048 = vmatpush3.bf16.msra.mxu1 %v4787_v62 }
0x218a   :  { %4055 = vmatprep.subr.bf16.mxu1 %v4287_v12 }
0x2257   :  { %v2727_v29 = vpop.f32.mrb[32].mxu1 }
0x2258   :  { %v2731_v31 = vadd.f32 %v2727_v29, %v2230_v49  ;;  %v3815_v59 = vpop.f32.mrb[33].mxu1  ;;  %v3072_v49 = vld [vmem:[%s5027_s10 + $0x30] sm:$0xff]  ;;  %v3073_v29 = vld [vmem:[%s5027_s10 + $0x38] sm:$0xff] }
0x2259   :  { %v4065_v59 = vpack.c.bf16 %v3073_v29, %v3072_v49 }
0x225a   :  { %4247 = vtanh.f32 %v2731_v31  ;;  %v3339_v34 = vmul.f32 -1.442695, %v2731_v31 }
0x225c   :  { %4249 = vpow2.f32 %v3339_v34 }
0x2264   :  { %v4248_v33 = vpop.eup %4247 }
0x2265   :  { %2741 = vrot.lane.b32.xlu0 %v4248_v33, %s4290_s20 }
0x2266   :  { %v4250_v35 = vpop.eup %4249 }
0x2267   :  { %v2735_v37 = vadd.f32 1.0, %v4250_v35 }
0x2269   :  { %4251 = vrcp.f32 %v2735_v37 }
0x2273   :  { %v4252_v38 = vpop.eup %4251 }
0x2274   :  { %v2739_v41 = vmul.f32 %v4252_v38, %v2648_v18  ;;  %v3070_v18 = vld [vmem:[%s5027_s10 + $0x20] sm:$0xff] }
0x2275   :  { %v4062_v20 = vpack.c.bf16 %v3071_v47, %v3070_v18 }
0x22d7   :  { %v2742_v40 = vpop.permute.xlu0 %2741 }
0x22d8   :  { %v2744_v32 = vmul.f32 %v4252_v38, %v2742_v40 }
0x22da   :  { %2746 = vrot.lane.b32.xlu1 %v2744_v32, %s4291_s2 }
0x234c   :  { %v2747_v42 = vpop.permute.xlu1 %2746 }
0x234d   :  { %v2749_v43 = vadd.f32 %v2747_v42, %v2739_v41  ;;  %v3346_v42 = vld [vmem:[%s5028_s12] ss:$0 sm:$0xff]  ;;  %s4292_s12 = smov 96  }
0x234f   :  { %4253 = vtanh.f32 %v2749_v43 }
0x2359   :  { %v4254_v44 = vpop.eup %4253 }
0x235a   :  { %2752 = vrot.lane.b32.xlu0 %v4254_v44, %s4290_s20 }
0x23cc   :  { %v2753_v45 = vpop.permute.xlu0 %2752 }
0x23cd   :  { %v2755_v46 = vmul.f32 %v4252_v38, %v2753_v45 }
0x23cf   :  { %2758 = vrot.lane.b32.xlu1 %v2755_v46, %s4291_s2 }
0x2441   :  { %v2759_v39 = vpop.permute.xlu1 %2758 }
0x2442   :  { %3825 = vmatmul.mubr.msk.f32.vlgmr.msra.gmra.mrb[32].mxu0 %vm368_vm2, %v2759_v39 }
0x2443   :  { %4051 = vmatpush3.bf16.msra.mxu0 %v4770_v7  ;;  %3846 = vmatprep.mubr.msk.f32.mxu0 %vm4288_vm1, %v4289_v21 }
0x2444   :  { %4052 = vmatprep.subr.bf16.mxu0 %v4287_v12 }
0x2447   :  { %4054 = vmatpush3.bf16.msra.mxu0 %v4787_v62 }
0x2448   :  { %4067 = vmatprep.subr.bf16.mxu0 %v4287_v12 }
0x2515   :  { %v2828_v50 = vpop.f32.mrb[32].mxu0 }
0x2516   :  { %v2832_v51 = vadd.f32 %v2828_v50, %v2235_v48  ;;  %v3826_v28 = vpop.f32.mrb[33].mxu0 }
0x2518   :  { %4255 = vtanh.f32 %v2832_v51  ;;  %v3341_v7 = vmul.f32 -1.442695, %v2832_v51 }
0x251a   :  { %4257 = vpow2.f32 %v3341_v7 }
0x2522   :  { %v4256_v52 = vpop.eup %4255 }
0x2523   :  { %2842 = vrot.lane.b32.xlu0 %v4256_v52, %s4290_s20 }
0x2524   :  { %v4258_v60 = vpop.eup %4257 }
0x2525   :  { %v2836_v53 = vadd.f32 1.0, %v4258_v60 }
0x2527   :  { %4259 = vrcp.f32 %v2836_v53 }
0x2531   :  { %v4260_v54 = vpop.eup %4259 }
0x2532   :  { %v2840_v61 = vmul.f32 %v4260_v54, %v2749_v43 }
0x2595   :  { %v2843_v55 = vpop.permute.xlu0 %2842 }
0x2596   :  { %v2845_v62 = vmul.f32 %v4260_v54, %v2843_v55 }
0x2598   :  { %2847 = vrot.lane.b32.xlu1 %v2845_v62, %s4291_s2 }
0x260a   :  { %v2848_v56 = vpop.permute.xlu1 %2847 }
0x260b   :  { %v2850_v0 = vadd.f32 %v2848_v56, %v2840_v61 }
0x260d   :  { %4261 = vtanh.f32 %v2850_v0 }
0x2617   :  { %v4262_v1 = vpop.eup %4261 }
0x2618   :  { %2853 = vrot.lane.b32.xlu0 %v4262_v1, %s4290_s20  ;;  %v3182_v1 = vld [vmem:[%s5029_s13 + $0x8] sm:$0xff] }
0x268a   :  { %v2854_v13 = vpop.permute.xlu0 %2853 }
0x268b   :  { %v2856_v2 = vmul.f32 %v4260_v54, %v2854_v13  ;;  %v3183_v13 = vld [vmem:[%s5029_s13 + $0x10] sm:$0xff] }
0x268d   :  { %2859 = vrot.lane.b32.xlu1 %v2856_v2, %s4291_s2 }
0x26ff   :  { %v2860_v3 = vpop.permute.xlu1 %2859 }
0x2700   :  { %3836 = vmatmul.mubr.msk.f32.vlgmr.msra.gmra.mrb[34].mxu1 %vm368_vm2, %v2860_v3  ;;  %v3184_v3 = vld [vmem:[%s5029_s13 + $0x18] sm:$0xff] }
0x2701   :  { %3865 = vmatprep.mubr.msk.f32.mxu1 %vm4288_vm1, %v4289_v21  ;;  %4057 = vmatpush3.bf16.msra.mxu1 %v4056_v16 }
0x2702   :  { %4058 = vmatprep.subr.bf16.mxu1 %v4287_v12 }
0x2705   :  { %4060 = vmatpush3.bf16.msra.mxu1 %v4059_v17 }
0x2706   :  { %4061 = vmatprep.subr.bf16.mxu1 %v4287_v12 }
0x2709   :  { %4063 = vmatpush3.bf16.msra.mxu1 %v4062_v20 }
0x270a   :  { %4064 = vmatprep.subr.bf16.mxu1 %v4287_v12 }
0x270d   :  { %4066 = vmatpush3.bf16.msra.mxu1 %v4065_v59 }
0x27d3   :  { %v2929_v63 = vpop.f32.mrb[34].mxu1 }
0x27d4   :  { %v2933_v4 = vadd.f32 %v2929_v63, %v2240_v22  ;;  %v3837_v57 = vpop.f32.mrb[35].mxu1  ;;  %v4071_v22 = vpack.c.bf16 %v3184_v3, %v3183_v13  ;;  %v3185_v63 = vld [vmem:[%s5029_s13 + $0x20] sm:$0xff] }
0x27d6   :  { %4263 = vtanh.f32 %v2933_v4  ;;  %v3343_v8 = vmul.f32 -1.442695, %v2933_v4  ;;  %v3186_v4 = vld [vmem:[%s5029_s13 + $0x28] sm:$0xff] }
0x27d7   :  { %v4074_v57 = vpack.c.bf16 %v3186_v4, %v3185_v63 }
0x27d8   :  { %4265 = vpow2.f32 %v3343_v8  ;;  %v3187_v8 = vld [vmem:[%s5029_s13 + $0x30] sm:$0xff] }
0x27e0   :  { %v4264_v6 = vpop.eup %4263 }
0x27e1   :  { %2943 = vrot.lane.b32.xlu0 %v4264_v6, %s4290_s20 }
0x27e2   :  { %v4266_v9 = vpop.eup %4265 }
0x27e3   :  { %v2937_v10 = vadd.f32 1.0, %v4266_v9  ;;  %v3188_v9 = vld [vmem:[%s5029_s13 + $0x38] sm:$0xff] }
0x27e5   :  { %4267 = vrcp.f32 %v2937_v10 }
0x27ef   :  { %v4268_v11 = vpop.eup %4267 }
0x27f0   :  { %v2941_v24 = vmul.f32 %v4268_v11, %v2850_v0  ;;  %v3181_v0 = vld [vmem:[%s5029_s13] sm:$0xff] }
0x27f1   :  { %v4068_v2 = vpack.c.bf16 %v3182_v1, %v3181_v0 }
0x2853   :  { %v2944_v26 = vpop.permute.xlu0 %2943 }
0x2854   :  { %v2946_v36 = vmul.f32 %v4268_v11, %v2944_v26  ;;  %v4077_v26 = vpack.c.bf16 %v3188_v9, %v3187_v8 }
0x2856   :  { %2948 = vrot.lane.b32.xlu1 %v2946_v36, %s4291_s2 }
0x28c8   :  { %v2949_v25 = vpop.permute.xlu1 %2948 }
0x28c9   :  { %v2951_v31 = vadd.f32 %v2949_v25, %v2941_v24 }
0x28cb   :  { %4269 = vtanh.f32 %v2951_v31 }
0x28d5   :  { %v4270_v33 = vpop.eup %4269 }
0x28d6   :  { %2954 = vrot.lane.b32.xlu0 %v4270_v33, %s4290_s20 }
0x28da   :  { %3062 = vrot.lane.b32.xlu0 %v4856_v23, %s4291_s2  ;;  %v2245_v23 = vadd.f32 %v4891_v5, %v4811_v27 }
0x2948   :  { %v2955_v34 = vpop.permute.xlu0 %2954 }
0x2949   :  { %v2957_v35 = vmul.f32 %v4268_v11, %v2955_v34 }
0x294b   :  { %2960 = vrot.lane.b32.xlu1 %v2957_v35, %s4291_s2 }
0x294c   :  { %v3063_v37 = vpop.permute.xlu0 %3062 }
0x294d   :  { %v3065_v38 = vsel %vm368_vm2, %v4872_v58, %v3063_v37 }
0x294e   :  { %3866 = vmatmul.mubr.msk.f32.vlgmr.msra.gmra.mrb[36].mxu1 %vm2118_vm3, %v3065_v38 }
0x29bd   :  { %v2961_v40 = vpop.permute.xlu1 %2960 }
0x29be   :  { %3847 = vmatmul.mubr.msk.f32.vlgmr.msra.gmra.mrb[34].mxu0 %vm368_vm2, %v2961_v40 }
0x29bf   :  { %3884 = vmatprep.mubr.msk.f32.mxu0 %vm4288_vm1, %v4289_v21  ;;  %4069 = vmatpush3.bf16.msra.mxu0 %v4068_v2 }
0x29c0   :  { %4070 = vmatprep.subr.bf16.mxu0 %v4287_v12 }
0x29c3   :  { %4072 = vmatpush3.bf16.msra.mxu0 %v4071_v22 }
0x29c4   :  { %4073 = vmatprep.subr.bf16.mxu0 %v4287_v12 }
0x29c7   :  { %4075 = vmatpush3.bf16.msra.mxu0 %v4074_v57 }
0x29c8   :  { %4076 = vmatprep.subr.bf16.mxu0 %v4287_v12 }
0x29cb   :  { %4078 = vmatpush3.bf16.msra.mxu0 %v4077_v26 }
0x2a21   :  { %v3150_v32 = vpop.f32.mrb[36].mxu1 }
0x2a22   :  { %v3867_v41 = vpop.f32.mrb[37].mxu1  ;;  %v3151_v45 = vadd.f32 %v3346_v42, %v3150_v32 }
0x2a24   :  { %v3348_v48 = vmul.f32 -1.442695, %v3151_v45 }
0x2a91   :  { %v3030_v43 = vpop.f32.mrb[34].mxu0 }
0x2a92   :  { %v3034_v44 = vadd.f32 %v3030_v43, %v2245_v23  ;;  %v3848_v58 = vpop.f32.mrb[35].mxu0 }
0x2a94   :  { %4271 = vtanh.f32 %v3034_v44  ;;  %v3345_v21 = vmul.f32 -1.442695, %v3034_v44 }
0x2a95   :  { %4273 = vtanh.f32 %v3151_v45 }
0x2a96   :  { %4275 = vpow2.f32 %v3345_v21 }
0x2a97   :  { %4277 = vpow2.f32 %v3348_v48 }
0x2a9e   :  { %v4272_v46 = vpop.eup %4271 }
0x2a9f   :  { %3044 = vrot.lane.b32.xlu1 %v4272_v46, %s4290_s20  ;;  %v4274_v39 = vpop.eup %4273 }
0x2aa0   :  { %v4276_v27 = vpop.eup %4275 }
0x2aa1   :  { %v3038_v5 = vadd.f32 1.0, %v4276_v27  ;;  %v4278_v50 = vpop.eup %4277 }
0x2aa2   :  { %v3157_v51 = vadd.f32 1.0, %v4278_v50 }
0x2aa3   :  { %3162 = vrot.lane.b32.xlu1 %v4274_v39, %s4290_s20  ;;  %4279 = vrcp.f32 %v3038_v5 }
0x2aa4   :  { %4281 = vrcp.f32 %v3157_v51 }
0x2aad   :  { %v4280_v28 = vpop.eup %4279 }
0x2aae   :  { %v4282_v60 = vpop.eup %4281  ;;  %v3042_v62 = vmul.f32 %v4280_v28, %v2951_v31 }
0x2b11   :  { %v3045_v52 = vpop.permute.xlu1 %3044 }
0x2b12   :  { %v3047_v7 = vmul.f32 %v4280_v28, %v3045_v52 }
0x2b14   :  { %3049 = vrot.lane.b32.xlu0 %v3047_v7, %s4291_s2 }
0x2b15   :  { %v3163_v53 = vpop.permute.xlu1 %3162 }
0x2b16   :  { %v3165_v54 = vmul.f32 %v4282_v60, %v3163_v53 }
0x2b18   :  { %4283 = vtanh.f32 %v3165_v54 }
0x2b22   :  { %v4284_v55 = vpop.eup %4283 }
0x2b23   :  { %3168 = vrot.lane.b32.xlu1 %v4284_v55, %s4292_s12 }
0x2b86   :  { %v3050_v61 = vpop.permute.xlu0 %3049 }
0x2b87   :  { %v3052_v56 = vadd.f32 %v3050_v61, %v3042_v62 }
0x2b89   :  { %4285 = vtanh.f32 %v3052_v56 }
0x2b93   :  { %v4286_v6 = vpop.eup %4285 }
0x2b94   :  { %3055 = vrot.lane.b32.xlu0 %v4286_v6, %s4290_s20 }
0x2b95   :  { %v3169_v10 = vpop.permute.xlu1 %3168 }
0x2b96   :  { %v3171_v11 = vmul.f32 %v4282_v60, %v3169_v10 }
0x2b98   :  { %3177 = vrot.lane.b32.xlu1 %v3171_v11, %s4290_s20 }
0x2c06   :  { %v3056_v36 = vpop.permute.xlu0 %3055 }
0x2c07   :  { %v3058_v19 = vmul.f32 %v4280_v28, %v3056_v36 }
0x2c09   :  { %3173 = vrot.lane.b32.xlu0 %v3058_v19, %s4291_s2 }
0x2c0a   :  { %v3178_v14 = vpop.permute.xlu1 %3177 }
0x2c7b   :  { %v3174_v15 = vpop.permute.xlu0 %3173 }
0x2c7c   :  { %v3180_v16 = vsel %vm368_vm2, %v3174_v15, %v3178_v14 }
0x2c7d   :  { %3885 = vmatmul.mubr.msk.f32.vlgmr.msra.gmra.mrb[36].mxu0 %vm2118_vm3, %v3180_v16 }
0x2d50   :  { %v3265_v17 = vpop.f32.mrb[36].mxu0 }
0x2d51   :  { %v3266_v18 = vadd.f32 %v3349_v30, %v3265_v17  ;;  %v3886_v12 = vpop.f32.mrb[37].mxu0 }
0x2d53   :  { %3269 = vst [vmem:[%s5031_s15] sm:$0xff] %v3266_v18 }

</bundles_post_ra>
